<compile_context>
chip_gen: v5e
topology: v5e:2x2
jax: 0.10.0
libtpu: 0.0.40
codegen_flags: <defaults>
</compile_context>

<pallas_src>
import jax
import jax.numpy as jnp
from jax import lax
from jax.experimental import pallas as pl
from jax.experimental.pallas import tpu as pltpu

VMEM_SPEC = pl.BlockSpec(memory_space=pltpu.MemorySpace.VMEM)


# ----------------------------------------------------------------------------
# Fully fused kernel:
#   per view: relu(GCN1) -> relu(GAT) -> relu(GCN2)
#   then:     channel means -> fc1 -> relu -> fc2 -> sigmoid -> gated relu -> 1x1 conv
# ----------------------------------------------------------------------------
def _embedding_kernel(adjs_ref, x_ref, w1cat_ref, b1_ref, w2_ref, b2_ref,
                      gw_ref, asrc_ref, adst_ref, ce_ref, gb_ref,
                      fc1w_ref, fc1b_ref, fc2w_ref, fc2b_ref,
                      cw_ref, cb_ref, o_ref):
    nview, n, _ = adjs_ref.shape
    f = x_ref.shape[1]
    heads = asrc_ref.shape[1]
    hf = heads * f

    x = x_ref[...]                                   # (N, F), shared across views

    # Batched GCN1 projection for all views at once: (N, F) @ (F, V*F).
    xw1_all = jnp.dot(x, w1cat_ref[...], preferred_element_type=jnp.float32)

    # Head-block pool: pool[k, h] = 1 iff lane k lies in head h's F-wide block.
    # (built once, hoisted; comparisons avoid vector integer division)
    rr = lax.broadcasted_iota(jnp.int32, (hf, heads), 0)
    cc = lax.broadcasted_iota(jnp.int32, (hf, heads), 1)
    head_pool = ((rr >= cc * f) & (rr < (cc + 1) * f)).astype(jnp.float32)

    feats = []                                       # channel order per view: [x3, x2, x1]
    for v in range(nview):                           # static unroll (3 views)
        a = adjs_ref[v]                              # (N, N) dense edge weights / attrs

        # Symmetric GCN normalization, hoisted and reused by both GCN layers.
        deg_r = jnp.maximum(jnp.sum(a, axis=1, keepdims=True), 1e-12)
        deg_c = jnp.maximum(jnp.sum(a, axis=0, keepdims=True), 1e-12)
        a_hat = lax.rsqrt(deg_r) * a * lax.rsqrt(deg_c)

        # relu(GCN1): aggregation of the pre-batched projection block.
        x1 = jnp.maximum(
            jnp.dot(a_hat, xw1_all[:, v * f:(v + 1) * f],
                    preferred_element_type=jnp.float32) + b1_ref[v], 0.0)

        # ---- GAT (heads=2, concat=False, edge_dim=1 folded to a per-head scalar) ----
        h_all = jnp.dot(x1, gw_ref[v], preferred_element_type=jnp.float32)   # (N, H*F)
        # Both heads' dst scores via one pool contraction; both src scores via one
        # block-diagonal contraction (no per-head M=1 MXU pushes, no concatenates).
        sdst = jnp.dot(h_all * adst_ref[v], head_pool,
                       preferred_element_type=jnp.float32)                   # (N, H)
        ssrc = lax.dot_general(asrc_ref[v], h_all, (((1,), (1,)), ((), ())),
                               preferred_element_type=jnp.float32)           # (H, N)
        ce = ce_ref[v]                                                       # (1, H)

        x2 = None
        for hd in range(heads):
            hh = h_all[:, hd * f:(hd + 1) * f]                               # (N, F)
            logits = sdst[:, hd:hd + 1] + ssrc[hd:hd + 1, :] + ce[0:1, hd:hd + 1] * a
            logits = jnp.where(logits > 0, logits, 0.2 * logits)             # LeakyReLU(0.2)
            logits = logits - jnp.max(logits, axis=1, keepdims=True)
            p = jnp.exp(logits)
            inv_den = pl.reciprocal(jnp.sum(p, axis=1, keepdims=True), approx=True)  # EUP
            contrib = jnp.dot(p * inv_den, hh, preferred_element_type=jnp.float32)
            x2 = contrib if x2 is None else x2 + contrib
        x2 = jnp.maximum(x2 * (1.0 / heads) + gb_ref[v], 0.0)                # head mean+bias+relu

        # relu(GCN2) on x1, reusing a_hat.
        x3 = jnp.maximum(
            jnp.dot(a_hat,
                    jnp.dot(x1, w2_ref[v], preferred_element_type=jnp.float32),
                    preferred_element_type=jnp.float32) + b2_ref[v], 0.0)

        feats += [x3, x2, x1]                        # torch cat order: (.._3, .._2, .._1)

    # ---- Fused channel-attention epilogue (squeeze-excite + 1x1 conv) ----
    # Squeeze: per-channel global average pool folded straight into fc1 as
    # scalar-weighted fc1 rows (pure VPU/XLU, no tiny M=1 matmuls).
    inv_nf = 1.0 / (n * f)
    h = fc1b_ref[...]                                # (1, HID)
    for c, xc in enumerate(feats):
        m = jnp.sum(jnp.sum(xc, axis=1, keepdims=True), axis=0, keepdims=True) * inv_nf
        h = h + m * fc1w_ref[c:c + 1, :]
    h = jnp.maximum(h, 0.0)                          # relu(fc1)
    att = jax.nn.sigmoid(
        jnp.dot(h, fc2w_ref[...], preferred_element_type=jnp.float32) + fc2b_ref[...])  # (1, C)

    # Excite (gated relu) + 1x1 conv accumulated directly into the (N, F) output.
    out = jnp.zeros((n, f), jnp.float32) + cb_ref[0:1, 0:1]
    for c, xc in enumerate(feats):
        out = out + cw_ref[0:1, c:c + 1] * jnp.maximum(att[0:1, c:c + 1] * xc, 0.0)
    o_ref[...] = out


def embedding_m_forward(adjs, x_m, gcn1_w, gcn1_b, gcn2_w, gcn2_b,
                        gat_w, gat_asrc, gat_adst, gat_ce, gat_b,
                        fc1_w, fc1_b, fc2_w, fc2_b, conv_w, conv_b):
    nview, n, _ = adjs.shape
    f = x_m.shape[1]
    heads = gat_asrc.shape[1]
    hf = heads * f

    # One-time layout prep (outside the kernel): GCN1 weights concatenated along
    # the output axis so all views share one X @ W projection; att_src expanded
    # to a block-diagonal (H, H*F) per view so both heads' source scores come
    # from a single contraction; att_dst flattened lane-major to (1, H*F).
    w1_cat = jnp.transpose(gcn1_w, (1, 0, 2)).reshape(f, nview * f)
    eye_h = jnp.eye(heads, dtype=gat_asrc.dtype)
    asrc_blk = (eye_h[None, :, :, None] * gat_asrc[:, None, :, :]).reshape(nview, heads, hf)
    adst_flat = gat_adst.reshape(nview, 1, hf)

    # Advisory cost model (f32 throughout).
    flops = 2 * n * f * nview * f                                  # batched GCN1 projection
    per_view = (2 * n * n * f                                      # GCN1 aggregation
                + 2 * n * f * hf                                   # GAT projection
                + 2 * n * hf * heads + 2 * heads * hf * n          # sdst pool + ssrc block-diag
                + heads * 2 * n * n * f                            # per-head alpha @ h
                + 2 * n * f * f + 2 * n * n * f)                   # GCN2
    flops = int(flops + nview * per_view)
    transcendentals = int(nview * heads * n * n + 3 * nview)
    bytes_accessed = int(4 * (adjs.size + x_m.size + w1_cat.size + gcn1_b.size
                              + gcn2_w.size + gcn2_b.size + gat_w.size + asrc_blk.size
                              + adst_flat.size + gat_ce.size + gat_b.size + fc1_w.size
                              + fc1_b.size + fc2_w.size + fc2_b.size + conv_w.size
                              + conv_b.size + n * f))

    return pl.pallas_call(
        _embedding_kernel,
        out_shape=jax.ShapeDtypeStruct((n, f), jnp.float32),
        in_specs=[VMEM_SPEC] * 17,
        out_specs=VMEM_SPEC,
        compiler_params=pltpu.CompilerParams(
            # Actual resident footprint is < 1 MiB at N=F=32 (incl. 128-lane
            # padding); 8 MiB leaves ample headroom.  Re-derive before scaling N.
            vmem_limit_bytes=8 * 1024 * 1024),
        cost_estimate=pl.CostEstimate(flops=flops,
                                      transcendentals=transcendentals,
                                      bytes_accessed=bytes_accessed),
    )(adjs, x_m, w1_cat, gcn1_b, gcn2_w, gcn2_b,
      gat_w, asrc_blk, adst_flat, gat_ce, gat_b,
      fc1_w, fc1_b, fc2_w, fc2_b, conv_w, conv_b)


# ----------------------------------------------------------------------------
# Driver
# ----------------------------------------------------------------------------
if __name__ == "__main__":
    N, F = 32, 32            # miRNA_number, fm   (small synthetic sizes)
    VIEW, LAYERS = 3, 3
    C = VIEW * LAYERS        # 9 stacked channels (x_?3, x_?2, x_?1 per view)
    HID = 5 * C              # fc1 hidden = 45
    HEADS = 2

    key = jax.random.PRNGKey(0)
    ks = iter(jax.random.split(key, 64))

    def nrm(shape, scale):
        return (scale * jax.random.normal(next(ks), shape)).astype(jnp.float32)

    # stand-in for torch.manual_seed(1); torch.randn(miRNA_number, fm)
    x_m = nrm((N, F), 1.0)

    # dense symmetric similarity matrices for views f / s / g (diag = 1 self loops)
    eye = jnp.eye(N, dtype=jnp.float32)
    adj_list = []
    for _ in range(VIEW):
        r = jax.random.uniform(next(ks), (N, N), dtype=jnp.float32)
        sym = 0.5 * (r + r.T)
        adj_list.append(sym * (1.0 - eye) + eye)
    adjs = jnp.stack(adj_list, axis=0)               # (VIEW, N, N)

    # deterministic synthetic parameters, stacked per view (shapes follow __init__)
    gcn1_w = nrm((VIEW, F, F), F ** -0.5)
    gcn1_b = nrm((VIEW, 1, F), 0.01)
    gcn2_w = nrm((VIEW, F, F), F ** -0.5)
    gcn2_b = nrm((VIEW, 1, F), 0.01)
    gat_w = nrm((VIEW, F, HEADS * F), F ** -0.5)
    gat_asrc = nrm((VIEW, HEADS, F), F ** -0.5)
    gat_adst = nrm((VIEW, HEADS, F), F ** -0.5)
    gat_ce = nrm((VIEW, 1, HEADS), 1.0)              # (lin_edge . att_edge) scalar per head
    gat_b = nrm((VIEW, 1, F), 0.01)

    fc1_w = nrm((C, HID), C ** -0.5)
    fc1_b = nrm((1, HID), 0.01)
    fc2_w = nrm((HID, C), HID ** -0.5)
    fc2_b = nrm((1, C), 0.01)
    conv_w = nrm((1, C), C ** -0.5)                  # Conv2d(C, 1, kernel=1) weights
    conv_b = nrm((1, 1), 0.01)                       # Conv2d bias

    @jax.jit
    def forward(x_m, adjs):
        return embedding_m_forward(adjs, x_m, gcn1_w, gcn1_b, gcn2_w, gcn2_b,
                                   gat_w, gat_asrc, gat_adst, gat_ce, gat_b,
                                   fc1_w, fc1_b, fc2_w, fc2_b, conv_w, conv_b)

    out = forward(x_m, adjs)
    jax.block_until_ready(out)
    assert out.shape == (N, F)
    assert bool(jnp.all(jnp.isfinite(out)))
    print("KERNEL_OK")
</pallas_src>

<mosaic_0001>
module attributes {stable_mosaic.version = 11 : i64} {
  func.func @_embedding_kernel(%arg0: memref<3x32x32xf32, #tpu.memory_space<vmem>>, %arg1: memref<32x32xf32, #tpu.memory_space<vmem>>, %arg2: memref<32x96xf32, #tpu.memory_space<vmem>>, %arg3: memref<3x1x32xf32, #tpu.memory_space<vmem>>, %arg4: memref<3x32x32xf32, #tpu.memory_space<vmem>>, %arg5: memref<3x1x32xf32, #tpu.memory_space<vmem>>, %arg6: memref<3x32x64xf32, #tpu.memory_space<vmem>>, %arg7: memref<3x2x64xf32, #tpu.memory_space<vmem>>, %arg8: memref<3x1x64xf32, #tpu.memory_space<vmem>>, %arg9: memref<3x1x2xf32, #tpu.memory_space<vmem>>, %arg10: memref<3x1x32xf32, #tpu.memory_space<vmem>>, %arg11: memref<9x45xf32, #tpu.memory_space<vmem>>, %arg12: memref<1x45xf32, #tpu.memory_space<vmem>>, %arg13: memref<45x9xf32, #tpu.memory_space<vmem>>, %arg14: memref<1x9xf32, #tpu.memory_space<vmem>>, %arg15: memref<1x9xf32, #tpu.memory_space<vmem>>, %arg16: memref<1x1xf32, #tpu.memory_space<vmem>>, %arg17: memref<32x32xf32, #tpu.memory_space<vmem>>) attributes {dimension_semantics = [], scalar_prefetch = 0 : i64, scratch_operands = 0 : i64, tpu.core_type = #tpu.core_type<tc>} {
    %c0 = arith.constant 0 : index
    %c0_0 = arith.constant 0 : index
    %0 = vector.load %arg1[%c0, %c0_0] : memref<32x32xf32, #tpu.memory_space<vmem>>, vector<32x32xf32>
    %c0_1 = arith.constant 0 : index
    %c0_2 = arith.constant 0 : index
    %1 = vector.load %arg2[%c0_1, %c0_2] : memref<32x96xf32, #tpu.memory_space<vmem>>, vector<32x96xf32>
    %cst = arith.constant dense<0.000000e+00> : vector<32x96xf32>
    %2 = tpu.matmul %0, %1, %cst {dimension_numbers = #tpu.dot_dimension_numbers<[1], [0], [0], [1], [0, 0, 1, 1], [], []>} : vector<32x32xf32>, vector<32x96xf32>, vector<32x96xf32> -> vector<32x96xf32>
    %3 = tpu.iota {dimensions = array<i32: 0>} : vector<64x2xi32>
    %4 = tpu.iota {dimensions = array<i32: 1>} : vector<64x2xi32>
    %c32_i32 = arith.constant 32 : i32
    %5 = vector.broadcast %c32_i32 : i32 to vector<64x2xi32>
    %6 = arith.muli %4, %5 : vector<64x2xi32>
    %7 = arith.cmpi sge, %3, %6 : vector<64x2xi32>
    %c1_i32 = arith.constant 1 : i32
    %8 = vector.broadcast %c1_i32 : i32 to vector<64x2xi32>
    %9 = arith.addi %4, %8 : vector<64x2xi32>
    %c32_i32_3 = arith.constant 32 : i32
    %10 = vector.broadcast %c32_i32_3 : i32 to vector<64x2xi32>
    %11 = arith.muli %9, %10 : vector<64x2xi32>
    %12 = arith.cmpi slt, %3, %11 : vector<64x2xi32>
    %13 = arith.andi %7, %12 : vector<64x2xi1>
    %14 = arith.extui %13 : vector<64x2xi1> to vector<64x2xi32>
    %15 = arith.sitofp %14 : vector<64x2xi32> to vector<64x2xf32>
    %c0_4 = arith.constant 0 : index
    %c0_5 = arith.constant 0 : index
    %c0_6 = arith.constant 0 : index
    %16 = vector.load %arg0[%c0_4, %c0_5, %c0_6] : memref<3x32x32xf32, #tpu.memory_space<vmem>>, vector<1x32x32xf32>
    %17 = vector.shape_cast %16 : vector<1x32x32xf32> to vector<32x32xf32>
    %cst_7 = arith.constant dense<0.000000e+00> : vector<32xf32>
    %18 = vector.multi_reduction <add>, %17, %cst_7 [1] : vector<32x32xf32> to vector<32xf32>
    %19 = vector.shape_cast %18 : vector<32xf32> to vector<32x1xf32>
    %cst_8 = arith.constant 9.99999996E-13 : f32
    %20 = vector.broadcast %cst_8 : f32 to vector<32x1xf32>
    %21 = arith.maximumf %19, %20 : vector<32x1xf32>
    %cst_9 = arith.constant dense<0.000000e+00> : vector<32xf32>
    %22 = vector.multi_reduction <add>, %17, %cst_9 [0] : vector<32x32xf32> to vector<32xf32>
    %23 = vector.shape_cast %22 : vector<32xf32> to vector<1x32xf32>
    %cst_10 = arith.constant 9.99999996E-13 : f32
    %24 = vector.broadcast %cst_10 : f32 to vector<1x32xf32>
    %25 = arith.maximumf %23, %24 : vector<1x32xf32>
    %26 = math.rsqrt %21 : vector<32x1xf32>
    %27 = vector.broadcast %26 : vector<32x1xf32> to vector<32x32xf32>
    %28 = arith.mulf %27, %17 : vector<32x32xf32>
    %29 = math.rsqrt %25 : vector<1x32xf32>
    %30 = vector.broadcast %29 : vector<1x32xf32> to vector<32x32xf32>
    %31 = arith.mulf %28, %30 : vector<32x32xf32>
    %32 = vector.extract_strided_slice %2 {offsets = [0, 0], sizes = [32, 32], strides = [1, 1]} : vector<32x96xf32> to vector<32x32xf32>
    %cst_11 = arith.constant dense<0.000000e+00> : vector<32x32xf32>
    %33 = tpu.matmul %31, %32, %cst_11 {dimension_numbers = #tpu.dot_dimension_numbers<[1], [0], [0], [1], [0, 0, 1, 1], [], []>} : vector<32x32xf32>, vector<32x32xf32>, vector<32x32xf32> -> vector<32x32xf32>
    %c0_12 = arith.constant 0 : index
    %c0_13 = arith.constant 0 : index
    %c0_14 = arith.constant 0 : index
    %34 = vector.load %arg3[%c0_12, %c0_13, %c0_14] : memref<3x1x32xf32, #tpu.memory_space<vmem>>, vector<1x1x32xf32>
    %35 = vector.shape_cast %34 : vector<1x1x32xf32> to vector<1x32xf32>
    %36 = vector.broadcast %35 : vector<1x32xf32> to vector<32x32xf32>
    %37 = arith.addf %33, %36 : vector<32x32xf32>
    %cst_15 = arith.constant 0.000000e+00 : f32
    %38 = vector.broadcast %cst_15 : f32 to vector<32x32xf32>
    %39 = arith.maximumf %37, %38 : vector<32x32xf32>
    %c0_16 = arith.constant 0 : index
    %c0_17 = arith.constant 0 : index
    %c0_18 = arith.constant 0 : index
    %40 = vector.load %arg6[%c0_16, %c0_17, %c0_18] : memref<3x32x64xf32, #tpu.memory_space<vmem>>, vector<1x32x64xf32>
    %41 = vector.shape_cast %40 : vector<1x32x64xf32> to vector<32x64xf32>
    %cst_19 = arith.constant dense<0.000000e+00> : vector<32x64xf32>
    %42 = tpu.matmul %39, %41, %cst_19 {dimension_numbers = #tpu.dot_dimension_numbers<[1], [0], [0], [1], [0, 0, 1, 1], [], []>} : vector<32x32xf32>, vector<32x64xf32>, vector<32x64xf32> -> vector<32x64xf32>
    %c0_20 = arith.constant 0 : index
    %c0_21 = arith.constant 0 : index
    %c0_22 = arith.constant 0 : index
    %43 = vector.load %arg8[%c0_20, %c0_21, %c0_22] : memref<3x1x64xf32, #tpu.memory_space<vmem>>, vector<1x1x64xf32>
    %44 = vector.shape_cast %43 : vector<1x1x64xf32> to vector<1x64xf32>
    %45 = vector.broadcast %44 : vector<1x64xf32> to vector<32x64xf32>
    %46 = arith.mulf %42, %45 : vector<32x64xf32>
    %cst_23 = arith.constant dense<0.000000e+00> : vector<32x2xf32>
    %47 = tpu.matmul %46, %15, %cst_23 {dimension_numbers = #tpu.dot_dimension_numbers<[1], [0], [0], [1], [0, 0, 1, 1], [], []>} : vector<32x64xf32>, vector<64x2xf32>, vector<32x2xf32> -> vector<32x2xf32>
    %c0_24 = arith.constant 0 : index
    %c0_25 = arith.constant 0 : index
    %c0_26 = arith.constant 0 : index
    %48 = vector.load %arg7[%c0_24, %c0_25, %c0_26] : memref<3x2x64xf32, #tpu.memory_space<vmem>>, vector<1x2x64xf32>
    %49 = vector.shape_cast %48 : vector<1x2x64xf32> to vector<2x64xf32>
    %cst_27 = arith.constant dense<0.000000e+00> : vector<2x32xf32>
    %50 = tpu.matmul %49, %42, %cst_27 {dimension_numbers = #tpu.dot_dimension_numbers<[1], [1], [0], [0], [0, 0, 1, 0], [], []>} : vector<2x64xf32>, vector<32x64xf32>, vector<2x32xf32> -> vector<2x32xf32>
    %c0_28 = arith.constant 0 : index
    %c0_29 = arith.constant 0 : index
    %c0_30 = arith.constant 0 : index
    %51 = vector.load %arg9[%c0_28, %c0_29, %c0_30] : memref<3x1x2xf32, #tpu.memory_space<vmem>>, vector<1x1x2xf32>
    %52 = vector.shape_cast %51 : vector<1x1x2xf32> to vector<1x2xf32>
    %53 = vector.extract_strided_slice %42 {offsets = [0, 0], sizes = [32, 32], strides = [1, 1]} : vector<32x64xf32> to vector<32x32xf32>
    %54 = vector.extract_strided_slice %47 {offsets = [0, 0], sizes = [32, 1], strides = [1, 1]} : vector<32x2xf32> to vector<32x1xf32>
    %55 = vector.extract_strided_slice %50 {offsets = [0, 0], sizes = [1, 32], strides = [1, 1]} : vector<2x32xf32> to vector<1x32xf32>
    %56 = vector.broadcast %54 : vector<32x1xf32> to vector<32x32xf32>
    %57 = vector.broadcast %55 : vector<1x32xf32> to vector<32x32xf32>
    %58 = arith.addf %56, %57 : vector<32x32xf32>
    %59 = vector.extract_strided_slice %52 {offsets = [0, 0], sizes = [1, 1], strides = [1, 1]} : vector<1x2xf32> to vector<1x1xf32>
    %60 = vector.broadcast %59 : vector<1x1xf32> to vector<32x32xf32>
    %61 = arith.mulf %60, %17 : vector<32x32xf32>
    %62 = arith.addf %58, %61 : vector<32x32xf32>
    %cst_31 = arith.constant 0.000000e+00 : f32
    %63 = vector.broadcast %cst_31 : f32 to vector<32x32xf32>
    %64 = arith.cmpf ogt, %62, %63 : vector<32x32xf32>
    %cst_32 = arith.constant 2.000000e-01 : f32
    %65 = vector.broadcast %cst_32 : f32 to vector<32x32xf32>
    %66 = arith.mulf %65, %62 : vector<32x32xf32>
    %67 = arith.select %64, %62, %66 : vector<32x32xi1>, vector<32x32xf32>
    %cst_33 = arith.constant dense<0xFF800000> : vector<32xf32>
    %68 = vector.multi_reduction <maximumf>, %67, %cst_33 [1] : vector<32x32xf32> to vector<32xf32>
    %69 = vector.shape_cast %68 : vector<32xf32> to vector<32x1xf32>
    %70 = vector.broadcast %69 : vector<32x1xf32> to vector<32x32xf32>
    %71 = arith.subf %67, %70 : vector<32x32xf32>
    %72 = math.exp %71 : vector<32x32xf32>
    %cst_34 = arith.constant dense<0.000000e+00> : vector<32xf32>
    %73 = vector.multi_reduction <add>, %72, %cst_34 [1] : vector<32x32xf32> to vector<32xf32>
    %74 = vector.shape_cast %73 : vector<32xf32> to vector<32x1xf32>
    %75 = tpu.reciprocal %74 {approx = true} : vector<32x1xf32> -> vector<32x1xf32>
    %76 = vector.broadcast %75 : vector<32x1xf32> to vector<32x32xf32>
    %77 = arith.mulf %72, %76 : vector<32x32xf32>
    %cst_35 = arith.constant dense<0.000000e+00> : vector<32x32xf32>
    %78 = tpu.matmul %77, %53, %cst_35 {dimension_numbers = #tpu.dot_dimension_numbers<[1], [0], [0], [1], [0, 0, 1, 1], [], []>} : vector<32x32xf32>, vector<32x32xf32>, vector<32x32xf32> -> vector<32x32xf32>
    %79 = vector.extract_strided_slice %42 {offsets = [0, 32], sizes = [32, 32], strides = [1, 1]} : vector<32x64xf32> to vector<32x32xf32>
    %80 = vector.extract_strided_slice %47 {offsets = [0, 1], sizes = [32, 1], strides = [1, 1]} : vector<32x2xf32> to vector<32x1xf32>
    %81 = vector.extract_strided_slice %50 {offsets = [1, 0], sizes = [1, 32], strides = [1, 1]} : vector<2x32xf32> to vector<1x32xf32>
    %82 = vector.broadcast %80 : vector<32x1xf32> to vector<32x32xf32>
    %83 = vector.broadcast %81 : vector<1x32xf32> to vector<32x32xf32>
    %84 = arith.addf %82, %83 : vector<32x32xf32>
    %85 = vector.extract_strided_slice %52 {offsets = [0, 1], sizes = [1, 1], strides = [1, 1]} : vector<1x2xf32> to vector<1x1xf32>
    %86 = vector.broadcast %85 : vector<1x1xf32> to vector<32x32xf32>
    %87 = arith.mulf %86, %17 : vector<32x32xf32>
    %88 = arith.addf %84, %87 : vector<32x32xf32>
    %cst_36 = arith.constant 0.000000e+00 : f32
    %89 = vector.broadcast %cst_36 : f32 to vector<32x32xf32>
    %90 = arith.cmpf ogt, %88, %89 : vector<32x32xf32>
    %cst_37 = arith.constant 2.000000e-01 : f32
    %91 = vector.broadcast %cst_37 : f32 to vector<32x32xf32>
    %92 = arith.mulf %91, %88 : vector<32x32xf32>
    %93 = arith.select %90, %88, %92 : vector<32x32xi1>, vector<32x32xf32>
    %cst_38 = arith.constant dense<0xFF800000> : vector<32xf32>
    %94 = vector.multi_reduction <maximumf>, %93, %cst_38 [1] : vector<32x32xf32> to vector<32xf32>
    %95 = vector.shape_cast %94 : vector<32xf32> to vector<32x1xf32>
    %96 = vector.broadcast %95 : vector<32x1xf32> to vector<32x32xf32>
    %97 = arith.subf %93, %96 : vector<32x32xf32>
    %98 = math.exp %97 : vector<32x32xf32>
    %cst_39 = arith.constant dense<0.000000e+00> : vector<32xf32>
    %99 = vector.multi_reduction <add>, %98, %cst_39 [1] : vector<32x32xf32> to vector<32xf32>
    %100 = vector.shape_cast %99 : vector<32xf32> to vector<32x1xf32>
    %101 = tpu.reciprocal %100 {approx = true} : vector<32x1xf32> -> vector<32x1xf32>
    %102 = vector.broadcast %101 : vector<32x1xf32> to vector<32x32xf32>
    %103 = arith.mulf %98, %102 : vector<32x32xf32>
    %cst_40 = arith.constant dense<0.000000e+00> : vector<32x32xf32>
    %104 = tpu.matmul %103, %79, %cst_40 {dimension_numbers = #tpu.dot_dimension_numbers<[1], [0], [0], [1], [0, 0, 1, 1], [], []>} : vector<32x32xf32>, vector<32x32xf32>, vector<32x32xf32> -> vector<32x32xf32>
    %105 = arith.addf %78, %104 : vector<32x32xf32>
    %cst_41 = arith.constant 5.000000e-01 : f32
    %106 = vector.broadcast %cst_41 : f32 to vector<32x32xf32>
    %107 = arith.mulf %105, %106 : vector<32x32xf32>
    %c0_42 = arith.constant 0 : index
    %c0_43 = arith.constant 0 : index
    %c0_44 = arith.constant 0 : index
    %108 = vector.load %arg10[%c0_42, %c0_43, %c0_44] : memref<3x1x32xf32, #tpu.memory_space<vmem>>, vector<1x1x32xf32>
    %109 = vector.shape_cast %108 : vector<1x1x32xf32> to vector<1x32xf32>
    %110 = vector.broadcast %109 : vector<1x32xf32> to vector<32x32xf32>
    %111 = arith.addf %107, %110 : vector<32x32xf32>
    %cst_45 = arith.constant 0.000000e+00 : f32
    %112 = vector.broadcast %cst_45 : f32 to vector<32x32xf32>
    %113 = arith.maximumf %111, %112 : vector<32x32xf32>
    %c0_46 = arith.constant 0 : index
    %c0_47 = arith.constant 0 : index
    %c0_48 = arith.constant 0 : index
    %114 = vector.load %arg4[%c0_46, %c0_47, %c0_48] : memref<3x32x32xf32, #tpu.memory_space<vmem>>, vector<1x32x32xf32>
    %115 = vector.shape_cast %114 : vector<1x32x32xf32> to vector<32x32xf32>
    %cst_49 = arith.constant dense<0.000000e+00> : vector<32x32xf32>
    %116 = tpu.matmul %39, %115, %cst_49 {dimension_numbers = #tpu.dot_dimension_numbers<[1], [0], [0], [1], [0, 0, 1, 1], [], []>} : vector<32x32xf32>, vector<32x32xf32>, vector<32x32xf32> -> vector<32x32xf32>
    %cst_50 = arith.constant dense<0.000000e+00> : vector<32x32xf32>
    %117 = tpu.matmul %31, %116, %cst_50 {dimension_numbers = #tpu.dot_dimension_numbers<[1], [0], [0], [1], [0, 0, 1, 1], [], []>} : vector<32x32xf32>, vector<32x32xf32>, vector<32x32xf32> -> vector<32x32xf32>
    %c0_51 = arith.constant 0 : index
    %c0_52 = arith.constant 0 : index
    %c0_53 = arith.constant 0 : index
    %118 = vector.load %arg5[%c0_51, %c0_52, %c0_53] : memref<3x1x32xf32, #tpu.memory_space<vmem>>, vector<1x1x32xf32>
    %119 = vector.shape_cast %118 : vector<1x1x32xf32> to vector<1x32xf32>
    %120 = vector.broadcast %119 : vector<1x32xf32> to vector<32x32xf32>
    %121 = arith.addf %117, %120 : vector<32x32xf32>
    %cst_54 = arith.constant 0.000000e+00 : f32
    %122 = vector.broadcast %cst_54 : f32 to vector<32x32xf32>
    %123 = arith.maximumf %121, %122 : vector<32x32xf32>
    %c1 = arith.constant 1 : index
    %c0_55 = arith.constant 0 : index
    %c0_56 = arith.constant 0 : index
    %124 = vector.load %arg0[%c1, %c0_55, %c0_56] : memref<3x32x32xf32, #tpu.memory_space<vmem>>, vector<1x32x32xf32>
    %125 = vector.shape_cast %124 : vector<1x32x32xf32> to vector<32x32xf32>
    %cst_57 = arith.constant dense<0.000000e+00> : vector<32xf32>
    %126 = vector.multi_reduction <add>, %125, %cst_57 [1] : vector<32x32xf32> to vector<32xf32>
    %127 = vector.shape_cast %126 : vector<32xf32> to vector<32x1xf32>
    %cst_58 = arith.constant 9.99999996E-13 : f32
    %128 = vector.broadcast %cst_58 : f32 to vector<32x1xf32>
    %129 = arith.maximumf %127, %128 : vector<32x1xf32>
    %cst_59 = arith.constant dense<0.000000e+00> : vector<32xf32>
    %130 = vector.multi_reduction <add>, %125, %cst_59 [0] : vector<32x32xf32> to vector<32xf32>
    %131 = vector.shape_cast %130 : vector<32xf32> to vector<1x32xf32>
    %cst_60 = arith.constant 9.99999996E-13 : f32
    %132 = vector.broadcast %cst_60 : f32 to vector<1x32xf32>
    %133 = arith.maximumf %131, %132 : vector<1x32xf32>
    %134 = math.rsqrt %129 : vector<32x1xf32>
    %135 = vector.broadcast %134 : vector<32x1xf32> to vector<32x32xf32>
    %136 = arith.mulf %135, %125 : vector<32x32xf32>
    %137 = math.rsqrt %133 : vector<1x32xf32>
    %138 = vector.broadcast %137 : vector<1x32xf32> to vector<32x32xf32>
    %139 = arith.mulf %136, %138 : vector<32x32xf32>
    %140 = vector.extract_strided_slice %2 {offsets = [0, 32], sizes = [32, 32], strides = [1, 1]} : vector<32x96xf32> to vector<32x32xf32>
    %cst_61 = arith.constant dense<0.000000e+00> : vector<32x32xf32>
    %141 = tpu.matmul %139, %140, %cst_61 {dimension_numbers = #tpu.dot_dimension_numbers<[1], [0], [0], [1], [0, 0, 1, 1], [], []>} : vector<32x32xf32>, vector<32x32xf32>, vector<32x32xf32> -> vector<32x32xf32>
    %c1_62 = arith.constant 1 : index
    %c0_63 = arith.constant 0 : index
    %c0_64 = arith.constant 0 : index
    %142 = vector.load %arg3[%c1_62, %c0_63, %c0_64] : memref<3x1x32xf32, #tpu.memory_space<vmem>>, vector<1x1x32xf32>
    %143 = vector.shape_cast %142 : vector<1x1x32xf32> to vector<1x32xf32>
    %144 = vector.broadcast %143 : vector<1x32xf32> to vector<32x32xf32>
    %145 = arith.addf %141, %144 : vector<32x32xf32>
    %cst_65 = arith.constant 0.000000e+00 : f32
    %146 = vector.broadcast %cst_65 : f32 to vector<32x32xf32>
    %147 = arith.maximumf %145, %146 : vector<32x32xf32>
    %c1_66 = arith.constant 1 : index
    %c0_67 = arith.constant 0 : index
    %c0_68 = arith.constant 0 : index
    %148 = vector.load %arg6[%c1_66, %c0_67, %c0_68] : memref<3x32x64xf32, #tpu.memory_space<vmem>>, vector<1x32x64xf32>
    %149 = vector.shape_cast %148 : vector<1x32x64xf32> to vector<32x64xf32>
    %cst_69 = arith.constant dense<0.000000e+00> : vector<32x64xf32>
    %150 = tpu.matmul %147, %149, %cst_69 {dimension_numbers = #tpu.dot_dimension_numbers<[1], [0], [0], [1], [0, 0, 1, 1], [], []>} : vector<32x32xf32>, vector<32x64xf32>, vector<32x64xf32> -> vector<32x64xf32>
    %c1_70 = arith.constant 1 : index
    %c0_71 = arith.constant 0 : index
    %c0_72 = arith.constant 0 : index
    %151 = vector.load %arg8[%c1_70, %c0_71, %c0_72] : memref<3x1x64xf32, #tpu.memory_space<vmem>>, vector<1x1x64xf32>
    %152 = vector.shape_cast %151 : vector<1x1x64xf32> to vector<1x64xf32>
    %153 = vector.broadcast %152 : vector<1x64xf32> to vector<32x64xf32>
    %154 = arith.mulf %150, %153 : vector<32x64xf32>
    %cst_73 = arith.constant dense<0.000000e+00> : vector<32x2xf32>
    %155 = tpu.matmul %154, %15, %cst_73 {dimension_numbers = #tpu.dot_dimension_numbers<[1], [0], [0], [1], [0, 0, 1, 1], [], []>} : vector<32x64xf32>, vector<64x2xf32>, vector<32x2xf32> -> vector<32x2xf32>
    %c1_74 = arith.constant 1 : index
    %c0_75 = arith.constant 0 : index
    %c0_76 = arith.constant 0 : index
    %156 = vector.load %arg7[%c1_74, %c0_75, %c0_76] : memref<3x2x64xf32, #tpu.memory_space<vmem>>, vector<1x2x64xf32>
    %157 = vector.shape_cast %156 : vector<1x2x64xf32> to vector<2x64xf32>
    %cst_77 = arith.constant dense<0.000000e+00> : vector<2x32xf32>
    %158 = tpu.matmul %157, %150, %cst_77 {dimension_numbers = #tpu.dot_dimension_numbers<[1], [1], [0], [0], [0, 0, 1, 0], [], []>} : vector<2x64xf32>, vector<32x64xf32>, vector<2x32xf32> -> vector<2x32xf32>
    %c1_78 = arith.constant 1 : index
    %c0_79 = arith.constant 0 : index
    %c0_80 = arith.constant 0 : index
    %159 = vector.load %arg9[%c1_78, %c0_79, %c0_80] : memref<3x1x2xf32, #tpu.memory_space<vmem>>, vector<1x1x2xf32>
    %160 = vector.shape_cast %159 : vector<1x1x2xf32> to vector<1x2xf32>
    %161 = vector.extract_strided_slice %150 {offsets = [0, 0], sizes = [32, 32], strides = [1, 1]} : vector<32x64xf32> to vector<32x32xf32>
    %162 = vector.extract_strided_slice %155 {offsets = [0, 0], sizes = [32, 1], strides = [1, 1]} : vector<32x2xf32> to vector<32x1xf32>
    %163 = vector.extract_strided_slice %158 {offsets = [0, 0], sizes = [1, 32], strides = [1, 1]} : vector<2x32xf32> to vector<1x32xf32>
    %164 = vector.broadcast %162 : vector<32x1xf32> to vector<32x32xf32>
    %165 = vector.broadcast %163 : vector<1x32xf32> to vector<32x32xf32>
    %166 = arith.addf %164, %165 : vector<32x32xf32>
    %167 = vector.extract_strided_slice %160 {offsets = [0, 0], sizes = [1, 1], strides = [1, 1]} : vector<1x2xf32> to vector<1x1xf32>
    %168 = vector.broadcast %167 : vector<1x1xf32> to vector<32x32xf32>
    %169 = arith.mulf %168, %125 : vector<32x32xf32>
    %170 = arith.addf %166, %169 : vector<32x32xf32>
    %cst_81 = arith.constant 0.000000e+00 : f32
    %171 = vector.broadcast %cst_81 : f32 to vector<32x32xf32>
    %172 = arith.cmpf ogt, %170, %171 : vector<32x32xf32>
    %cst_82 = arith.constant 2.000000e-01 : f32
    %173 = vector.broadcast %cst_82 : f32 to vector<32x32xf32>
    %174 = arith.mulf %173, %170 : vector<32x32xf32>
    %175 = arith.select %172, %170, %174 : vector<32x32xi1>, vector<32x32xf32>
    %cst_83 = arith.constant dense<0xFF800000> : vector<32xf32>
    %176 = vector.multi_reduction <maximumf>, %175, %cst_83 [1] : vector<32x32xf32> to vector<32xf32>
    %177 = vector.shape_cast %176 : vector<32xf32> to vector<32x1xf32>
    %178 = vector.broadcast %177 : vector<32x1xf32> to vector<32x32xf32>
    %179 = arith.subf %175, %178 : vector<32x32xf32>
    %180 = math.exp %179 : vector<32x32xf32>
    %cst_84 = arith.constant dense<0.000000e+00> : vector<32xf32>
    %181 = vector.multi_reduction <add>, %180, %cst_84 [1] : vector<32x32xf32> to vector<32xf32>
    %182 = vector.shape_cast %181 : vector<32xf32> to vector<32x1xf32>
    %183 = tpu.reciprocal %182 {approx = true} : vector<32x1xf32> -> vector<32x1xf32>
    %184 = vector.broadcast %183 : vector<32x1xf32> to vector<32x32xf32>
    %185 = arith.mulf %180, %184 : vector<32x32xf32>
    %cst_85 = arith.constant dense<0.000000e+00> : vector<32x32xf32>
    %186 = tpu.matmul %185, %161, %cst_85 {dimension_numbers = #tpu.dot_dimension_numbers<[1], [0], [0], [1], [0, 0, 1, 1], [], []>} : vector<32x32xf32>, vector<32x32xf32>, vector<32x32xf32> -> vector<32x32xf32>
    %187 = vector.extract_strided_slice %150 {offsets = [0, 32], sizes = [32, 32], strides = [1, 1]} : vector<32x64xf32> to vector<32x32xf32>
    %188 = vector.extract_strided_slice %155 {offsets = [0, 1], sizes = [32, 1], strides = [1, 1]} : vector<32x2xf32> to vector<32x1xf32>
    %189 = vector.extract_strided_slice %158 {offsets = [1, 0], sizes = [1, 32], strides = [1, 1]} : vector<2x32xf32> to vector<1x32xf32>
    %190 = vector.broadcast %188 : vector<32x1xf32> to vector<32x32xf32>
    %191 = vector.broadcast %189 : vector<1x32xf32> to vector<32x32xf32>
    %192 = arith.addf %190, %191 : vector<32x32xf32>
    %193 = vector.extract_strided_slice %160 {offsets = [0, 1], sizes = [1, 1], strides = [1, 1]} : vector<1x2xf32> to vector<1x1xf32>
    %194 = vector.broadcast %193 : vector<1x1xf32> to vector<32x32xf32>
    %195 = arith.mulf %194, %125 : vector<32x32xf32>
    %196 = arith.addf %192, %195 : vector<32x32xf32>
    %cst_86 = arith.constant 0.000000e+00 : f32
    %197 = vector.broadcast %cst_86 : f32 to vector<32x32xf32>
    %198 = arith.cmpf ogt, %196, %197 : vector<32x32xf32>
    %cst_87 = arith.constant 2.000000e-01 : f32
    %199 = vector.broadcast %cst_87 : f32 to vector<32x32xf32>
    %200 = arith.mulf %199, %196 : vector<32x32xf32>
    %201 = arith.select %198, %196, %200 : vector<32x32xi1>, vector<32x32xf32>
    %cst_88 = arith.constant dense<0xFF800000> : vector<32xf32>
    %202 = vector.multi_reduction <maximumf>, %201, %cst_88 [1] : vector<32x32xf32> to vector<32xf32>
    %203 = vector.shape_cast %202 : vector<32xf32> to vector<32x1xf32>
    %204 = vector.broadcast %203 : vector<32x1xf32> to vector<32x32xf32>
    %205 = arith.subf %201, %204 : vector<32x32xf32>
    %206 = math.exp %205 : vector<32x32xf32>
    %cst_89 = arith.constant dense<0.000000e+00> : vector<32xf32>
    %207 = vector.multi_reduction <add>, %206, %cst_89 [1] : vector<32x32xf32> to vector<32xf32>
    %208 = vector.shape_cast %207 : vector<32xf32> to vector<32x1xf32>
    %209 = tpu.reciprocal %208 {approx = true} : vector<32x1xf32> -> vector<32x1xf32>
    %210 = vector.broadcast %209 : vector<32x1xf32> to vector<32x32xf32>
    %211 = arith.mulf %206, %210 : vector<32x32xf32>
    %cst_90 = arith.constant dense<0.000000e+00> : vector<32x32xf32>
    %212 = tpu.matmul %211, %187, %cst_90 {dimension_numbers = #tpu.dot_dimension_numbers<[1], [0], [0], [1], [0, 0, 1, 1], [], []>} : vector<32x32xf32>, vector<32x32xf32>, vector<32x32xf32> -> vector<32x32xf32>
    %213 = arith.addf %186, %212 : vector<32x32xf32>
    %cst_91 = arith.constant 5.000000e-01 : f32
    %214 = vector.broadcast %cst_91 : f32 to vector<32x32xf32>
    %215 = arith.mulf %213, %214 : vector<32x32xf32>
    %c1_92 = arith.constant 1 : index
    %c0_93 = arith.constant 0 : index
    %c0_94 = arith.constant 0 : index
    %216 = vector.load %arg10[%c1_92, %c0_93, %c0_94] : memref<3x1x32xf32, #tpu.memory_space<vmem>>, vector<1x1x32xf32>
    %217 = vector.shape_cast %216 : vector<1x1x32xf32> to vector<1x32xf32>
    %218 = vector.broadcast %217 : vector<1x32xf32> to vector<32x32xf32>
    %219 = arith.addf %215, %218 : vector<32x32xf32>
    %cst_95 = arith.constant 0.000000e+00 : f32
    %220 = vector.broadcast %cst_95 : f32 to vector<32x32xf32>
    %221 = arith.maximumf %219, %220 : vector<32x32xf32>
    %c1_96 = arith.constant 1 : index
    %c0_97 = arith.constant 0 : index
    %c0_98 = arith.constant 0 : index
    %222 = vector.load %arg4[%c1_96, %c0_97, %c0_98] : memref<3x32x32xf32, #tpu.memory_space<vmem>>, vector<1x32x32xf32>
    %223 = vector.shape_cast %222 : vector<1x32x32xf32> to vector<32x32xf32>
    %cst_99 = arith.constant dense<0.000000e+00> : vector<32x32xf32>
    %224 = tpu.matmul %147, %223, %cst_99 {dimension_numbers = #tpu.dot_dimension_numbers<[1], [0], [0], [1], [0, 0, 1, 1], [], []>} : vector<32x32xf32>, vector<32x32xf32>, vector<32x32xf32> -> vector<32x32xf32>
    %cst_100 = arith.constant dense<0.000000e+00> : vector<32x32xf32>
    %225 = tpu.matmul %139, %224, %cst_100 {dimension_numbers = #tpu.dot_dimension_numbers<[1], [0], [0], [1], [0, 0, 1, 1], [], []>} : vector<32x32xf32>, vector<32x32xf32>, vector<32x32xf32> -> vector<32x32xf32>
    %c1_101 = arith.constant 1 : index
    %c0_102 = arith.constant 0 : index
    %c0_103 = arith.constant 0 : index
    %226 = vector.load %arg5[%c1_101, %c0_102, %c0_103] : memref<3x1x32xf32, #tpu.memory_space<vmem>>, vector<1x1x32xf32>
    %227 = vector.shape_cast %226 : vector<1x1x32xf32> to vector<1x32xf32>
    %228 = vector.broadcast %227 : vector<1x32xf32> to vector<32x32xf32>
    %229 = arith.addf %225, %228 : vector<32x32xf32>
    %cst_104 = arith.constant 0.000000e+00 : f32
    %230 = vector.broadcast %cst_104 : f32 to vector<32x32xf32>
    %231 = arith.maximumf %229, %230 : vector<32x32xf32>
    %c2 = arith.constant 2 : index
    %c0_105 = arith.constant 0 : index
    %c0_106 = arith.constant 0 : index
    %232 = vector.load %arg0[%c2, %c0_105, %c0_106] : memref<3x32x32xf32, #tpu.memory_space<vmem>>, vector<1x32x32xf32>
    %233 = vector.shape_cast %232 : vector<1x32x32xf32> to vector<32x32xf32>
    %cst_107 = arith.constant dense<0.000000e+00> : vector<32xf32>
    %234 = vector.multi_reduction <add>, %233, %cst_107 [1] : vector<32x32xf32> to vector<32xf32>
    %235 = vector.shape_cast %234 : vector<32xf32> to vector<32x1xf32>
    %cst_108 = arith.constant 9.99999996E-13 : f32
    %236 = vector.broadcast %cst_108 : f32 to vector<32x1xf32>
    %237 = arith.maximumf %235, %236 : vector<32x1xf32>
    %cst_109 = arith.constant dense<0.000000e+00> : vector<32xf32>
    %238 = vector.multi_reduction <add>, %233, %cst_109 [0] : vector<32x32xf32> to vector<32xf32>
    %239 = vector.shape_cast %238 : vector<32xf32> to vector<1x32xf32>
    %cst_110 = arith.constant 9.99999996E-13 : f32
    %240 = vector.broadcast %cst_110 : f32 to vector<1x32xf32>
    %241 = arith.maximumf %239, %240 : vector<1x32xf32>
    %242 = math.rsqrt %237 : vector<32x1xf32>
    %243 = vector.broadcast %242 : vector<32x1xf32> to vector<32x32xf32>
    %244 = arith.mulf %243, %233 : vector<32x32xf32>
    %245 = math.rsqrt %241 : vector<1x32xf32>
    %246 = vector.broadcast %245 : vector<1x32xf32> to vector<32x32xf32>
    %247 = arith.mulf %244, %246 : vector<32x32xf32>
    %248 = vector.extract_strided_slice %2 {offsets = [0, 64], sizes = [32, 32], strides = [1, 1]} : vector<32x96xf32> to vector<32x32xf32>
    %cst_111 = arith.constant dense<0.000000e+00> : vector<32x32xf32>
    %249 = tpu.matmul %247, %248, %cst_111 {dimension_numbers = #tpu.dot_dimension_numbers<[1], [0], [0], [1], [0, 0, 1, 1], [], []>} : vector<32x32xf32>, vector<32x32xf32>, vector<32x32xf32> -> vector<32x32xf32>
    %c2_112 = arith.constant 2 : index
    %c0_113 = arith.constant 0 : index
    %c0_114 = arith.constant 0 : index
    %250 = vector.load %arg3[%c2_112, %c0_113, %c0_114] : memref<3x1x32xf32, #tpu.memory_space<vmem>>, vector<1x1x32xf32>
    %251 = vector.shape_cast %250 : vector<1x1x32xf32> to vector<1x32xf32>
    %252 = vector.broadcast %251 : vector<1x32xf32> to vector<32x32xf32>
    %253 = arith.addf %249, %252 : vector<32x32xf32>
    %cst_115 = arith.constant 0.000000e+00 : f32
    %254 = vector.broadcast %cst_115 : f32 to vector<32x32xf32>
    %255 = arith.maximumf %253, %254 : vector<32x32xf32>
    %c2_116 = arith.constant 2 : index
    %c0_117 = arith.constant 0 : index
    %c0_118 = arith.constant 0 : index
    %256 = vector.load %arg6[%c2_116, %c0_117, %c0_118] : memref<3x32x64xf32, #tpu.memory_space<vmem>>, vector<1x32x64xf32>
    %257 = vector.shape_cast %256 : vector<1x32x64xf32> to vector<32x64xf32>
    %cst_119 = arith.constant dense<0.000000e+00> : vector<32x64xf32>
    %258 = tpu.matmul %255, %257, %cst_119 {dimension_numbers = #tpu.dot_dimension_numbers<[1], [0], [0], [1], [0, 0, 1, 1], [], []>} : vector<32x32xf32>, vector<32x64xf32>, vector<32x64xf32> -> vector<32x64xf32>
    %c2_120 = arith.constant 2 : index
    %c0_121 = arith.constant 0 : index
    %c0_122 = arith.constant 0 : index
    %259 = vector.load %arg8[%c2_120, %c0_121, %c0_122] : memref<3x1x64xf32, #tpu.memory_space<vmem>>, vector<1x1x64xf32>
    %260 = vector.shape_cast %259 : vector<1x1x64xf32> to vector<1x64xf32>
    %261 = vector.broadcast %260 : vector<1x64xf32> to vector<32x64xf32>
    %262 = arith.mulf %258, %261 : vector<32x64xf32>
    %cst_123 = arith.constant dense<0.000000e+00> : vector<32x2xf32>
    %263 = tpu.matmul %262, %15, %cst_123 {dimension_numbers = #tpu.dot_dimension_numbers<[1], [0], [0], [1], [0, 0, 1, 1], [], []>} : vector<32x64xf32>, vector<64x2xf32>, vector<32x2xf32> -> vector<32x2xf32>
    %c2_124 = arith.constant 2 : index
    %c0_125 = arith.constant 0 : index
    %c0_126 = arith.constant 0 : index
    %264 = vector.load %arg7[%c2_124, %c0_125, %c0_126] : memref<3x2x64xf32, #tpu.memory_space<vmem>>, vector<1x2x64xf32>
    %265 = vector.shape_cast %264 : vector<1x2x64xf32> to vector<2x64xf32>
    %cst_127 = arith.constant dense<0.000000e+00> : vector<2x32xf32>
    %266 = tpu.matmul %265, %258, %cst_127 {dimension_numbers = #tpu.dot_dimension_numbers<[1], [1], [0], [0], [0, 0, 1, 0], [], []>} : vector<2x64xf32>, vector<32x64xf32>, vector<2x32xf32> -> vector<2x32xf32>
    %c2_128 = arith.constant 2 : index
    %c0_129 = arith.constant 0 : index
    %c0_130 = arith.constant 0 : index
    %267 = vector.load %arg9[%c2_128, %c0_129, %c0_130] : memref<3x1x2xf32, #tpu.memory_space<vmem>>, vector<1x1x2xf32>
    %268 = vector.shape_cast %267 : vector<1x1x2xf32> to vector<1x2xf32>
    %269 = vector.extract_strided_slice %258 {offsets = [0, 0], sizes = [32, 32], strides = [1, 1]} : vector<32x64xf32> to vector<32x32xf32>
    %270 = vector.extract_strided_slice %263 {offsets = [0, 0], sizes = [32, 1], strides = [1, 1]} : vector<32x2xf32> to vector<32x1xf32>
    %271 = vector.extract_strided_slice %266 {offsets = [0, 0], sizes = [1, 32], strides = [1, 1]} : vector<2x32xf32> to vector<1x32xf32>
    %272 = vector.broadcast %270 : vector<32x1xf32> to vector<32x32xf32>
    %273 = vector.broadcast %271 : vector<1x32xf32> to vector<32x32xf32>
    %274 = arith.addf %272, %273 : vector<32x32xf32>
    %275 = vector.extract_strided_slice %268 {offsets = [0, 0], sizes = [1, 1], strides = [1, 1]} : vector<1x2xf32> to vector<1x1xf32>
    %276 = vector.broadcast %275 : vector<1x1xf32> to vector<32x32xf32>
    %277 = arith.mulf %276, %233 : vector<32x32xf32>
    %278 = arith.addf %274, %277 : vector<32x32xf32>
    %cst_131 = arith.constant 0.000000e+00 : f32
    %279 = vector.broadcast %cst_131 : f32 to vector<32x32xf32>
    %280 = arith.cmpf ogt, %278, %279 : vector<32x32xf32>
    %cst_132 = arith.constant 2.000000e-01 : f32
    %281 = vector.broadcast %cst_132 : f32 to vector<32x32xf32>
    %282 = arith.mulf %281, %278 : vector<32x32xf32>
    %283 = arith.select %280, %278, %282 : vector<32x32xi1>, vector<32x32xf32>
    %cst_133 = arith.constant dense<0xFF800000> : vector<32xf32>
    %284 = vector.multi_reduction <maximumf>, %283, %cst_133 [1] : vector<32x32xf32> to vector<32xf32>
    %285 = vector.shape_cast %284 : vector<32xf32> to vector<32x1xf32>
    %286 = vector.broadcast %285 : vector<32x1xf32> to vector<32x32xf32>
    %287 = arith.subf %283, %286 : vector<32x32xf32>
    %288 = math.exp %287 : vector<32x32xf32>
    %cst_134 = arith.constant dense<0.000000e+00> : vector<32xf32>
    %289 = vector.multi_reduction <add>, %288, %cst_134 [1] : vector<32x32xf32> to vector<32xf32>
    %290 = vector.shape_cast %289 : vector<32xf32> to vector<32x1xf32>
    %291 = tpu.reciprocal %290 {approx = true} : vector<32x1xf32> -> vector<32x1xf32>
    %292 = vector.broadcast %291 : vector<32x1xf32> to vector<32x32xf32>
    %293 = arith.mulf %288, %292 : vector<32x32xf32>
    %cst_135 = arith.constant dense<0.000000e+00> : vector<32x32xf32>
    %294 = tpu.matmul %293, %269, %cst_135 {dimension_numbers = #tpu.dot_dimension_numbers<[1], [0], [0], [1], [0, 0, 1, 1], [], []>} : vector<32x32xf32>, vector<32x32xf32>, vector<32x32xf32> -> vector<32x32xf32>
    %295 = vector.extract_strided_slice %258 {offsets = [0, 32], sizes = [32, 32], strides = [1, 1]} : vector<32x64xf32> to vector<32x32xf32>
    %296 = vector.extract_strided_slice %263 {offsets = [0, 1], sizes = [32, 1], strides = [1, 1]} : vector<32x2xf32> to vector<32x1xf32>
    %297 = vector.extract_strided_slice %266 {offsets = [1, 0], sizes = [1, 32], strides = [1, 1]} : vector<2x32xf32> to vector<1x32xf32>
    %298 = vector.broadcast %296 : vector<32x1xf32> to vector<32x32xf32>
    %299 = vector.broadcast %297 : vector<1x32xf32> to vector<32x32xf32>
    %300 = arith.addf %298, %299 : vector<32x32xf32>
    %301 = vector.extract_strided_slice %268 {offsets = [0, 1], sizes = [1, 1], strides = [1, 1]} : vector<1x2xf32> to vector<1x1xf32>
    %302 = vector.broadcast %301 : vector<1x1xf32> to vector<32x32xf32>
    %303 = arith.mulf %302, %233 : vector<32x32xf32>
    %304 = arith.addf %300, %303 : vector<32x32xf32>
    %cst_136 = arith.constant 0.000000e+00 : f32
    %305 = vector.broadcast %cst_136 : f32 to vector<32x32xf32>
    %306 = arith.cmpf ogt, %304, %305 : vector<32x32xf32>
    %cst_137 = arith.constant 2.000000e-01 : f32
    %307 = vector.broadcast %cst_137 : f32 to vector<32x32xf32>
    %308 = arith.mulf %307, %304 : vector<32x32xf32>
    %309 = arith.select %306, %304, %308 : vector<32x32xi1>, vector<32x32xf32>
    %cst_138 = arith.constant dense<0xFF800000> : vector<32xf32>
    %310 = vector.multi_reduction <maximumf>, %309, %cst_138 [1] : vector<32x32xf32> to vector<32xf32>
    %311 = vector.shape_cast %310 : vector<32xf32> to vector<32x1xf32>
    %312 = vector.broadcast %311 : vector<32x1xf32> to vector<32x32xf32>
    %313 = arith.subf %309, %312 : vector<32x32xf32>
    %314 = math.exp %313 : vector<32x32xf32>
    %cst_139 = arith.constant dense<0.000000e+00> : vector<32xf32>
    %315 = vector.multi_reduction <add>, %314, %cst_139 [1] : vector<32x32xf32> to vector<32xf32>
    %316 = vector.shape_cast %315 : vector<32xf32> to vector<32x1xf32>
    %317 = tpu.reciprocal %316 {approx = true} : vector<32x1xf32> -> vector<32x1xf32>
    %318 = vector.broadcast %317 : vector<32x1xf32> to vector<32x32xf32>
    %319 = arith.mulf %314, %318 : vector<32x32xf32>
    %cst_140 = arith.constant dense<0.000000e+00> : vector<32x32xf32>
    %320 = tpu.matmul %319, %295, %cst_140 {dimension_numbers = #tpu.dot_dimension_numbers<[1], [0], [0], [1], [0, 0, 1, 1], [], []>} : vector<32x32xf32>, vector<32x32xf32>, vector<32x32xf32> -> vector<32x32xf32>
    %321 = arith.addf %294, %320 : vector<32x32xf32>
    %cst_141 = arith.constant 5.000000e-01 : f32
    %322 = vector.broadcast %cst_141 : f32 to vector<32x32xf32>
    %323 = arith.mulf %321, %322 : vector<32x32xf32>
    %c2_142 = arith.constant 2 : index
    %c0_143 = arith.constant 0 : index
    %c0_144 = arith.constant 0 : index
    %324 = vector.load %arg10[%c2_142, %c0_143, %c0_144] : memref<3x1x32xf32, #tpu.memory_space<vmem>>, vector<1x1x32xf32>
    %325 = vector.shape_cast %324 : vector<1x1x32xf32> to vector<1x32xf32>
    %326 = vector.broadcast %325 : vector<1x32xf32> to vector<32x32xf32>
    %327 = arith.addf %323, %326 : vector<32x32xf32>
    %cst_145 = arith.constant 0.000000e+00 : f32
    %328 = vector.broadcast %cst_145 : f32 to vector<32x32xf32>
    %329 = arith.maximumf %327, %328 : vector<32x32xf32>
    %c2_146 = arith.constant 2 : index
    %c0_147 = arith.constant 0 : index
    %c0_148 = arith.constant 0 : index
    %330 = vector.load %arg4[%c2_146, %c0_147, %c0_148] : memref<3x32x32xf32, #tpu.memory_space<vmem>>, vector<1x32x32xf32>
    %331 = vector.shape_cast %330 : vector<1x32x32xf32> to vector<32x32xf32>
    %cst_149 = arith.constant dense<0.000000e+00> : vector<32x32xf32>
    %332 = tpu.matmul %255, %331, %cst_149 {dimension_numbers = #tpu.dot_dimension_numbers<[1], [0], [0], [1], [0, 0, 1, 1], [], []>} : vector<32x32xf32>, vector<32x32xf32>, vector<32x32xf32> -> vector<32x32xf32>
    %cst_150 = arith.constant dense<0.000000e+00> : vector<32x32xf32>
    %333 = tpu.matmul %247, %332, %cst_150 {dimension_numbers = #tpu.dot_dimension_numbers<[1], [0], [0], [1], [0, 0, 1, 1], [], []>} : vector<32x32xf32>, vector<32x32xf32>, vector<32x32xf32> -> vector<32x32xf32>
    %c2_151 = arith.constant 2 : index
    %c0_152 = arith.constant 0 : index
    %c0_153 = arith.constant 0 : index
    %334 = vector.load %arg5[%c2_151, %c0_152, %c0_153] : memref<3x1x32xf32, #tpu.memory_space<vmem>>, vector<1x1x32xf32>
    %335 = vector.shape_cast %334 : vector<1x1x32xf32> to vector<1x32xf32>
    %336 = vector.broadcast %335 : vector<1x32xf32> to vector<32x32xf32>
    %337 = arith.addf %333, %336 : vector<32x32xf32>
    %cst_154 = arith.constant 0.000000e+00 : f32
    %338 = vector.broadcast %cst_154 : f32 to vector<32x32xf32>
    %339 = arith.maximumf %337, %338 : vector<32x32xf32>
    %c0_155 = arith.constant 0 : index
    %c0_156 = arith.constant 0 : index
    %340 = vector.load %arg12[%c0_155, %c0_156] : memref<1x45xf32, #tpu.memory_space<vmem>>, vector<1x45xf32>
    %cst_157 = arith.constant dense<0.000000e+00> : vector<32xf32>
    %341 = vector.multi_reduction <add>, %123, %cst_157 [1] : vector<32x32xf32> to vector<32xf32>
    %342 = vector.shape_cast %341 : vector<32xf32> to vector<32x1xf32>
    %cst_158 = arith.constant dense<0.000000e+00> : vector<1xf32>
    %343 = vector.multi_reduction <add>, %342, %cst_158 [0] : vector<32x1xf32> to vector<1xf32>
    %344 = vector.shape_cast %343 : vector<1xf32> to vector<1x1xf32>
    %cst_159 = arith.constant 9.765625E-4 : f32
    %345 = vector.broadcast %cst_159 : f32 to vector<1x1xf32>
    %346 = arith.mulf %344, %345 : vector<1x1xf32>
    %c0_160 = arith.constant 0 : index
    %c0_161 = arith.constant 0 : index
    %347 = vector.load %arg11[%c0_160, %c0_161] : memref<9x45xf32, #tpu.memory_space<vmem>>, vector<1x45xf32>
    %348 = vector.broadcast %346 : vector<1x1xf32> to vector<1x45xf32>
    %349 = arith.mulf %348, %347 : vector<1x45xf32>
    %350 = arith.addf %340, %349 : vector<1x45xf32>
    %cst_162 = arith.constant dense<0.000000e+00> : vector<32xf32>
    %351 = vector.multi_reduction <add>, %113, %cst_162 [1] : vector<32x32xf32> to vector<32xf32>
    %352 = vector.shape_cast %351 : vector<32xf32> to vector<32x1xf32>
    %cst_163 = arith.constant dense<0.000000e+00> : vector<1xf32>
    %353 = vector.multi_reduction <add>, %352, %cst_163 [0] : vector<32x1xf32> to vector<1xf32>
    %354 = vector.shape_cast %353 : vector<1xf32> to vector<1x1xf32>
    %cst_164 = arith.constant 9.765625E-4 : f32
    %355 = vector.broadcast %cst_164 : f32 to vector<1x1xf32>
    %356 = arith.mulf %354, %355 : vector<1x1xf32>
    %c1_165 = arith.constant 1 : index
    %c0_166 = arith.constant 0 : index
    %357 = vector.load %arg11[%c1_165, %c0_166] : memref<9x45xf32, #tpu.memory_space<vmem>>, vector<1x45xf32>
    %358 = vector.broadcast %356 : vector<1x1xf32> to vector<1x45xf32>
    %359 = arith.mulf %358, %357 : vector<1x45xf32>
    %360 = arith.addf %350, %359 : vector<1x45xf32>
    %cst_167 = arith.constant dense<0.000000e+00> : vector<32xf32>
    %361 = vector.multi_reduction <add>, %39, %cst_167 [1] : vector<32x32xf32> to vector<32xf32>
    %362 = vector.shape_cast %361 : vector<32xf32> to vector<32x1xf32>
    %cst_168 = arith.constant dense<0.000000e+00> : vector<1xf32>
    %363 = vector.multi_reduction <add>, %362, %cst_168 [0] : vector<32x1xf32> to vector<1xf32>
    %364 = vector.shape_cast %363 : vector<1xf32> to vector<1x1xf32>
    %cst_169 = arith.constant 9.765625E-4 : f32
    %365 = vector.broadcast %cst_169 : f32 to vector<1x1xf32>
    %366 = arith.mulf %364, %365 : vector<1x1xf32>
    %c2_170 = arith.constant 2 : index
    %c0_171 = arith.constant 0 : index
    %367 = vector.load %arg11[%c2_170, %c0_171] : memref<9x45xf32, #tpu.memory_space<vmem>>, vector<1x45xf32>
    %368 = vector.broadcast %366 : vector<1x1xf32> to vector<1x45xf32>
    %369 = arith.mulf %368, %367 : vector<1x45xf32>
    %370 = arith.addf %360, %369 : vector<1x45xf32>
    %cst_172 = arith.constant dense<0.000000e+00> : vector<32xf32>
    %371 = vector.multi_reduction <add>, %231, %cst_172 [1] : vector<32x32xf32> to vector<32xf32>
    %372 = vector.shape_cast %371 : vector<32xf32> to vector<32x1xf32>
    %cst_173 = arith.constant dense<0.000000e+00> : vector<1xf32>
    %373 = vector.multi_reduction <add>, %372, %cst_173 [0] : vector<32x1xf32> to vector<1xf32>
    %374 = vector.shape_cast %373 : vector<1xf32> to vector<1x1xf32>
    %cst_174 = arith.constant 9.765625E-4 : f32
    %375 = vector.broadcast %cst_174 : f32 to vector<1x1xf32>
    %376 = arith.mulf %374, %375 : vector<1x1xf32>
    %c3 = arith.constant 3 : index
    %c0_175 = arith.constant 0 : index
    %377 = vector.load %arg11[%c3, %c0_175] : memref<9x45xf32, #tpu.memory_space<vmem>>, vector<1x45xf32>
    %378 = vector.broadcast %376 : vector<1x1xf32> to vector<1x45xf32>
    %379 = arith.mulf %378, %377 : vector<1x45xf32>
    %380 = arith.addf %370, %379 : vector<1x45xf32>
    %cst_176 = arith.constant dense<0.000000e+00> : vector<32xf32>
    %381 = vector.multi_reduction <add>, %221, %cst_176 [1] : vector<32x32xf32> to vector<32xf32>
    %382 = vector.shape_cast %381 : vector<32xf32> to vector<32x1xf32>
    %cst_177 = arith.constant dense<0.000000e+00> : vector<1xf32>
    %383 = vector.multi_reduction <add>, %382, %cst_177 [0] : vector<32x1xf32> to vector<1xf32>
    %384 = vector.shape_cast %383 : vector<1xf32> to vector<1x1xf32>
    %cst_178 = arith.constant 9.765625E-4 : f32
    %385 = vector.broadcast %cst_178 : f32 to vector<1x1xf32>
    %386 = arith.mulf %384, %385 : vector<1x1xf32>
    %c4 = arith.constant 4 : index
    %c0_179 = arith.constant 0 : index
    %387 = vector.load %arg11[%c4, %c0_179] : memref<9x45xf32, #tpu.memory_space<vmem>>, vector<1x45xf32>
    %388 = vector.broadcast %386 : vector<1x1xf32> to vector<1x45xf32>
    %389 = arith.mulf %388, %387 : vector<1x45xf32>
    %390 = arith.addf %380, %389 : vector<1x45xf32>
    %cst_180 = arith.constant dense<0.000000e+00> : vector<32xf32>
    %391 = vector.multi_reduction <add>, %147, %cst_180 [1] : vector<32x32xf32> to vector<32xf32>
    %392 = vector.shape_cast %391 : vector<32xf32> to vector<32x1xf32>
    %cst_181 = arith.constant dense<0.000000e+00> : vector<1xf32>
    %393 = vector.multi_reduction <add>, %392, %cst_181 [0] : vector<32x1xf32> to vector<1xf32>
    %394 = vector.shape_cast %393 : vector<1xf32> to vector<1x1xf32>
    %cst_182 = arith.constant 9.765625E-4 : f32
    %395 = vector.broadcast %cst_182 : f32 to vector<1x1xf32>
    %396 = arith.mulf %394, %395 : vector<1x1xf32>
    %c5 = arith.constant 5 : index
    %c0_183 = arith.constant 0 : index
    %397 = vector.load %arg11[%c5, %c0_183] : memref<9x45xf32, #tpu.memory_space<vmem>>, vector<1x45xf32>
    %398 = vector.broadcast %396 : vector<1x1xf32> to vector<1x45xf32>
    %399 = arith.mulf %398, %397 : vector<1x45xf32>
    %400 = arith.addf %390, %399 : vector<1x45xf32>
    %cst_184 = arith.constant dense<0.000000e+00> : vector<32xf32>
    %401 = vector.multi_reduction <add>, %339, %cst_184 [1] : vector<32x32xf32> to vector<32xf32>
    %402 = vector.shape_cast %401 : vector<32xf32> to vector<32x1xf32>
    %cst_185 = arith.constant dense<0.000000e+00> : vector<1xf32>
    %403 = vector.multi_reduction <add>, %402, %cst_185 [0] : vector<32x1xf32> to vector<1xf32>
    %404 = vector.shape_cast %403 : vector<1xf32> to vector<1x1xf32>
    %cst_186 = arith.constant 9.765625E-4 : f32
    %405 = vector.broadcast %cst_186 : f32 to vector<1x1xf32>
    %406 = arith.mulf %404, %405 : vector<1x1xf32>
    %c6 = arith.constant 6 : index
    %c0_187 = arith.constant 0 : index
    %407 = vector.load %arg11[%c6, %c0_187] : memref<9x45xf32, #tpu.memory_space<vmem>>, vector<1x45xf32>
    %408 = vector.broadcast %406 : vector<1x1xf32> to vector<1x45xf32>
    %409 = arith.mulf %408, %407 : vector<1x45xf32>
    %410 = arith.addf %400, %409 : vector<1x45xf32>
    %cst_188 = arith.constant dense<0.000000e+00> : vector<32xf32>
    %411 = vector.multi_reduction <add>, %329, %cst_188 [1] : vector<32x32xf32> to vector<32xf32>
    %412 = vector.shape_cast %411 : vector<32xf32> to vector<32x1xf32>
    %cst_189 = arith.constant dense<0.000000e+00> : vector<1xf32>
    %413 = vector.multi_reduction <add>, %412, %cst_189 [0] : vector<32x1xf32> to vector<1xf32>
    %414 = vector.shape_cast %413 : vector<1xf32> to vector<1x1xf32>
    %cst_190 = arith.constant 9.765625E-4 : f32
    %415 = vector.broadcast %cst_190 : f32 to vector<1x1xf32>
    %416 = arith.mulf %414, %415 : vector<1x1xf32>
    %c7 = arith.constant 7 : index
    %c0_191 = arith.constant 0 : index
    %417 = vector.load %arg11[%c7, %c0_191] : memref<9x45xf32, #tpu.memory_space<vmem>>, vector<1x45xf32>
    %418 = vector.broadcast %416 : vector<1x1xf32> to vector<1x45xf32>
    %419 = arith.mulf %418, %417 : vector<1x45xf32>
    %420 = arith.addf %410, %419 : vector<1x45xf32>
    %cst_192 = arith.constant dense<0.000000e+00> : vector<32xf32>
    %421 = vector.multi_reduction <add>, %255, %cst_192 [1] : vector<32x32xf32> to vector<32xf32>
    %422 = vector.shape_cast %421 : vector<32xf32> to vector<32x1xf32>
    %cst_193 = arith.constant dense<0.000000e+00> : vector<1xf32>
    %423 = vector.multi_reduction <add>, %422, %cst_193 [0] : vector<32x1xf32> to vector<1xf32>
    %424 = vector.shape_cast %423 : vector<1xf32> to vector<1x1xf32>
    %cst_194 = arith.constant 9.765625E-4 : f32
    %425 = vector.broadcast %cst_194 : f32 to vector<1x1xf32>
    %426 = arith.mulf %424, %425 : vector<1x1xf32>
    %c8 = arith.constant 8 : index
    %c0_195 = arith.constant 0 : index
    %427 = vector.load %arg11[%c8, %c0_195] : memref<9x45xf32, #tpu.memory_space<vmem>>, vector<1x45xf32>
    %428 = vector.broadcast %426 : vector<1x1xf32> to vector<1x45xf32>
    %429 = arith.mulf %428, %427 : vector<1x45xf32>
    %430 = arith.addf %420, %429 : vector<1x45xf32>
    %cst_196 = arith.constant 0.000000e+00 : f32
    %431 = vector.broadcast %cst_196 : f32 to vector<1x45xf32>
    %432 = arith.maximumf %430, %431 : vector<1x45xf32>
    %c0_197 = arith.constant 0 : index
    %c0_198 = arith.constant 0 : index
    %433 = vector.load %arg13[%c0_197, %c0_198] : memref<45x9xf32, #tpu.memory_space<vmem>>, vector<45x9xf32>
    %cst_199 = arith.constant dense<0.000000e+00> : vector<1x9xf32>
    %434 = tpu.matmul %432, %433, %cst_199 {dimension_numbers = #tpu.dot_dimension_numbers<[1], [0], [0], [1], [0, 0, 1, 1], [], []>} : vector<1x45xf32>, vector<45x9xf32>, vector<1x9xf32> -> vector<1x9xf32>
    %c0_200 = arith.constant 0 : index
    %c0_201 = arith.constant 0 : index
    %435 = vector.load %arg14[%c0_200, %c0_201] : memref<1x9xf32, #tpu.memory_space<vmem>>, vector<1x9xf32>
    %436 = arith.addf %434, %435 : vector<1x9xf32>
    %437 = arith.negf %436 : vector<1x9xf32>
    %438 = math.exp %437 : vector<1x9xf32>
    %cst_202 = arith.constant 1.000000e+00 : f32
    %439 = vector.broadcast %cst_202 : f32 to vector<1x9xf32>
    %440 = arith.addf %439, %438 : vector<1x9xf32>
    %441 = arith.divf %439, %440 : vector<1x9xf32>
    %cst_203 = arith.constant 0.000000e+00 : f32
    %442 = vector.broadcast %cst_203 : f32 to vector<32x32xf32>
    %c0_204 = arith.constant 0 : index
    %c0_205 = arith.constant 0 : index
    %443 = vector.load %arg16[%c0_204, %c0_205] : memref<1x1xf32, #tpu.memory_space<vmem>>, vector<1x1xf32>
    %444 = vector.broadcast %443 : vector<1x1xf32> to vector<32x32xf32>
    %445 = arith.addf %442, %444 : vector<32x32xf32>
    %c0_206 = arith.constant 0 : index
    %c0_207 = arith.constant 0 : index
    %446 = vector.load %arg15[%c0_206, %c0_207] : memref<1x9xf32, #tpu.memory_space<vmem>>, vector<1x1xf32>
    %447 = vector.extract_strided_slice %441 {offsets = [0, 0], sizes = [1, 1], strides = [1, 1]} : vector<1x9xf32> to vector<1x1xf32>
    %448 = vector.broadcast %447 : vector<1x1xf32> to vector<32x32xf32>
    %449 = arith.mulf %448, %123 : vector<32x32xf32>
    %cst_208 = arith.constant 0.000000e+00 : f32
    %450 = vector.broadcast %cst_208 : f32 to vector<32x32xf32>
    %451 = arith.maximumf %449, %450 : vector<32x32xf32>
    %452 = vector.broadcast %446 : vector<1x1xf32> to vector<32x32xf32>
    %453 = arith.mulf %452, %451 : vector<32x32xf32>
    %454 = arith.addf %445, %453 : vector<32x32xf32>
    %c0_209 = arith.constant 0 : index
    %c1_210 = arith.constant 1 : index
    %455 = vector.load %arg15[%c0_209, %c1_210] : memref<1x9xf32, #tpu.memory_space<vmem>>, vector<1x1xf32>
    %456 = vector.extract_strided_slice %441 {offsets = [0, 1], sizes = [1, 1], strides = [1, 1]} : vector<1x9xf32> to vector<1x1xf32>
    %457 = vector.broadcast %456 : vector<1x1xf32> to vector<32x32xf32>
    %458 = arith.mulf %457, %113 : vector<32x32xf32>
    %cst_211 = arith.constant 0.000000e+00 : f32
    %459 = vector.broadcast %cst_211 : f32 to vector<32x32xf32>
    %460 = arith.maximumf %458, %459 : vector<32x32xf32>
    %461 = vector.broadcast %455 : vector<1x1xf32> to vector<32x32xf32>
    %462 = arith.mulf %461, %460 : vector<32x32xf32>
    %463 = arith.addf %454, %462 : vector<32x32xf32>
    %c0_212 = arith.constant 0 : index
    %c2_213 = arith.constant 2 : index
    %464 = vector.load %arg15[%c0_212, %c2_213] : memref<1x9xf32, #tpu.memory_space<vmem>>, vector<1x1xf32>
    %465 = vector.extract_strided_slice %441 {offsets = [0, 2], sizes = [1, 1], strides = [1, 1]} : vector<1x9xf32> to vector<1x1xf32>
    %466 = vector.broadcast %465 : vector<1x1xf32> to vector<32x32xf32>
    %467 = arith.mulf %466, %39 : vector<32x32xf32>
    %cst_214 = arith.constant 0.000000e+00 : f32
    %468 = vector.broadcast %cst_214 : f32 to vector<32x32xf32>
    %469 = arith.maximumf %467, %468 : vector<32x32xf32>
    %470 = vector.broadcast %464 : vector<1x1xf32> to vector<32x32xf32>
    %471 = arith.mulf %470, %469 : vector<32x32xf32>
    %472 = arith.addf %463, %471 : vector<32x32xf32>
    %c0_215 = arith.constant 0 : index
    %c3_216 = arith.constant 3 : index
    %473 = vector.load %arg15[%c0_215, %c3_216] : memref<1x9xf32, #tpu.memory_space<vmem>>, vector<1x1xf32>
    %474 = vector.extract_strided_slice %441 {offsets = [0, 3], sizes = [1, 1], strides = [1, 1]} : vector<1x9xf32> to vector<1x1xf32>
    %475 = vector.broadcast %474 : vector<1x1xf32> to vector<32x32xf32>
    %476 = arith.mulf %475, %231 : vector<32x32xf32>
    %cst_217 = arith.constant 0.000000e+00 : f32
    %477 = vector.broadcast %cst_217 : f32 to vector<32x32xf32>
    %478 = arith.maximumf %476, %477 : vector<32x32xf32>
    %479 = vector.broadcast %473 : vector<1x1xf32> to vector<32x32xf32>
    %480 = arith.mulf %479, %478 : vector<32x32xf32>
    %481 = arith.addf %472, %480 : vector<32x32xf32>
    %c0_218 = arith.constant 0 : index
    %c4_219 = arith.constant 4 : index
    %482 = vector.load %arg15[%c0_218, %c4_219] : memref<1x9xf32, #tpu.memory_space<vmem>>, vector<1x1xf32>
    %483 = vector.extract_strided_slice %441 {offsets = [0, 4], sizes = [1, 1], strides = [1, 1]} : vector<1x9xf32> to vector<1x1xf32>
    %484 = vector.broadcast %483 : vector<1x1xf32> to vector<32x32xf32>
    %485 = arith.mulf %484, %221 : vector<32x32xf32>
    %cst_220 = arith.constant 0.000000e+00 : f32
    %486 = vector.broadcast %cst_220 : f32 to vector<32x32xf32>
    %487 = arith.maximumf %485, %486 : vector<32x32xf32>
    %488 = vector.broadcast %482 : vector<1x1xf32> to vector<32x32xf32>
    %489 = arith.mulf %488, %487 : vector<32x32xf32>
    %490 = arith.addf %481, %489 : vector<32x32xf32>
    %c0_221 = arith.constant 0 : index
    %c5_222 = arith.constant 5 : index
    %491 = vector.load %arg15[%c0_221, %c5_222] : memref<1x9xf32, #tpu.memory_space<vmem>>, vector<1x1xf32>
    %492 = vector.extract_strided_slice %441 {offsets = [0, 5], sizes = [1, 1], strides = [1, 1]} : vector<1x9xf32> to vector<1x1xf32>
    %493 = vector.broadcast %492 : vector<1x1xf32> to vector<32x32xf32>
    %494 = arith.mulf %493, %147 : vector<32x32xf32>
    %cst_223 = arith.constant 0.000000e+00 : f32
    %495 = vector.broadcast %cst_223 : f32 to vector<32x32xf32>
    %496 = arith.maximumf %494, %495 : vector<32x32xf32>
    %497 = vector.broadcast %491 : vector<1x1xf32> to vector<32x32xf32>
    %498 = arith.mulf %497, %496 : vector<32x32xf32>
    %499 = arith.addf %490, %498 : vector<32x32xf32>
    %c0_224 = arith.constant 0 : index
    %c6_225 = arith.constant 6 : index
    %500 = vector.load %arg15[%c0_224, %c6_225] : memref<1x9xf32, #tpu.memory_space<vmem>>, vector<1x1xf32>
    %501 = vector.extract_strided_slice %441 {offsets = [0, 6], sizes = [1, 1], strides = [1, 1]} : vector<1x9xf32> to vector<1x1xf32>
    %502 = vector.broadcast %501 : vector<1x1xf32> to vector<32x32xf32>
    %503 = arith.mulf %502, %339 : vector<32x32xf32>
    %cst_226 = arith.constant 0.000000e+00 : f32
    %504 = vector.broadcast %cst_226 : f32 to vector<32x32xf32>
    %505 = arith.maximumf %503, %504 : vector<32x32xf32>
    %506 = vector.broadcast %500 : vector<1x1xf32> to vector<32x32xf32>
    %507 = arith.mulf %506, %505 : vector<32x32xf32>
    %508 = arith.addf %499, %507 : vector<32x32xf32>
    %c0_227 = arith.constant 0 : index
    %c7_228 = arith.constant 7 : index
    %509 = vector.load %arg15[%c0_227, %c7_228] : memref<1x9xf32, #tpu.memory_space<vmem>>, vector<1x1xf32>
    %510 = vector.extract_strided_slice %441 {offsets = [0, 7], sizes = [1, 1], strides = [1, 1]} : vector<1x9xf32> to vector<1x1xf32>
    %511 = vector.broadcast %510 : vector<1x1xf32> to vector<32x32xf32>
    %512 = arith.mulf %511, %329 : vector<32x32xf32>
    %cst_229 = arith.constant 0.000000e+00 : f32
    %513 = vector.broadcast %cst_229 : f32 to vector<32x32xf32>
    %514 = arith.maximumf %512, %513 : vector<32x32xf32>
    %515 = vector.broadcast %509 : vector<1x1xf32> to vector<32x32xf32>
    %516 = arith.mulf %515, %514 : vector<32x32xf32>
    %517 = arith.addf %508, %516 : vector<32x32xf32>
    %c0_230 = arith.constant 0 : index
    %c8_231 = arith.constant 8 : index
    %518 = vector.load %arg15[%c0_230, %c8_231] : memref<1x9xf32, #tpu.memory_space<vmem>>, vector<1x1xf32>
    %519 = vector.extract_strided_slice %441 {offsets = [0, 8], sizes = [1, 1], strides = [1, 1]} : vector<1x9xf32> to vector<1x1xf32>
    %520 = vector.broadcast %519 : vector<1x1xf32> to vector<32x32xf32>
    %521 = arith.mulf %520, %255 : vector<32x32xf32>
    %cst_232 = arith.constant 0.000000e+00 : f32
    %522 = vector.broadcast %cst_232 : f32 to vector<32x32xf32>
    %523 = arith.maximumf %521, %522 : vector<32x32xf32>
    %524 = vector.broadcast %518 : vector<1x1xf32> to vector<32x32xf32>
    %525 = arith.mulf %524, %523 : vector<32x32xf32>
    %526 = arith.addf %517, %525 : vector<32x32xf32>
    %c0_233 = arith.constant 0 : index
    %c0_234 = arith.constant 0 : index
    %527 = vector.load %arg17[%c0_233, %c0_234] : memref<32x32xf32, #tpu.memory_space<vmem>>, vector<32x32xf32>
    tpu.vector_store %arg17[%c0_233, %c0_234], %526 {strides = array<i32>} : memref<32x32xf32, #tpu.memory_space<vmem>>, vector<32x32xf32>,
    return
  }
}

</mosaic_0001>

<bundles_post_ra>
// kernel: forward.1
= control target key start
LH: loop header
LB: loop body
LE: loop exit
PB: predicated region body
PF: predicated region fallthrough
CT: control target
= control target key end

     0   :  { %s4895_s0 = inlined_call_operand.hbm [shape: f32[3,32,32], index: 0, kind: input, shape index: {}]   ;;  %s4896_s1 = inlined_call_operand.hbm [shape: f32[32,32], index: 1, kind: input, shape index: {}]   ;;  %s4897_s2 = inlined_call_operand.vmem [shape: f32[32,96], index: 2, kind: input, shape index: {}]   ;;  %s4898_s3 = inlined_call_operand.hbm [shape: f32[3,1,32], index: 3, kind: input, shape index: {}]   ;;  %s4899_s4 = inlined_call_operand.hbm [shape: f32[3,32,32], index: 4, kind: input, shape index: {}]   ;;  %s4900_s5 = inlined_call_operand.hbm [shape: f32[3,1,32], index: 5, kind: input, shape index: {}]   ;;  %s4901_s6 = inlined_call_operand.hbm [shape: f32[3,32,64], index: 6, kind: input, shape index: {}]   ;;  %s4902_s7 = inlined_call_operand.vmem [shape: f32[3,2,64], index: 7, kind: input, shape index: {}]   ;;  %s4903_s8 = inlined_call_operand.hbm [shape: f32[3,1,64], index: 8, kind: input, shape index: {}]   ;;  %s4904_s9 = inlined_call_operand.hbm [shape: f32[3,1,2], index: 9, kind: input, shape index: {}]   ;;  %s4905_s10 = inlined_call_operand.vmem [shape: f32[3,1,32], index: 10, kind: input, shape index: {}]   ;;  %s4906_s11 = inlined_call_operand.hbm [shape: f32[9,45], index: 11, kind: input, shape index: {}]   ;;  %s4907_s12 = inlined_call_operand.hbm [shape: f32[1,45], index: 12, kind: input, shape index: {}]   ;;  %s4908_s13 = inlined_call_operand.hbm [shape: f32[45,9], index: 13, kind: input, shape index: {}]   ;;  %s4909_s14 = inlined_call_operand.hbm [shape: f32[1,9], index: 14, kind: input, shape index: {}]   ;;  %s4910_s15 = inlined_call_operand.vmem [shape: f32[1,9], index: 15, kind: input, shape index: {}]   ;;  %s4911_s16 = inlined_call_operand.<no memory space> [shape: f32[1,1], index: 16, kind: input, shape index: {}]   ;;  %s4912_s17 = inlined_call_operand.hbm [shape: f32[32,32], index: 17, kind: output, shape index: {}]  }
   0x1   :  { %4954 = sst [smem:[#allocation44_spill]] %s4895_s0  ;;  %v22_v0 = vstv %s4911_s16 }
   0x2   :  { %4955 = sst [smem:[#allocation45_spill]] %s4896_s1  ;;  %23 = vst [vmem:[#allocation2] sm:$0x1] %v22_v0 }
   0x3   :  { %24 = vsyncpa [#allocation4], 0 }
   0x4   :  { %25 = vsyncpa [#allocation7], 0 }
   0x5   :  { %26 = vsyncpa [#allocation10], 0 }
   0x6   :  { %27 = vsyncpa [#allocation13], 0 }
   0x7   :  { %28 = vsyncpa [#allocation16], 0 }
   0x8   :  { %29 = vsyncpa [#allocation19], 0 }
   0x9   :  { %30 = vsyncpa [#allocation22], 0 }
   0xa   :  { %31 = vsyncpa [#allocation5], 0  ;;  %s4956_s28 = sld [smem:[#allocation45_spill]]  ;;  %s3584_s0 = smov [#allocation6]  }
   0xb   :  { %s51_s30 = sshll.u32 %s3584_s0, 4  ;;  %s77_s16 = sshll.u32 %s4899_s4, 4  ;;  %s52_s30 = int_to_ptr.vmem [resolvable:$true] %s51_s30  ;;  %s78_s16 = int_to_ptr.hbm [resolvable:$true] %s77_s16 }
   0xc   :  { %s3585_s1 = smov 128   ;;  %s3586_s20 = smov 8  }
   0xd   :  { %s3587_s21 = smov [#allocation9]   ;;  %s103_s25 = sshll.u32 %s4901_s6, 4  ;;  %s104_s25 = int_to_ptr.hbm [resolvable:$true] %s103_s25 }
   0xe   :  { %s79_s22 = sshll.u32 %s3587_s21, 4  ;;  %s3588_s4 = smov [#allocation12]   ;;  %s80_s22 = int_to_ptr.vmem [resolvable:$true] %s79_s22 }
   0xf   :  { %85 = dma.hbm_to_vmem [thread:$0]  %s78_s16, 1536, %s80_s22, [#allocation10], %s3585_s1, %s3585_s1, %s3586_s20  }
  0x10   :  { %s49_s29 = sshll.u32 %s4956_s28, 4  ;;  %s105_s26 = sshll.u32 %s3588_s4, 4  ;;  %s50_s29 = int_to_ptr.hbm [resolvable:$true] %s49_s29  ;;  %s106_s26 = int_to_ptr.vmem [resolvable:$true] %s105_s26 }
  0x11   :  { %57 = dma.hbm_to_vmem [thread:$0]  %s50_s29, 512, %s52_s30, [#allocation7], %s3585_s1, %s3585_s1, %s3586_s20  }
  0x12   :  { %s131_s29 = sshll.u32 %s4904_s9, 4  ;;  %s3589_s0 = smov [#allocation15]   ;;  %s132_s29 = int_to_ptr.hbm [resolvable:$true] %s131_s29 }
  0x13   :  { %111 = dma.hbm_to_vmem [thread:$0]  %s104_s25, 1536, %s106_s26, [#allocation13], %s3585_s1, %s3585_s1, %s3586_s20  }
  0x14   :  { %s133_s6 = sshll.u32 %s3589_s0, 4  ;;  %s160_s19 = sshll.u32 %s4907_s12, 4  ;;  %s134_s6 = int_to_ptr.vmem [resolvable:$true] %s133_s6  ;;  %s161_s19 = int_to_ptr.hbm [resolvable:$true] %s160_s19 }
  0x15   :  { %s3590_s16 = smov 16   ;;  %s3591_s21 = smov 1  }
  0x16   :  { %139 = dma.hbm_to_vmem [thread:$0]  %s132_s29, 48, %s134_s6, [#allocation16], %s3590_s16, %s3590_s16, %s3591_s21  }
  0x17   :  { %s4957_s23 = sld [smem:[#allocation44_spill]]  ;;  %s3592_s25 = smov [#allocation18]  }
  0x18   :  { %s162_s4 = sshll.u32 %s3592_s25, 4  ;;  %s3593_s26 = smov [#allocation3]   ;;  %s163_s4 = int_to_ptr.vmem [resolvable:$true] %s162_s4 }
  0x19   :  { %165 = dma.hbm_to_vmem [thread:$0]  %s161_s19, 16, %s163_s4, [#allocation19]  }
  0x1a   :  { %s38_s27 = sshll.u32 %s3593_s26, 4  ;;  %s64_s0 = sshll.u32 %s4898_s3, 4  ;;  %s39_s27 = int_to_ptr.vmem [resolvable:$true] %s38_s27  ;;  %s65_s0 = int_to_ptr.hbm [resolvable:$true] %s64_s0 }
  0x1b   :  { %s90_s30 = sshll.u32 %s4900_s5, 4  ;;  %s3594_s18 = smov [#allocation8]   ;;  %s91_s30 = int_to_ptr.hbm [resolvable:$true] %s90_s30 }
  0x1c   :  { %s66_s9 = sshll.u32 %s3594_s18, 4  ;;  %s3595_s19 = smov [#allocation11]   ;;  %s67_s9 = int_to_ptr.vmem [resolvable:$true] %s66_s9 }
  0x1d   :  { %s36_s24 = sshll.u32 %s4957_s23, 4  ;;  %s92_s3 = sshll.u32 %s3595_s19, 4  ;;  %s37_s24 = int_to_ptr.hbm [resolvable:$true] %s36_s24  ;;  %s93_s3 = int_to_ptr.vmem [resolvable:$true] %s92_s3 }
  0x1e   :  { %44 = dma.hbm_to_vmem [thread:$0]  %s37_s24, 1536, %s39_s27, [#allocation4], %s3585_s1, %s3585_s1, %s3586_s20  }
  0x1f   :  { %72 = dma.hbm_to_vmem [thread:$0]  %s65_s0, 48, %s67_s9, [#allocation7], %s3590_s16, %s3590_s16, %s3591_s21  }
  0x20   :  { %s118_s25 = sshll.u32 %s4903_s8, 4  ;;  %s146_s4 = sshll.u32 %s4906_s11, 4  ;;  %s119_s25 = int_to_ptr.hbm [resolvable:$true] %s118_s25  ;;  %s147_s4 = int_to_ptr.hbm [resolvable:$true] %s146_s4 }
  0x21   :  { %98 = dma.hbm_to_vmem [thread:$0]  %s91_s30, 48, %s93_s3, [#allocation10], %s3590_s16, %s3590_s16, %s3591_s21  }
  0x22   :  { %s3596_s26 = smov [#allocation14]   ;;  %s3597_s12 = smov [#allocation17]  }
  0x23   :  { %s120_s27 = sshll.u32 %s3596_s26, 4  ;;  %s148_s8 = sshll.u32 %s3597_s12, 4  ;;  %s121_s27 = int_to_ptr.vmem [resolvable:$true] %s120_s27  ;;  %s149_s8 = int_to_ptr.vmem [resolvable:$true] %s148_s8 }
  0x24   :  { %126 = dma.hbm_to_vmem [thread:$0]  %s119_s25, 48, %s121_s27, [#allocation13], %s3590_s16, %s3590_s16, %s3591_s21  }
  0x25   :  { %s170_s29 = sshll.u32 %s4908_s13, 4  ;;  %s184_s30 = sshll.u32 %s4909_s14, 4  ;;  %s171_s29 = int_to_ptr.hbm [resolvable:$true] %s170_s29  ;;  %s185_s30 = int_to_ptr.hbm [resolvable:$true] %s184_s30 }
  0x26   :  { %154 = dma.hbm_to_vmem [thread:$0]  %s147_s4, 256, %s149_s8, [#allocation16], %s3585_s1, %s3585_s1, %s3586_s20  }
  0x27   :  { %s3598_s18 = smov [#allocation20]   ;;  %s3599_s16 = smov [#allocation21]  }
  0x28   :  { %s172_s9 = sshll.u32 %s3598_s18, 4  ;;  %s186_s13 = sshll.u32 %s3599_s16, 4  ;;  %s173_s9 = int_to_ptr.vmem [resolvable:$true] %s172_s9  ;;  %s187_s13 = int_to_ptr.vmem [resolvable:$true] %s186_s13 }
  0x29   :  { %178 = dma.hbm_to_vmem [thread:$0]  %s171_s29, 768, %s173_s9, [#allocation19], %s3585_s1, %s3585_s1, %s3586_s20  }
  0x2a   :  { %189 = dma.hbm_to_vmem [thread:$0]  %s185_s30, 16, %s187_s13, [#allocation22]  }
  0x2b   :  { %3568 = dma.done.wait [#allocation4], 1536  }
  0x2c   :  { %3569 = vsyncadd [#allocation4], 4294965760 }
  0x2d   :  { %3570 = dma.done.wait [#allocation7], 560  }
  0x2e   :  { %3571 = vsyncadd [#allocation7], 4294966736 }
  0x2f   :  { %3572 = dma.done.wait [#allocation10], 1584  }
  0x30   :  { %3573 = vsyncadd [#allocation10], 4294965712 }
  0x31   :  { %3574 = dma.done.wait [#allocation13], 1584  }
  0x32   :  { %3575 = vsyncadd [#allocation13], 4294965712 }
  0x33   :  { %3576 = dma.done.wait [#allocation16], 304  }
  0x34   :  { %3577 = vsyncadd [#allocation16], 4294966992 }
  0x35   :  { %3578 = dma.done.wait [#allocation19], 784  }
  0x36   :  { %3579 = vsyncadd [#allocation19], 4294966512 }
  0x37   :  { %3580 = dma.done.wait [#allocation22], 16  }
  0x38   :  { %3581 = vsyncadd [#allocation22], 4294967280  ;;  %vm250_vm0 = vcmask 261120   ;;  %v249_v1 = vld [vmem:[%s4897_s2 + $0x18] sm:$0xff]  ;;  %v248_v2 = vld [vmem:[%s4897_s2 + $0x10] sm:$0xff]  ;;  %s3602_s4 = smov 96  }
  0x39   :  { %275 = vmatpush.msra.mxu0 %v249_v1  ;;  %v3786_v3 = vld [vmem:[#allocation3] sm:$0xff]  ;;  %v3796_v7 = vld [vmem:[#allocation3 + $0x8] sm:$0xff]  ;;  %v3800_v10 = vld [vmem:[#allocation3 + $0x10] sm:$0xff]  ;;  %s3604_s12 = smov 64   ;;  %s3606_s18 = smov 126  }
  0x3a   :  { %v247_v4 = vld [vmem:[%s4897_s2 + $0x8] sm:$0xff]  ;;  %v246_v5 = vld [vmem:[%s4897_s2] sm:$0xff]  ;;  %v350_v6 = vsel %vm250_vm0, %v3786_v3, 0.0  ;;  %v353_v9 = vsel %vm250_vm0, %v3796_v7, 0.0  ;;  %v356_v13 = vsel %vm250_vm0, %v3800_v10, 0.0  ;;  %v244_v18 = vld [vmem:[#allocation6 + $0x10] sm:$0xff] }
  0x3b   :  { %276 = vmatpush.msra.mxu0 %v248_v2  ;;  %v242_v8 = vld [vmem:[#allocation6] sm:$0xff]  ;;  %351 = vadd.xlane.f32.xlu0 %v350_v6  ;;  %v3802_v11 = vld [vmem:[#allocation3 + $0x18] sm:$0xff]  ;;  %v366_v12 = vadd.f32 %v353_v9, %v350_v6  ;;  %v243_v17 = vld [vmem:[#allocation6 + $0x8] sm:$0xff]  ;;  %s3607_s9 = smov 127   ;;  %s3608_s16 = smov 122  }
  0x3c   :  { %v359_v14 = vsel %vm250_vm0, %v3802_v11, 0.0  ;;  %357 = vadd.xlane.f32.xlu1 %v356_v13  ;;  %v245_v19 = vld [vmem:[#allocation6 + $0x18] sm:$0xff]  ;;  %v486_v63 = vld [vmem:[#allocation12 + $0x18] sm:$0xff]  ;;  %s3609_s13 = smov 124   ;;  %s3610_s14 = smov 123  }
  0x3d   :  { %277 = vmatpush.msra.mxu0 %v247_v4  ;;  %v367_v15 = vadd.f32 %v366_v12, %v356_v13  ;;  %511 = vmatpush.msra.mxu2 %v486_v63  ;;  %s3611_s3 = smov 121   ;;  %s3612_s22 = smov 120  }
  0x3e   :  { %s2815_s0 = sshll.u32 %s4912_s17, 4  ;;  %s2816_s0 = int_to_ptr.hbm [resolvable:$true] %s2815_s0 }
  0x3f   :  { %278 = vmatpush.msra.mxu0 %v246_v5  ;;  %v368_v16 = vadd.f32 %v367_v15, %v359_v14 }
  0x40   :  { %2834 = vmatmul.msk.f32.vlgmr.msra.gmra.mxu0 %vm250_vm0, %v242_v8 }
  0x41   :  { %v369_v20 = vrot.slane %v368_v16, 4 }
  0x43   :  { %354 = vadd.xlane.f32.xlu0 %v353_v9  ;;  %v370_v21 = vadd.f32 %v369_v20, %v368_v16 }
  0x44   :  { %360 = vadd.xlane.f32.xlu1 %v359_v14 }
  0x45   :  { %v371_v22 = vrot.slane %v370_v21, 2 }
  0x47   :  { %v372_v23 = vadd.f32 %v371_v22, %v370_v21 }
  0x48   :  { %2835 = vmatmul.msk.f32.gmra.mxu0 %vm250_vm0, %v243_v17 }
  0x49   :  { %v373_v25 = vrot.slane %v372_v23, 1 }
  0x4b   :  { %v374_v26 = vadd.f32 %v373_v25, %v372_v23  ;;  %v485_v25 = vld [vmem:[#allocation12 + $0x10] sm:$0xff] }
  0x4c   :  { %512 = vmatpush.msra.mxu2 %v485_v25  ;;  %v3601_v25 = vmov 1  }
  0x4d   :  { %v375_v29 = vmax.f32 %v374_v26, 1e-12  ;;  %v484_v26 = vld [vmem:[#allocation12 + $0x8] sm:$0xff]  ;;  %3031 = vset.pattern.permute.xlu2 %v3601_v25  ;;  %3032 = vset.pattern.permute.xlu0 %v3601_v25 }
  0x4e   :  { %513 = vmatpush.msra.mxu2 %v484_v26  ;;  %v909_v26 = vld [vmem:[#allocation9] sm:$0xff]  ;;  %3033 = vset.pattern.permute.xlu1 %v3601_v25 }
  0x4f   :  { %vm426_vm4 = vweird.f32 %v375_v29 }
  0x50   :  { %2836 = vmatmul.msk.f32.gmra.mxu0 %vm250_vm0, %v244_v18 }
  0x58   :  { %2837 = vmatmul.msk.f32.gmra.mxu0 %vm250_vm0, %v245_v19 }
  0xae   :  { %v352_v24 = vpop.xlane.xlu0 %351 }
  0xaf   :  { %v362_v27 = vmax.f32 %v352_v24, 1e-12  ;;  %v358_v31 = vpop.xlane.xlu1 %357 }
  0xb0   :  { %v364_v36 = vmax.f32 %v358_v31, 1e-12 }
  0xb1   :  { %3122 = vrsqrt.f32 %v362_v27  ;;  %vm382_vm1 = vweird.f32 %v362_v27 }
  0xb2   :  { %3124 = vrsqrt.f32 %v375_v29  ;;  %vm402_vm10 = vweird.f32 %v364_v36 }
  0xb6   :  { %v355_v28 = vpop.xlane.xlu0 %354 }
  0xb7   :  { %v363_v30 = vmax.f32 %v355_v28, 1e-12  ;;  %v3123_v32 = vpop.eup %3122  ;;  %v361_v43 = vpop.xlane.xlu1 %360  ;;  %v3105_v28 = vld [vmem:[#allocation8] ss:$0 sm:$0xff] }
  0xb8   :  { %v377_v34 = vmul.f32 %v3123_v32, %v362_v27  ;;  %v3125_v35 = vpop.eup %3124  ;;  %v365_v46 = vmax.f32 %v361_v43, 1e-12  ;;  %vm383_vm2 = vweird.f32 %v3123_v32  ;;  %v483_v27 = vld [vmem:[#allocation12] sm:$0xff] }
  0xb9   :  { %3126 = vrsqrt.f32 %v363_v30  ;;  %v421_v38 = vmul.f32 %v3125_v35, %v375_v29  ;;  %vm3816_vm3 = vmor %vm382_vm1, %vm383_vm2  ;;  %vm427_vm5 = vweird.f32 %v3125_v35  ;;  %vm392_vm6 = vweird.f32 %v363_v30  ;;  %514 = vmatpush.msra.mxu2 %v483_v27 }
  0xba   :  { %v378_v39 = vmul.f32 %v3123_v32, %v377_v34  ;;  %3128 = vrsqrt.f32 %v364_v36  ;;  %vm428_vm8 = vmor %vm426_vm4, %vm427_vm5  ;;  %vm412_vm13 = vweird.f32 %v365_v46  ;;  %v292_v29 = vlaneseq }
  0xbb   :  { %v422_v44 = vmul.f32 %v3125_v35, %v421_v38  ;;  %3130 = vrsqrt.f32 %v365_v46 }
  0xbc   :  { %v379_v45 = vmul.f32 0.5, %v378_v39  ;;  %v302_v31 = vand.u32 127, %v292_v29 }
  0xbd   :  { %v280_v33 = vpop.f32.mrf.mxu0  ;;  %v423_v50 = vmul.f32 0.5, %v422_v44 }
  0xbe   :  { %v380_v49 = vsub.f32 1.5, %v379_v45  ;;  %v3600_v45 = vmov 1.0  }
  0xbf   :  { %v3127_v37 = vpop.eup %3126  ;;  %v424_v55 = vsub.f32 1.5, %v423_v50 }
  0xc0   :  { %v387_v42 = vmul.f32 %v3127_v37, %v363_v30  ;;  %v3129_v48 = vpop.eup %3128  ;;  %v381_v54 = vmul.f32 %v3123_v32, %v380_v49  ;;  %vm393_vm7 = vweird.f32 %v3127_v37  ;;  %v293_v30 = vshrl.u32 %v292_v29, 7 }
  0xc1   :  { %v397_v53 = vmul.f32 %v3129_v48, %v364_v36  ;;  %v3131_v59 = vpop.eup %3130  ;;  %v425_v61 = vmul.f32 %v3125_v35, %v424_v55  ;;  %vm394_vm9 = vmor %vm392_vm6, %vm393_vm7  ;;  %vm403_vm11 = vweird.f32 %v3129_v48  ;;  %v312_v36 = vadd.s32 1, %v302_v31 }
  0xc2   :  { %v388_v47 = vmul.f32 %v3127_v37, %v387_v42  ;;  %v385_v60 = vsel %vm3816_vm3, %v3123_v32, %v381_v54  ;;  %v407_v2 = vmul.f32 %v3131_v59, %v365_v46  ;;  %vm404_vm12 = vmor %vm402_vm10, %vm403_vm11  ;;  %vm413_vm14 = vweird.f32 %v3131_v59 }
  0xc3   :  { %v398_v58 = vmul.f32 %v3129_v48, %v397_v53  ;;  %v416_v4 = vmul.f32 %v385_v60, %v3786_v3  ;;  %v429_v5 = vsel %vm428_vm8, %v3125_v35, %v425_v61  ;;  %vm414_vm15 = vmor %vm412_vm13, %vm413_vm14  ;;  %v300_v34 = vadd.s32 56, %v293_v30 }
  0xc4   :  { %v389_v52 = vmul.f32 0.5, %v388_v47  ;;  %v408_v8 = vmul.f32 %v3131_v59, %v407_v2  ;;  %v303_v35 = vmul.u32 32, %v302_v31  ;;  %v298_v38 = vadd.s32 40, %v293_v30  ;;  %v3106_v2 = vld [vmem:[#allocation14] ss:$0 sm:$0xff] }
  0xc5   :  { %v283_v40 = vpop.f32.mrf.mxu0  ;;  %v399_v1 = vmul.f32 0.5, %v398_v58  ;;  %v3827_v12 = vmul.f32 %v429_v5, %v416_v4  ;;  %v297_v42 = vadd.s32 32, %v293_v30  ;;  %v296_v43 = vadd.s32 24, %v293_v30 }
  0xc6   :  { %v3812_v41 = vpack.i.bf16 %v280_v33, %v283_v40  ;;  %v390_v57 = vsub.f32 1.5, %v389_v52  ;;  %v409_v15 = vmul.f32 0.5, %v408_v8  ;;  %vm311_vm1 = vcmp.ge.s32.totalorder %v300_v34, %v303_v35 }
  0xc7   :  { %v400_v6 = vsub.f32 1.5, %v399_v1  ;;  %vm309_vm5 = vcmp.ge.s32.totalorder %v298_v38, %v303_v35  ;;  %v295_v47 = vadd.s32 16, %v293_v30  ;;  %v294_v63 = vadd.s32 8, %v293_v30 }
  0xc8   :  { %v391_v0 = vmul.f32 %v3127_v37, %v390_v57  ;;  %v410_v17 = vsub.f32 1.5, %v409_v15 }
  0xc9   :  { %v401_v14 = vmul.f32 %v3129_v48, %v400_v6 }
  0xca   :  { %v395_v9 = vsel %vm394_vm9, %v3127_v37, %v391_v0  ;;  %v411_v20 = vmul.f32 %v3131_v59, %v410_v17  ;;  %v299_v37 = vadd.s32 48, %v293_v30  ;;  %vm308_vm9 = vcmp.ge.s32.totalorder %v297_v42, %v303_v35 }
  0xcb   :  { %v417_v13 = vmul.f32 %v395_v9, %v3796_v7  ;;  %v405_v18 = vsel %vm404_vm12, %v3129_v48, %v401_v14  ;;  %vm307_vm12 = vcmp.ge.s32.totalorder %v296_v43, %v303_v35 }
  0xcc   :  { %v418_v19 = vmul.f32 %v405_v18, %v3800_v10  ;;  %v415_v22 = vsel %vm414_vm15, %v3131_v59, %v411_v20  ;;  %vm310_vm2 = vcmp.ge.s32.totalorder %v299_v37, %v303_v35  ;;  %vm306_vm15 = vcmp.ge.s32.totalorder %v295_v47, %v303_v35  ;;  %v912_v18 = vld [vmem:[#allocation9 + $0x18] sm:$0xff]  ;;  %v911_v20 = vld [vmem:[#allocation9 + $0x10] sm:$0xff] }
  0xcd   :  { %v3814_v51 = vpop.f32.mrf.mxu0  ;;  %v3832_v16 = vmul.f32 %v429_v5, %v417_v13  ;;  %v419_v23 = vmul.f32 %v415_v22, %v3802_v11  ;;  %v910_v22 = vld [vmem:[#allocation9 + $0x8] sm:$0xff] }
  0xce   :  { %v3837_v21 = vmul.f32 %v429_v5, %v418_v19  ;;  %v578_v19 = vld [vmem:[%s4902_s7] sm:$0x3] }
  0xcf   :  { %v3842_v24 = vmul.f32 %v429_v5, %v419_v23  ;;  %v3940_v23 = vld [vmem:[#allocation15] ss:$0 sm:$0xff] }
  0xd0   :  { %732 = vperm.xlu2 %3031, %v3940_v23  }
  0xd5   :  { %v3822_v62 = vpop.f32.mrf.mxu0 }
  0xd6   :  { %462 = vmatpush.msra.mxu1 %v3822_v62 }
  0xd8   :  { %463 = vmatpush.msra.mxu1 %v3814_v51 }
  0xda   :  { %464 = vmatpush.msra.mxu1 %v283_v40  ;;  %v313_v40 = vmul.u32 32, %v312_v36 }
  0xdc   :  { %465 = vmatpush.msra.mxu1 %v280_v33  ;;  %vm321_vm3 = vcmp.lt.s32.totalorder %v300_v34, %v313_v40  ;;  %vm320_vm4 = vcmp.lt.s32.totalorder %v299_v37, %v313_v40  ;;  %vm319_vm6 = vcmp.lt.s32.totalorder %v298_v38, %v313_v40  ;;  %vm318_vm10 = vcmp.lt.s32.totalorder %v297_v42, %v313_v40  ;;  %v4000_v38 = vld [vmem:[#allocation3 + $0x20] sm:$0xff] }
  0xdd   :  { %2846 = vmatmul.msk.f32.vlgmr.msra.gmra.mxu1 %vm250_vm0, %v3827_v12  ;;  %vm3850_vm7 = vmand %vm311_vm1, %vm321_vm3  ;;  %vm317_vm13 = vcmp.lt.s32.totalorder %v296_v43, %v313_v40  ;;  %vm316_vm1 = vcmp.lt.s32.totalorder %v295_v47, %v313_v40  ;;  %v984_v42 = vsel %vm250_vm0, %v4000_v38, 0.0 }
  0xde   :  { %2854 = vmatpush.msk.msra.mxu3 %vm3850_vm7, %v3600_v45  ;;  %vm3857_vm8 = vmand %vm310_vm2, %vm320_vm4  ;;  %vm305_vm4 = vcmp.ge.s32.totalorder %v294_v63, %v303_v35 }
  0xdf   :  { %vm3861_vm11 = vmand %vm309_vm5, %vm319_vm6  ;;  %vm315_vm5 = vcmp.lt.s32.totalorder %v294_v63, %v313_v40 }
  0xe0   :  { %2855 = vmatpush.msk.msra.mxu3 %vm3857_vm8, %v3600_v45  ;;  %vm3868_vm14 = vmand %vm308_vm9, %vm318_vm10  ;;  %vm304_vm9 = vcmp.ge.s32.totalorder %v293_v30, %v303_v35  ;;  %vm314_vm10 = vcmp.lt.s32.totalorder %v293_v30, %v313_v40 }
  0xe1   :  { %vm3877_vm2 = vmand %vm307_vm12, %vm317_vm13  ;;  %vm4913_vm13 = vcmask 523264  }
  0xe2   :  { %2856 = vmatpush.msk.msra.mxu3 %vm3861_vm11, %v3600_v45  ;;  %vm3886_vm3 = vmand %vm306_vm15, %vm316_vm1 }
  0xe3   :  { %vm3904_vm6 = vmand %vm305_vm4, %vm315_vm5 }
  0xe4   :  { %2857 = vmatpush.msk.msra.mxu3 %vm3868_vm14, %v3600_v45  ;;  %vm3911_vm12 = vmand %vm304_vm9, %vm314_vm10 }
  0xe5   :  { %2847 = vmatmul.msk.f32.gmra.mxu1 %vm250_vm0, %v3832_v16 }
  0xe6   :  { %2858 = vmatpush.msk.msra.mxu3 %vm3877_vm2, %v3600_v45 }
  0xe8   :  { %2859 = vmatpush.msk.msra.mxu3 %vm3886_vm3, %v3600_v45 }
  0xea   :  { %2860 = vmatpush.msk.msra.mxu3 %vm3904_vm6, %v3600_v45 }
  0xec   :  { %2861 = vmatpush.msk.msra.mxu3 %vm3911_vm12, %v3600_v45 }
  0xed   :  { %2848 = vmatmul.msk.f32.gmra.mxu1 %vm250_vm0, %v3837_v21 }
  0xf5   :  { %2849 = vmatmul.msk.f32.gmra.mxu1 %vm250_vm0, %v3842_v24 }
 0x12a   :  { %v733_v36 = vpop.permute.xlu2 %732 }
 0x12b   :  { %v735_v43 = vmul.f32 %v733_v36, %v3786_v3 }
 0x15a   :  { %v467_v32 = vpop.f32.mrf.mxu1 }
 0x15b   :  { %v468_v33 = vadd.f32 %v3105_v28, %v467_v32 }
 0x15d   :  { %v3846_v39 = vmax.f32 %v468_v33, 0.0 }
 0x15f   :  { %2850 = vmatmul.msk.f32.vlgmr.msra.gmra.mxu2 %vm250_vm0, %v3846_v39 }
 0x162   :  { %v470_v48 = vpop.f32.mrf.mxu1 }
 0x163   :  { %v471_v50 = vadd.f32 %v3105_v28, %v470_v48 }
 0x165   :  { %v3872_v53 = vmax.f32 %v471_v50, 0.0 }
 0x167   :  { %2851 = vmatmul.msk.f32.gmra.mxu2 %vm250_vm0, %v3872_v53 }
 0x16a   :  { %v473_v56 = vpop.f32.mrf.mxu1 }
 0x16b   :  { %v474_v57 = vadd.f32 %v3105_v28, %v473_v56 }
 0x16d   :  { %v3896_v58 = vmax.f32 %v474_v57, 0.0 }
 0x16f   :  { %2852 = vmatmul.msk.f32.gmra.mxu2 %vm250_vm0, %v3896_v58 }
 0x172   :  { %v476_v59 = vpop.f32.mrf.mxu1 }
 0x173   :  { %v477_v60 = vadd.f32 %v3105_v28, %v476_v59  ;;  %v4012_v59 = vld [vmem:[#allocation3 + $0x30] sm:$0xff] }
 0x175   :  { %v3900_v61 = vmax.f32 %v477_v60, 0.0  ;;  %v990_v60 = vsel %vm250_vm0, %v4012_v59, 0.0 }
 0x177   :  { %2853 = vmatmul.msk.f32.gmra.mxu2 %vm250_vm0, %v3900_v61 }
 0x1e2   :  { %v516_v4 = vpop.f32.mrf.mxu2 }
 0x1e3   :  { %v532_v5 = vmul.f32 %v3106_v2, %v516_v4 }
 0x1e5   :  { %2862 = vmatmul.msk.f32.vlgmr.msra.gmra.mxu3 %vm4913_vm13, %v532_v5  ;;  %v736_v5 = vmul.f32 %v733_v36, %v3796_v7 }
 0x1ea   :  { %v519_v6 = vpop.f32.mrf.mxu2 }
 0x1eb   :  { %v533_v8 = vmul.f32 %v3106_v2, %v519_v6  ;;  %v3039_v9 = vpack.i.bf16 %v516_v4, %v519_v6 }
 0x1ed   :  { %2863 = vmatmul.msk.f32.gmra.mxu3 %vm4913_vm13, %v533_v8 }
 0x1f2   :  { %v3920_v13 = vpop.f32.mrf.mxu2 }
 0x1f3   :  { %v534_v14 = vmul.f32 %v3106_v2, %v3920_v13 }
 0x1f5   :  { %2864 = vmatmul.msk.f32.gmra.mxu3 %vm4913_vm13, %v534_v14 }
 0x1fa   :  { %v3924_v15 = vpop.f32.mrf.mxu2 }
 0x1fb   :  { %2866 = vmatpush.xpose.msk.msrb.mxu0 %vm4913_vm13, %v3924_v15  ;;  %876 = vmatpush.msrb.mxu2 %v3924_v15  ;;  %v535_v17 = vmul.f32 %v3106_v2, %v3924_v15  ;;  %v3034_v2 = vpack.i.bf16 %v3920_v13, %v3924_v15 }
 0x1fd   :  { %2865 = vmatmul.msk.f32.gmra.mxu3 %vm4913_vm13, %v535_v17  ;;  %877 = vmatpush.msrb.mxu2 %v3920_v13 }
 0x1ff   :  { %2867 = vmatpush.xpose.msk.msrb.mxu0 %vm4913_vm13, %v3920_v13  ;;  %878 = vmatpush.msrb.mxu2 %v519_v6 }
 0x201   :  { %879 = vmatpush.msrb.mxu2 %v516_v4 }
 0x203   :  { %2868 = vmatpush.xpose.msk.msrb.mxu0 %vm4913_vm13, %v519_v6 }
 0x207   :  { %2869 = vmatpush.xpose.msk.msrb.mxu0 %vm4913_vm13, %v516_v4 }
 0x20a   :  { %2870 = vmatmul.msk.f32.vlgmr.msrb.gmra.mxu0 %vm4913_vm13, %v578_v19  ;;  %v737_v19 = vmul.f32 %v733_v36, %v3800_v10 }
 0x20b   :  { %925 = vmatpush.msra.mxu0 %v912_v18 }
 0x20d   :  { %926 = vmatpush.msra.mxu0 %v911_v20 }
 0x20f   :  { %927 = vmatpush.msra.mxu0 %v910_v22 }
 0x211   :  { %928 = vmatpush.msra.mxu0 %v909_v26 }
 0x212   :  { %2879 = vmatmul.msk.f32.vlgmr.msra.gmra.mxu0 %vm250_vm0, %v3846_v39 }
 0x213   :  { %2895 = vmatpush.msk.msrb.mxu0 %vm3850_vm7, %v3600_v45 }
 0x215   :  { %2896 = vmatpush.msk.msrb.mxu0 %vm3857_vm8, %v3600_v45 }
 0x217   :  { %2897 = vmatpush.msk.msrb.mxu0 %vm3861_vm11, %v3600_v45 }
 0x219   :  { %2898 = vmatpush.msk.msrb.mxu0 %vm3868_vm14, %v3600_v45 }
 0x21a   :  { %2880 = vmatmul.msk.f32.gmra.mxu0 %vm250_vm0, %v3872_v53 }
 0x21b   :  { %2899 = vmatpush.msk.msrb.mxu0 %vm3877_vm2, %v3600_v45 }
 0x21d   :  { %2900 = vmatpush.msk.msrb.mxu0 %vm3886_vm3, %v3600_v45 }
 0x21f   :  { %2901 = vmatpush.msk.msrb.mxu0 %vm3904_vm6, %v3600_v45 }
 0x221   :  { %2902 = vmatpush.msk.msrb.mxu0 %vm3911_vm12, %v3600_v45 }
 0x222   :  { %2881 = vmatmul.msk.f32.gmra.mxu0 %vm250_vm0, %v3896_v58 }
 0x22a   :  { %2882 = vmatmul.msk.f32.gmra.mxu0 %vm250_vm0, %v3900_v61 }
 0x268   :  { %v3978_v27 = vpop.f32.mrf.mxu3 }
 0x269   :  { %711 = vperm.xlu2 %3031, %v3978_v27  }
 0x270   :  { %v3981_v28 = vpop.f32.mrf.mxu3 }
 0x271   :  { %715 = vperm.xlu0 %3032, %v3981_v28  }
 0x278   :  { %v3984_v29 = vpop.f32.mrf.mxu3 }
 0x279   :  { %719 = vperm.xlu1 %3033, %v3984_v29  }
 0x280   :  { %v3987_v30 = vpop.f32.mrf.mxu3 }
 0x281   :  { %3040 = vrot.lane.b32.xlu1 %v3039_v9, %s3602_s4  ;;  %723 = vperm.xlu2 %3031, %v3987_v30  }
 0x287   :  { %v3991_v31 = vpop.f32.mrf.mxu0 }
 0x288   :  { %v726_v37 = vperm.slane %v3991_v31, 1 }
 0x28f   :  { %v930_v32 = vpop.f32.mrf.mxu0 }
 0x297   :  { %v933_v33 = vpop.f32.mrf.mxu0 }
 0x29b   :  { %985 = vadd.xlane.f32.xlu0 %v984_v42 }
 0x29f   :  { %v936_v34 = vpop.f32.mrf.mxu0 }
 0x2a7   :  { %v939_v35 = vpop.f32.mrf.mxu0 }
 0x2a8   :  { %958 = vmatpush.msrb.mxu3 %v939_v35 }
 0x2aa   :  { %959 = vmatpush.msrb.mxu3 %v936_v34  ;;  %v738_v34 = vmul.f32 %v733_v36, %v3802_v11 }
 0x2ac   :  { %960 = vmatpush.msrb.mxu3 %v933_v33 }
 0x2ae   :  { %961 = vmatpush.msrb.mxu3 %v930_v32 }
 0x2af   :  { %2883 = vmatmul.msk.f32.vlgmr.msrb.gmra.mxu3 %vm250_vm0, %v3827_v12 }
 0x2b7   :  { %2884 = vmatmul.msk.f32.gmra.mxu3 %vm250_vm0, %v3832_v16 }
 0x2bf   :  { %2885 = vmatmul.msk.f32.gmra.mxu3 %vm250_vm0, %v3837_v21  ;;  %v4007_v21 = vld [vmem:[#allocation3 + $0x28] sm:$0xff] }
 0x2c0   :  { %v987_v56 = vsel %vm250_vm0, %v4007_v21, 0.0 }
 0x2c1   :  { %988 = vadd.xlane.f32.xlu0 %v987_v56  ;;  %v1000_v57 = vadd.f32 %v987_v56, %v984_v42 }
 0x2c3   :  { %v712_v40 = vpop.permute.xlu2 %711  ;;  %v4016_v63 = vadd.f32 %v1000_v57, %v990_v60 }
 0x2c4   :  { %v727_v47 = vadd.f32 %v726_v37, %v712_v40 }
 0x2c6   :  { %v739_v12 = vadd.f32 %v735_v43, %v727_v47  ;;  %v4032_v43 = vpack.i.bf16 %v3814_v51, %v3822_v62 }
 0x2c7   :  { %2886 = vmatmul.msk.f32.gmra.mxu3 %vm250_vm0, %v3842_v24  ;;  %v3603_v24 = vmov 0  }
 0x2c8   :  { %vm743_vm15 = vcmp.gt.f32.partialorder %v739_v12, 0.0  ;;  %v747_v16 = vmul.f32 0.2, %v739_v12  ;;  %3044 = vset.pattern.permute.xlu0 %v3603_v24  ;;  %3045 = vset.pattern.permute.xlu2 %v3603_v24 }
 0x2c9   :  { %3056 = vset.pattern.permute.xlu1 %v3603_v24 }
 0x2ca   :  { %v751_v48 = vsel %vm743_vm15, %v739_v12, %v747_v16 }
 0x2cb   :  { %v755_v50 = vsel %vm250_vm0, %v751_v48, -inf }
 0x2cc   :  { %756 = vmax.xlane.f32.xlu2 %v755_v50 }
 0x2db   :  { %v724_v32 = vpop.permute.xlu2 %723 }
 0x2dc   :  { %v730_v33 = vadd.f32 %v726_v37, %v724_v32 }
 0x2de   :  { %v742_v35 = vadd.f32 %v738_v34, %v730_v33 }
 0x2e0   :  { %v750_v40 = vmul.f32 0.2, %v742_v35  ;;  %vm746_vm5 = vcmp.gt.f32.partialorder %v742_v35, 0.0 }
 0x2e2   :  { %v754_v42 = vsel %vm746_vm5, %v742_v35, %v750_v40 }
 0x2e3   :  { %v716_v4 = vpop.permute.xlu0 %715  ;;  %v764_v47 = vsel %vm250_vm0, %v754_v42, -inf }
 0x2e4   :  { %v728_v6 = vadd.f32 %v726_v37, %v716_v4  ;;  %3035 = vrot.lane.b32.xlu2 %v3034_v2, %s3602_s4 }
 0x2e6   :  { %v740_v8 = vadd.f32 %v736_v5, %v728_v6 }
 0x2e8   :  { %vm744_vm1 = vcmp.gt.f32.partialorder %v740_v8, 0.0  ;;  %v748_v9 = vmul.f32 0.2, %v740_v8 }
 0x2ea   :  { %v752_v14 = vsel %vm744_vm1, %v740_v8, %v748_v9 }
 0x2eb   :  { %v720_v17 = vpop.permute.xlu1 %719  ;;  %v758_v18 = vsel %vm250_vm0, %v752_v14, -inf }
 0x2ec   :  { %v729_v20 = vadd.f32 %v726_v37, %v720_v17  ;;  %759 = vmax.xlane.f32.xlu1 %v758_v18 }
 0x2ee   :  { %v741_v22 = vadd.f32 %v737_v19, %v729_v20 }
 0x2f0   :  { %vm745_vm4 = vcmp.gt.f32.partialorder %v741_v22, 0.0  ;;  %v749_v13 = vmul.f32 0.2, %v741_v22 }
 0x2f2   :  { %v753_v15 = vsel %vm745_vm4, %v741_v22, %v749_v13 }
 0x2f3   :  { %v761_v26 = vsel %vm250_vm0, %v753_v15, -inf  ;;  %v3041_v56 = vpop.permute.xlu1 %3040 }
 0x2f4   :  { %762 = vmax.xlane.f32.xlu0 %v761_v26  ;;  %991 = vadd.xlane.f32.xlu1 %v990_v60  ;;  %v3042_v51 = vunpack.i.l.bf16 %v3041_v56  ;;  %v3043_v62 = vunpack.i.h.bf16 %v3041_v56 }
 0x308   :  { %617 = vperm.xlu0 %3044, %v3978_v27  }
 0x30d   :  { %3047 = vrot.lane.b32.xlu1 %v4032_v43, %s3602_s4  ;;  %765 = vmax.xlane.f32.xlu2 %v764_v47 }
 0x30e   :  { %v986_v2 = vpop.xlane.xlu0 %985 }
 0x334   :  { %v4038_v4 = vpop.xlane.xlu0 %988 }
 0x33f   :  { %v757_v12 = vpop.xlane.xlu2 %756 }
 0x340   :  { %v767_v37 = vsub.f32 %v751_v48, %v757_v12 }
 0x342   :  { %v771_v16 = vmul.f32 1.442695, %v767_v37 }
 0x344   :  { %3132 = vpow2.f32 %v771_v16 }
 0x347   :  { %v3036_v36 = vpop.permute.xlu2 %3035 }
 0x348   :  { %v3037_v50 = vunpack.i.l.bf16 %v3036_v36  ;;  %v3038_v27 = vunpack.i.h.bf16 %v3036_v36 }
 0x34a   :  { %v3133_v57 = vpop.eup %3132  ;;  %835 = vmatpush.msrb.mxu1 %v3037_v50 }
 0x34b   :  { %v779_v60 = vsel %vm250_vm0, %v3133_v57, 0.0 }
 0x34c   :  { %780 = vadd.xlane.f32.xlu2 %v779_v60  ;;  %836 = vmatpush.msrb.mxu1 %v3038_v27 }
 0x34e   :  { %837 = vmatpush.msrb.mxu1 %v3042_v51  ;;  %v996_v51 = vmax.f32 %v986_v2, 1e-12 }
 0x350   :  { %838 = vmatpush.msrb.mxu1 %v3043_v62  ;;  %vm1016_vm15 = vweird.f32 %v996_v51 }
 0x35f   :  { %v760_v48 = vpop.xlane.xlu1 %759 }
 0x360   :  { %v768_v5 = vsub.f32 %v752_v14, %v760_v48 }
 0x362   :  { %v773_v6 = vmul.f32 1.442695, %v768_v5 }
 0x364   :  { %3134 = vpow2.f32 %v773_v6  ;;  %v4067_v6 = vperm.slane %v3991_v31, 0 }
 0x367   :  { %v763_v8 = vpop.xlane.xlu0 %762  ;;  %v4042_v13 = vpop.xlane.xlu1 %991 }
 0x368   :  { %v769_v9 = vsub.f32 %v753_v15, %v763_v8 }
 0x36a   :  { %v3135_v17 = vpop.eup %3134  ;;  %v775_v18 = vmul.f32 1.442695, %v769_v9 }
 0x36b   :  { %v782_v19 = vsel %vm250_vm0, %v3135_v17, 0.0 }
 0x36c   :  { %3136 = vpow2.f32 %v775_v18  ;;  %783 = vadd.xlane.f32.xlu0 %v782_v19  ;;  %v4072_v18 = vmax.f32 %v4038_v4, 1e-12 }
 0x372   :  { %v3137_v20 = vpop.eup %3136 }
 0x373   :  { %v785_v22 = vsel %vm250_vm0, %v3137_v20, 0.0 }
 0x374   :  { %786 = vadd.xlane.f32.xlu2 %v785_v22 }
 0x37a   :  { %v618_v16 = vpop.permute.xlu0 %617 }
 0x37b   :  { %v636_v2 = vadd.f32 %v4067_v6, %v618_v16 }
 0x37f   :  { %v3048_v26 = vpop.permute.xlu1 %3047 }
 0x380   :  { %v3049_v32 = vunpack.i.l.bf16 %v3048_v26  ;;  %622 = vperm.xlu0 %3044, %v3981_v28   ;;  %v766_v14 = vpop.xlane.xlu2 %765  ;;  %v3050_v34 = vunpack.i.h.bf16 %v3048_v26  ;;  %v4057_v28 = vld [vmem:[#allocation3 + $0x38] sm:$0xff] }
 0x381   :  { %v770_v33 = vsub.f32 %v754_v42, %v766_v14  ;;  %v993_v42 = vsel %vm250_vm0, %v4057_v28, 0.0 }
 0x382   :  { %1113 = vmatpush.msra.mxu1 %v3049_v32 }
 0x383   :  { %v777_v15 = vmul.f32 1.442695, %v770_v33 }
 0x384   :  { %1114 = vmatpush.msra.mxu1 %v3050_v34 }
 0x385   :  { %3138 = vpow2.f32 %v777_v15 }
 0x388   :  { %3052 = vrot.lane.b32.xlu0 %v3812_v41, %s3602_s4 }
 0x38b   :  { %v4047_v35 = vpop.eup %3138 }
 0x38c   :  { %v788_v40 = vsel %vm250_vm0, %v4047_v35, 0.0  ;;  %643 = vperm.xlu2 %3045, %v3940_v23  }
 0x38d   :  { %789 = vadd.xlane.f32.xlu1 %v788_v40  ;;  %v4092_v40 = vmax.f32 %v4042_v13, 1e-12 }
 0x390   :  { %627 = vperm.xlu0 %3044, %v3984_v29   ;;  %v1002_v29 = vadd.f32 %v4016_v63, %v993_v42 }
 0x392   :  { %v1003_v37 = vrot.slane %v1002_v29, 4 }
 0x394   :  { %3059 = vset.pattern.permute.xlu2 %v3601_v25  ;;  %v1004_v36 = vadd.f32 %v1003_v37, %v1002_v29 }
 0x398   :  { %3058 = vset.pattern.permute.xlu0 %v3601_v25 }
 0x3a6   :  { %632 = vperm.xlu1 %3056, %v3987_v30   ;;  %v1005_v30 = vrot.slane %v1004_v36, 2 }
 0x3a8   :  { %v1006_v56 = vadd.f32 %v1005_v30, %v1004_v36 }
 0x3aa   :  { %v1007_v27 = vrot.slane %v1006_v56, 1 }
 0x3ac   :  { %v1008_v5 = vadd.f32 %v1007_v27, %v1006_v56 }
 0x3ae   :  { %3057 = vset.pattern.permute.xlu1 %v3601_v25 }
 0x3b5   :  { %994 = vadd.xlane.f32.xlu2 %v993_v42 }
 0x3bf   :  { %v781_v47 = vpop.xlane.xlu2 %780 }
 0x3c0   :  { %3140 = vrcp.f32 %v781_v47 }
 0x3c6   :  { %v3141_v23 = vpop.eup %3140 }
 0x3c7   :  { %v795_v12 = vmul.f32 %v3141_v23, %v3133_v57  ;;  %v4064_v57 = vmax.f32 %v1008_v5, 1e-12 }
 0x3c9   :  { %2871 = vmatmul.msk.f32.vlgmr.msrb.gmra.mxu1 %vm250_vm0, %v795_v12  ;;  %vm1060_vm5 = vweird.f32 %v4064_v57 }
 0x3df   :  { %v784_v50 = vpop.xlane.xlu0 %783 }
 0x3e0   :  { %3142 = vrcp.f32 %v784_v50 }
 0x3e6   :  { %v3143_v60 = vpop.eup %3142 }
 0x3e7   :  { %v787_v62 = vpop.xlane.xlu2 %786  ;;  %v796_v48 = vmul.f32 %v3143_v60, %v3135_v17 }
 0x3e8   :  { %3144 = vrcp.f32 %v787_v62 }
 0x3e9   :  { %2872 = vmatmul.msk.f32.gmra.mxu1 %vm250_vm0, %v796_v48  ;;  %3146 = vrsqrt.f32 %v996_v51 }
 0x3ea   :  { %3148 = vrsqrt.f32 %v4064_v57 }
 0x3eb   :  { %3150 = vrsqrt.f32 %v4072_v18 }
 0x3ec   :  { %3152 = vrsqrt.f32 %v4092_v40 }
 0x3ee   :  { %v3145_v63 = vpop.eup %3144 }
 0x3ef   :  { %v4069_v8 = vpop.permute.xlu2 %643  ;;  %v797_v9 = vmul.f32 %v3145_v63, %v3137_v20  ;;  %v4078_v19 = vpop.eup %3146 }
 0x3f0   :  { %v646_v17 = vmul.f32 %v4069_v8, %v3786_v3  ;;  %v647_v31 = vmul.f32 %v4069_v8, %v3796_v7  ;;  %v1011_v4 = vmul.f32 %v4078_v19, %v996_v51  ;;  %v3149_v14 = vpop.eup %3148  ;;  %vm1017_vm1 = vweird.f32 %v4078_v19 }
 0x3f1   :  { %2873 = vmatmul.msk.f32.gmra.mxu1 %vm250_vm0, %v797_v9  ;;  %v1055_v47 = vmul.f32 %v3149_v14, %v4064_v57  ;;  %v3151_v23 = vpop.eup %3150  ;;  %v648_v63 = vmul.f32 %v4069_v8, %v3800_v10  ;;  %vm4106_vm4 = vmor %vm1016_vm15, %vm1017_vm1  ;;  %vm1026_vm1 = vweird.f32 %v4072_v18 }
 0x3f2   :  { %v623_v22 = vpop.permute.xlu0 %622  ;;  %v650_v26 = vadd.f32 %v646_v17, %v636_v2  ;;  %v1012_v7 = vmul.f32 %v4078_v19, %v1011_v4  ;;  %v1021_v36 = vmul.f32 %v3151_v23, %v4072_v18  ;;  %v3153_v62 = vpop.eup %3152  ;;  %vm1027_vm13 = vweird.f32 %v3151_v23 }
 0x3f3   :  { %v637_v20 = vadd.f32 %v4067_v6, %v623_v22  ;;  %v1056_v13 = vmul.f32 %v3149_v14, %v1055_v47 }
 0x3f4   :  { %vm654_vm9 = vcmp.gt.f32.partialorder %v650_v26, 0.0  ;;  %v658_v32 = vmul.f32 0.2, %v650_v26  ;;  %v1013_v16 = vmul.f32 0.5, %v1012_v7  ;;  %v1022_v27 = vmul.f32 %v3151_v23, %v1021_v36 }
 0x3f5   :  { %v651_v3 = vadd.f32 %v647_v31, %v637_v20  ;;  %v1057_v60 = vmul.f32 0.5, %v1056_v13  ;;  %v1031_v31 = vmul.f32 %v3153_v62, %v4092_v40  ;;  %v649_v13 = vmul.f32 %v4069_v8, %v3802_v11 }
 0x3f6   :  { %v4086_v33 = vsel %vm654_vm9, %v650_v26, %v658_v32  ;;  %v1014_v50 = vsub.f32 1.5, %v1013_v16  ;;  %v1023_v17 = vmul.f32 0.5, %v1022_v27  ;;  %vm1061_vm9 = vweird.f32 %v3149_v14 }
 0x3f7   :  { %v666_v34 = vsel %vm250_vm0, %v4086_v33, -inf  ;;  %vm655_vm10 = vcmp.gt.f32.partialorder %v651_v3, 0.0  ;;  %v659_v15 = vmul.f32 0.2, %v651_v3  ;;  %v1058_v26 = vsub.f32 1.5, %v1057_v60  ;;  %vm1062_vm15 = vmor %vm1060_vm5, %vm1061_vm9 }
 0x3f8   :  { %667 = vmax.xlane.f32.xlu0 %v666_v34  ;;  %v1015_v9 = vmul.f32 %v4078_v19, %v1014_v50  ;;  %v1024_v32 = vsub.f32 1.5, %v1023_v17  ;;  %vm1036_vm5 = vweird.f32 %v4092_v40  ;;  %vm1037_vm9 = vweird.f32 %v3153_v62 }
 0x3f9   :  { %v4094_v42 = vsel %vm655_vm10, %v651_v3, %v659_v15  ;;  %v1032_v3 = vmul.f32 %v3153_v62, %v1031_v31  ;;  %v1059_v34 = vmul.f32 %v3149_v14, %v1058_v26 }
 0x3fa   :  { %v3053_v12 = vpop.permute.xlu0 %3052  ;;  %v669_v29 = vsel %vm250_vm0, %v4094_v42, -inf  ;;  %v1019_v10 = vsel %vm4106_vm4, %v4078_v19, %v1015_v9  ;;  %v1025_v19 = vmul.f32 %v3151_v23, %v1024_v32  ;;  %vm1028_vm4 = vmor %vm1026_vm1, %vm1027_vm13 }
 0x3fb   :  { %v3054_v37 = vunpack.i.l.bf16 %v3053_v12  ;;  %670 = vmax.xlane.f32.xlu1 %v669_v29  ;;  %v3055_v30 = vunpack.i.h.bf16 %v3053_v12  ;;  %v1050_v7 = vmul.f32 %v1019_v10, %v4000_v38  ;;  %v1033_v47 = vmul.f32 0.5, %v1032_v3 }
 0x3fd   :  { %1115 = vmatpush.msra.mxu1 %v3054_v37  ;;  %v1034_v29 = vsub.f32 1.5, %v1033_v47  ;;  %v1029_v37 = vsel %vm1028_vm4, %v3151_v23, %v1025_v19 }
 0x3fe   :  { %v1051_v18 = vmul.f32 %v1029_v37, %v4007_v21 }
 0x3ff   :  { %1116 = vmatpush.msra.mxu1 %v3055_v30  ;;  %v1035_v16 = vmul.f32 %v3153_v62, %v1034_v29 }
 0x400   :  { %v790_v56 = vpop.xlane.xlu1 %789 }
 0x401   :  { %3154 = vrcp.f32 %v790_v56 }
 0x402   :  { %v628_v48 = vpop.permute.xlu0 %627 }
 0x403   :  { %v638_v5 = vadd.f32 %v4067_v6, %v628_v48 }
 0x405   :  { %v652_v22 = vadd.f32 %v648_v63, %v638_v5 }
 0x407   :  { %v3155_v51 = vpop.eup %3154  ;;  %vm656_vm10 = vcmp.gt.f32.partialorder %v652_v22, 0.0  ;;  %v660_v20 = vmul.f32 0.2, %v652_v22 }
 0x408   :  { %v798_v4 = vmul.f32 %v3155_v51, %v4047_v35  ;;  %v1063_v35 = vsel %vm1062_vm15, %v3149_v14, %v1059_v34 }
 0x409   :  { %v4116_v15 = vsel %vm656_vm10, %v652_v22, %v660_v20  ;;  %v4123_v12 = vmul.f32 %v1063_v35, %v1050_v7  ;;  %vm1038_vm10 = vmor %vm1036_vm5, %vm1037_vm9  ;;  %v4129_v30 = vmul.f32 %v1063_v35, %v1051_v18 }
 0x40a   :  { %2874 = vmatmul.msk.f32.gmra.mxu1 %vm250_vm0, %v798_v4  ;;  %v672_v57 = vsel %vm250_vm0, %v4116_v15, -inf  ;;  %v1039_v50 = vsel %vm1038_vm10, %v3153_v62, %v1035_v16 }
 0x40b   :  { %673 = vmax.xlane.f32.xlu2 %v672_v57  ;;  %v1052_v40 = vmul.f32 %v1039_v50, %v4012_v59 }
 0x40d   :  { %v4138_v48 = vmul.f32 %v1063_v35, %v1052_v40 }
 0x412   :  { %2887 = vmatmul.msk.f32.vlgmr.msra.gmra.mxu1 %vm250_vm0, %v4123_v12 }
 0x418   :  { %v633_v36 = vpop.permute.xlu1 %632 }
 0x419   :  { %v639_v14 = vadd.f32 %v4067_v6, %v633_v36 }
 0x41a   :  { %2888 = vmatmul.msk.f32.gmra.mxu1 %vm250_vm0, %v4129_v30 }
 0x41b   :  { %v653_v23 = vadd.f32 %v649_v13, %v639_v14  ;;  %v1138_v14 = vld [vmem:[#allocation12 + $0x38] sm:$0xff]  ;;  %v1137_v13 = vld [vmem:[#allocation12 + $0x30] sm:$0xff] }
 0x41c   :  { %1163 = vmatpush.msra.mxu2 %v1138_v14 }
 0x41d   :  { %vm657_vm13 = vcmp.gt.f32.partialorder %v653_v23, 0.0  ;;  %v661_v56 = vmul.f32 0.2, %v653_v23 }
 0x41e   :  { %1164 = vmatpush.msra.mxu2 %v1137_v13 }
 0x41f   :  { %v665_v27 = vsel %vm657_vm13, %v653_v23, %v661_v56 }
 0x420   :  { %v675_v60 = vsel %vm250_vm0, %v665_v27, -inf }
 0x421   :  { %676 = vmax.xlane.f32.xlu2 %v675_v60 }
 0x422   :  { %2889 = vmatmul.msk.f32.gmra.mxu1 %vm250_vm0, %v4138_v48 }
 0x428   :  { %v995_v6 = vpop.xlane.xlu2 %994 }
 0x429   :  { %v999_v11 = vmax.f32 %v995_v6, 1e-12 }
 0x42b   :  { %3156 = vrsqrt.f32 %v999_v11  ;;  %vm1046_vm15 = vweird.f32 %v999_v11 }
 0x431   :  { %v3157_v8 = vpop.eup %3156 }
 0x432   :  { %v1041_v62 = vmul.f32 %v3157_v8, %v999_v11  ;;  %vm1047_vm1 = vweird.f32 %v3157_v8 }
 0x433   :  { %vm1048_vm4 = vmor %vm1046_vm15, %vm1047_vm1 }
 0x434   :  { %v1042_v5 = vmul.f32 %v3157_v8, %v1041_v62  ;;  %v1135_v62 = vld [vmem:[#allocation12 + $0x20] sm:$0xff] }
 0x436   :  { %v1043_v63 = vmul.f32 0.5, %v1042_v5 }
 0x438   :  { %v1044_v9 = vsub.f32 1.5, %v1043_v63 }
 0x43a   :  { %v1045_v2 = vmul.f32 %v3157_v8, %v1044_v9 }
 0x43c   :  { %v1049_v17 = vsel %vm1048_vm4, %v3157_v8, %v1045_v2 }
 0x43d   :  { %v1053_v31 = vmul.f32 %v1049_v17, %v4057_v28 }
 0x43f   :  { %v4144_v51 = vmul.f32 %v1063_v35, %v1053_v31 }
 0x441   :  { %2890 = vmatmul.msk.f32.gmra.mxu1 %vm250_vm0, %v4144_v51 }
 0x446   :  { %v4154_v56 = vpop.f32.mrf.mxu1 }
 0x466   :  { %v4157_v11 = vpop.f32.mrf.mxu1 }
 0x46b   :  { %v668_v22 = vpop.xlane.xlu0 %667 }
 0x46c   :  { %v678_v26 = vsub.f32 %v4086_v33, %v668_v22 }
 0x46e   :  { %v682_v20 = vmul.f32 1.442695, %v678_v26  ;;  %v671_v10 = vpop.xlane.xlu1 %670  ;;  %v4160_v9 = vpop.f32.mrf.mxu1  ;;  %v3109_v26 = vld [vmem:[#allocation8 + $0x1] ss:$0 sm:$0xff] }
 0x46f   :  { %v679_v4 = vsub.f32 %v4094_v42, %v671_v10  ;;  %v1568_v10 = vld [vmem:[#allocation9 + $0x38] sm:$0xff] }
 0x470   :  { %3158 = vpow2.f32 %v682_v20 }
 0x471   :  { %v684_v32 = vmul.f32 1.442695, %v679_v4  ;;  %v1567_v4 = vld [vmem:[#allocation9 + $0x30] sm:$0xff] }
 0x473   :  { %3160 = vpow2.f32 %v684_v32 }
 0x476   :  { %v3159_v3 = vpop.eup %3158 }
 0x477   :  { %v690_v34 = vsel %vm250_vm0, %v3159_v3, 0.0 }
 0x478   :  { %691 = vadd.xlane.f32.xlu2 %v690_v34  ;;  %v1565_v34 = vld [vmem:[#allocation9 + $0x20] sm:$0xff] }
 0x479   :  { %v3161_v57 = vpop.eup %3160 }
 0x47a   :  { %v693_v7 = vsel %vm250_vm0, %v3161_v57, 0.0 }
 0x47b   :  { %694 = vadd.xlane.f32.xlu0 %v693_v7 }
 0x47e   :  { %v674_v33 = vpop.xlane.xlu2 %673 }
 0x47f   :  { %v680_v19 = vsub.f32 %v4116_v15, %v674_v33 }
 0x481   :  { %v686_v47 = vmul.f32 1.442695, %v680_v19 }
 0x483   :  { %3162 = vpow2.f32 %v686_v47 }
 0x487   :  { %v4163_v2 = vpop.f32.mrf.mxu1 }
 0x489   :  { %v3163_v35 = vpop.eup %3162 }
 0x48a   :  { %v696_v29 = vsel %vm250_vm0, %v3163_v35, 0.0 }
 0x48b   :  { %697 = vadd.xlane.f32.xlu1 %v696_v29 }
 0x48f   :  { %v1118_v31 = vpop.f32.mrf.mxu1 }
 0x490   :  { %v1119_v32 = vadd.f32 %v3109_v26, %v1118_v31 }
 0x492   :  { %v4166_v7 = vmax.f32 %v1119_v32, 0.0 }
 0x494   :  { %v677_v42 = vpop.xlane.xlu2 %676 }
 0x495   :  { %v681_v37 = vsub.f32 %v665_v27, %v677_v42  ;;  %v1136_v27 = vld [vmem:[#allocation12 + $0x28] sm:$0xff] }
 0x496   :  { %1165 = vmatpush.msra.mxu2 %v1136_v27 }
 0x497   :  { %v688_v18 = vmul.f32 1.442695, %v681_v37 }
 0x498   :  { %1166 = vmatpush.msra.mxu2 %v1135_v62 }
 0x499   :  { %3164 = vpow2.f32 %v688_v18 }
 0x49f   :  { %v3165_v16 = vpop.eup %3164 }
 0x4a0   :  { %v699_v36 = vsel %vm250_vm0, %v3165_v16, 0.0 }
 0x4a1   :  { %700 = vadd.xlane.f32.xlu2 %v699_v36 }
 0x4eb   :  { %v692_v50 = vpop.xlane.xlu2 %691 }
 0x4ec   :  { %3166 = vrcp.f32 %v692_v50 }
 0x4ee   :  { %v695_v15 = vpop.xlane.xlu0 %694 }
 0x4ef   :  { %3168 = vrcp.f32 %v695_v15 }
 0x4f2   :  { %v3167_v23 = vpop.eup %3166 }
 0x4f3   :  { %v706_v40 = vmul.f32 %v3167_v23, %v3159_v3  ;;  %v1566_v3 = vld [vmem:[#allocation9 + $0x28] sm:$0xff] }
 0x4f5   :  { %2875 = vmatmul.msk.f32.vlgmr.msrb.gmra.mxu2 %vm250_vm0, %v706_v40  ;;  %v3169_v60 = vpop.eup %3168 }
 0x4f6   :  { %v707_v6 = vmul.f32 %v3169_v60, %v3161_v57  ;;  %1581 = vmatpush.msrb.mxu2 %v1568_v10  ;;  %v1121_v57 = vpop.f32.mrf.mxu1 }
 0x4f7   :  { %v1122_v33 = vadd.f32 %v3109_v26, %v1121_v57 }
 0x4f8   :  { %1582 = vmatpush.msrb.mxu2 %v1567_v4 }
 0x4f9   :  { %v4179_v19 = vmax.f32 %v1122_v33, 0.0  ;;  %v4297_v33 = vld [vmem:[#allocation3 + $0x48] sm:$0xff] }
 0x4fa   :  { %1583 = vmatpush.msrb.mxu2 %v1566_v3 }
 0x4fc   :  { %1584 = vmatpush.msrb.mxu2 %v1565_v34 }
 0x4fd   :  { %2876 = vmatmul.msk.f32.gmra.mxu2 %vm250_vm0, %v707_v6  ;;  %v2907_v6 = vld [vmem:[%s4902_s7 + $0x2] sm:$0x3] }
 0x4fe   :  { %v698_v8 = vpop.xlane.xlu1 %697  ;;  %v1124_v47 = vpop.f32.mrf.mxu1 }
 0x4ff   :  { %3170 = vrcp.f32 %v698_v8  ;;  %v1125_v44 = vadd.f32 %v3109_v26, %v1124_v47  ;;  %v4257_v8 = vld [vmem:[#allocation15 + $0x1] ss:$0 sm:$0xff]  ;;  %v1644_v47 = vsel %vm250_vm0, %v4297_v33, 0.0 }
 0x500   :  { %1386 = vperm.xlu1 %3057, %v4257_v8  }
 0x501   :  { %v4195_v46 = vmax.f32 %v1125_v44, 0.0 }
 0x505   :  { %v3171_v5 = vpop.eup %3170 }
 0x506   :  { %v708_v63 = vmul.f32 %v3171_v5, %v3163_v35  ;;  %v1127_v49 = vpop.f32.mrf.mxu1  ;;  %v3110_v35 = vld [vmem:[#allocation14 + $0x1] ss:$0 sm:$0xff] }
 0x507   :  { %v1128_v52 = vadd.f32 %v3109_v26, %v1127_v49 }
 0x508   :  { %2877 = vmatmul.msk.f32.gmra.mxu2 %vm250_vm0, %v708_v63 }
 0x509   :  { %v4202_v54 = vmax.f32 %v1128_v52, 0.0 }
 0x514   :  { %v701_v17 = vpop.xlane.xlu2 %700 }
 0x515   :  { %3172 = vrcp.f32 %v701_v17 }
 0x51b   :  { %v3173_v22 = vpop.eup %3172 }
 0x51c   :  { %v709_v20 = vmul.f32 %v3173_v22, %v3165_v16 }
 0x51e   :  { %2878 = vmatmul.msk.f32.gmra.mxu2 %vm250_vm0, %v709_v20 }
 0x526   :  { %2891 = vmatmul.msk.f32.vlgmr.msra.gmra.mxu2 %vm250_vm0, %v4166_v7 }
 0x527   :  { %2938 = vmatpush.msk.msra.mxu2 %vm3850_vm7, %v3600_v45  ;;  %vm4978_vm7 = vcmask 523264  }
 0x529   :  { %2939 = vmatpush.msk.msra.mxu2 %vm3857_vm8, %v3600_v45  ;;  %vm4979_vm8 = vmmov %vm4978_vm7 }
 0x52b   :  { %2940 = vmatpush.msk.msra.mxu2 %vm3861_vm11, %v3600_v45  ;;  %vm4980_vm11 = vmmov %vm4978_vm7 }
 0x52d   :  { %2941 = vmatpush.msk.msra.mxu2 %vm3868_vm14, %v3600_v45  ;;  %vm4981_vm14 = vmmov %vm4978_vm7 }
 0x52e   :  { %2892 = vmatmul.msk.f32.gmra.mxu2 %vm250_vm0, %v4179_v19 }
 0x52f   :  { %2942 = vmatpush.msk.msra.mxu2 %vm3877_vm2, %v3600_v45  ;;  %vm4982_vm2 = vmmov %vm4978_vm7 }
 0x530   :  { %vm4986_vm5 = vmmov %vm4982_vm2 }
 0x531   :  { %2943 = vmatpush.msk.msra.mxu2 %vm3886_vm3, %v3600_v45  ;;  %vm4983_vm3 = vmmov %vm4982_vm2 }
 0x533   :  { %2944 = vmatpush.msk.msra.mxu2 %vm3904_vm6, %v3600_v45  ;;  %vm4984_vm6 = vmmov %vm4982_vm2 }
 0x535   :  { %2945 = vmatpush.msk.msra.mxu2 %vm3911_vm12, %v3600_v45  ;;  %vm4985_vm12 = vmmov %vm4982_vm2 }
 0x536   :  { %2893 = vmatmul.msk.f32.gmra.mxu2 %vm250_vm0, %v4195_v46 }
 0x53e   :  { %2894 = vmatmul.msk.f32.gmra.mxu2 %vm250_vm0, %v4202_v54 }
 0x546   :  { %2922 = vmatmul.msk.f32.vlgmr.msrb.gmra.mxu2 %vm250_vm0, %v4166_v7 }
 0x54e   :  { %2923 = vmatmul.msk.f32.gmra.mxu2 %vm250_vm0, %v4179_v19 }
 0x556   :  { %2924 = vmatmul.msk.f32.gmra.mxu2 %vm250_vm0, %v4195_v46 }
 0x55e   :  { %2925 = vmatmul.msk.f32.gmra.mxu2 %vm250_vm0, %v4202_v54 }
 0x572   :  { %v1387_v22 = vpop.permute.xlu1 %1386 }
 0x573   :  { %v1390_v20 = vmul.f32 %v1387_v22, %v4007_v21  ;;  %v1389_v44 = vmul.f32 %v1387_v22, %v4000_v38 }
 0x578   :  { %v4214_v45 = vpop.f32.mrf.mxu2 }
 0x580   :  { %v4216_v55 = vpop.f32.mrf.mxu2 }
 0x58b   :  { %v4218_v0 = vpop.f32.mrf.mxu2 }
 0x5a1   :  { %v4220_v1 = vpop.f32.mrf.mxu2 }
 0x5a9   :  { %v4222_v29 = vpop.f32.mrf.mxu2 }
 0x5aa   :  { %v1185_v42 = vmul.f32 %v3110_v35, %v4222_v29 }
 0x5ac   :  { %2903 = vmatmul.msk.f32.vlgmr.msrb.gmra.mxu0 %vm4978_vm7, %v1185_v42 }
 0x5b1   :  { %v4226_v37 = vpop.f32.mrf.mxu2 }
 0x5b2   :  { %v1186_v18 = vmul.f32 %v3110_v35, %v4226_v37  ;;  %v3065_v16 = vpack.i.bf16 %v4222_v29, %v4226_v37 }
 0x5b4   :  { %2904 = vmatmul.msk.f32.gmra.mxu0 %vm4979_vm8, %v1186_v18 }
 0x5b9   :  { %v4232_v36 = vpop.f32.mrf.mxu2 }
 0x5ba   :  { %v1187_v14 = vmul.f32 %v3110_v35, %v4232_v36 }
 0x5bc   :  { %2905 = vmatmul.msk.f32.gmra.mxu0 %vm4980_vm11, %v1187_v14 }
 0x5c1   :  { %v4236_v13 = vpop.f32.mrf.mxu2 }
 0x5c2   :  { %2908 = vmatpush.xpose.msk.msra.mxu3 %vm4981_vm14, %v4236_v13  ;;  %1530 = vmatpush.msrb.mxu1 %v4236_v13  ;;  %v1188_v50 = vmul.f32 %v3110_v35, %v4236_v13  ;;  %v3060_v15 = vpack.i.bf16 %v4232_v36, %v4236_v13  ;;  %v1392_v35 = vmul.f32 %v1387_v22, %v4057_v28 }
 0x5c3   :  { %v1391_v28 = vmul.f32 %v1387_v22, %v4012_v59  ;;  %v4324_v59 = vld [vmem:[#allocation3 + $0x50] sm:$0xff]  ;;  %v4326_v22 = vld [vmem:[#allocation3 + $0x40] sm:$0xff] }
 0x5c4   :  { %2906 = vmatmul.msk.f32.gmra.mxu0 %vm4982_vm2, %v1188_v50  ;;  %1531 = vmatpush.msrb.mxu1 %v4232_v36 }
 0x5c6   :  { %2909 = vmatpush.xpose.msk.msra.mxu3 %vm4983_vm3, %v4232_v36  ;;  %1532 = vmatpush.msrb.mxu1 %v4226_v37 }
 0x5c8   :  { %1533 = vmatpush.msrb.mxu1 %v4222_v29 }
 0x5c9   :  { %v1586_v23 = vpop.f32.mrf.mxu2 }
 0x5ca   :  { %2910 = vmatpush.xpose.msk.msra.mxu3 %vm4984_vm6, %v4226_v37 }
 0x5ce   :  { %2911 = vmatpush.xpose.msk.msra.mxu3 %vm4985_vm12, %v4222_v29 }
 0x5d1   :  { %v1589_v40 = vpop.f32.mrf.mxu2  ;;  %2912 = vmatmul.msk.f32.vlgmr.msra.gmra.mxu3 %vm4986_vm5, %v2907_v6 }
 0x5d9   :  { %v1592_v27 = vpop.f32.mrf.mxu2 }
 0x5e1   :  { %v1595_v60 = vpop.f32.mrf.mxu2 }
 0x5e2   :  { %1615 = vmatpush.msra.mxu0 %v1595_v60 }
 0x5e4   :  { %1616 = vmatpush.msra.mxu0 %v1592_v27 }
 0x5e6   :  { %1617 = vmatpush.msra.mxu0 %v1589_v40 }
 0x5e8   :  { %1618 = vmatpush.msra.mxu0 %v1586_v23 }
 0x5e9   :  { %2926 = vmatmul.msk.f32.vlgmr.msra.gmra.mxu0 %vm250_vm0, %v4123_v12 }
 0x5f1   :  { %2927 = vmatmul.msk.f32.gmra.mxu0 %vm250_vm0, %v4129_v30  ;;  %v4281_v30 = vpop.f32.mrf.mxu3 }
 0x5f9   :  { %2928 = vmatmul.msk.f32.gmra.mxu0 %vm250_vm0, %v4138_v48  ;;  %v4283_v48 = vpop.f32.mrf.mxu3 }
 0x601   :  { %2929 = vmatmul.msk.f32.gmra.mxu0 %vm250_vm0, %v4144_v51  ;;  %v4285_v51 = vpop.f32.mrf.mxu3 }
 0x609   :  { %v4287_v17 = vpop.f32.mrf.mxu3 }
 0x629   :  { %v4269_v62 = vpop.f32.mrf.mxu0 }
 0x62a   :  { %1365 = vperm.xlu0 %3058, %v4269_v62  }
 0x631   :  { %v1221_v5 = vpop.f32.mrf.mxu0 }
 0x632   :  { %1369 = vperm.xlu2 %3059, %v1221_v5   ;;  %3075 = vset.pattern.permute.xlu0 %v3603_v24 }
 0x639   :  { %v4273_v63 = vpop.f32.mrf.mxu0 }
 0x63a   :  { %1373 = vperm.xlu1 %3057, %v4273_v63  }
 0x641   :  { %v4276_v12 = vpop.f32.mrf.mxu0 }
 0x642   :  { %1377 = vperm.xlu2 %3059, %v4276_v12   ;;  %3082 = vset.pattern.permute.xlu1 %v3603_v24 }
 0x64a   :  { %3076 = vset.pattern.permute.xlu2 %v3603_v24 }
 0x654   :  { %v4289_v31 = vpop.f32.mrf.mxu3 }
 0x655   :  { %v1380_v26 = vperm.slane %v4289_v31, 1 }
 0x68c   :  { %v1370_v10 = vpop.permute.xlu2 %1369 }
 0x68d   :  { %v1382_v4 = vadd.f32 %v1380_v26, %v1370_v10 }
 0x68f   :  { %v1394_v32 = vadd.f32 %v1390_v20, %v1382_v4 }
 0x691   :  { %vm1398_vm9 = vcmp.gt.f32.partialorder %v1394_v32, 0.0  ;;  %v1402_v3 = vmul.f32 0.2, %v1394_v32 }
 0x693   :  { %v4293_v34 = vsel %vm1398_vm9, %v1394_v32, %v1402_v3 }
 0x694   :  { %v1412_v57 = vsel %vm250_vm0, %v4293_v34, -inf }
 0x695   :  { %1413 = vmax.xlane.f32.xlu2 %v1412_v57 }
 0x69c   :  { %v1366_v49 = vpop.permute.xlu0 %1365  ;;  %v1378_v21 = vpop.permute.xlu2 %1377 }
 0x69d   :  { %v1381_v52 = vadd.f32 %v1380_v26, %v1366_v49  ;;  %v1384_v42 = vadd.f32 %v1380_v26, %v1378_v21  ;;  %1645 = vadd.xlane.f32.xlu2 %v1644_v47 }
 0x69f   :  { %v1393_v18 = vadd.f32 %v1389_v44, %v1381_v52  ;;  %v1396_v14 = vadd.f32 %v1392_v35, %v1384_v42 }
 0x6a1   :  { %vm1397_vm10 = vcmp.gt.f32.partialorder %v1393_v18, 0.0  ;;  %v1401_v50 = vmul.f32 0.2, %v1393_v18  ;;  %v1404_v27 = vmul.f32 0.2, %v1396_v14  ;;  %vm1400_vm13 = vcmp.gt.f32.partialorder %v1396_v14, 0.0 }
 0x6a3   :  { %v1405_v23 = vsel %vm1397_vm10, %v1393_v18, %v1401_v50  ;;  %v4304_v60 = vsel %vm1400_vm13, %v1396_v14, %v1404_v27 }
 0x6a4   :  { %v1409_v40 = vsel %vm250_vm0, %v1405_v23, -inf  ;;  %v1418_v6 = vsel %vm250_vm0, %v4304_v60, -inf }
 0x6a5   :  { %1410 = vmax.xlane.f32.xlu1 %v1409_v40 }
 0x6ac   :  { %v1374_v38 = vpop.permute.xlu1 %1373 }
 0x6ad   :  { %v1383_v20 = vadd.f32 %v1380_v26, %v1374_v38  ;;  %1419 = vmax.xlane.f32.xlu1 %v1418_v6  ;;  %v4332_v26 = vld [vmem:[#allocation3 + $0x58] sm:$0xff] }
 0x6ae   :  { %v1650_v37 = vsel %vm250_vm0, %v4332_v26, 0.0 }
 0x6af   :  { %v1395_v10 = vadd.f32 %v1391_v28, %v1383_v20 }
 0x6b1   :  { %vm1399_vm15 = vcmp.gt.f32.partialorder %v1395_v10, 0.0  ;;  %v1403_v4 = vmul.f32 0.2, %v1395_v10 }
 0x6b3   :  { %v4309_v32 = vsel %vm1399_vm15, %v1395_v10, %v1403_v4 }
 0x6b4   :  { %v1415_v3 = vsel %vm250_vm0, %v4309_v32, -inf }
 0x6b5   :  { %1416 = vmax.xlane.f32.xlu0 %v1415_v3  ;;  %3071 = vrot.lane.b32.xlu2 %v4032_v43, %s3604_s12  ;;  %v1641_v43 = vsel %vm250_vm0, %v4326_v22, 0.0 }
 0x6bd   :  { %1297 = vperm.xlu2 %3076, %v4257_v8   ;;  %v1657_v8 = vadd.f32 %v1644_v47, %v1641_v43 }
 0x6c5   :  { %3078 = vrot.lane.b32.xlu2 %v3812_v41, %s3604_s12  ;;  %v1647_v41 = vsel %vm250_vm0, %v4324_v59, 0.0  ;;  %s3620_s12 = smov [#allocation23]  }
 0x6c6   :  { %3066 = vrot.lane.b32.xlu1 %v3065_v16, %s3602_s4  ;;  %v1658_v29 = vadd.f32 %v1657_v8, %v1647_v41  ;;  %s2813_s8 = sshll.u32 %s3620_s12, 4  ;;  %s2814_s8 = int_to_ptr.vmem [resolvable:$true] %s2813_s8 }
 0x6c8   :  { %v1659_v16 = vadd.f32 %v1658_v29, %v1650_v37 }
 0x6c9   :  { %3061 = vrot.lane.b32.xlu0 %v3060_v15, %s3602_s4 }
 0x6ca   :  { %v1660_v36 = vrot.slane %v1659_v16, 4 }
 0x6cc   :  { %v1661_v13 = vadd.f32 %v1660_v36, %v1659_v16 }
 0x6cd   :  { %1276 = vperm.xlu2 %3076, %v1221_v5  }
 0x6ce   :  { %v1662_v15 = vrot.slane %v1661_v13, 2 }
 0x6d0   :  { %v1663_v5 = vadd.f32 %v1662_v15, %v1661_v13 }
 0x6d2   :  { %v1664_v57 = vrot.slane %v1663_v5, 1 }
 0x6d4   :  { %v1665_v44 = vadd.f32 %v1664_v57, %v1663_v5 }
 0x6d6   :  { %v1666_v47 = vmax.f32 %v1665_v44, 1e-12 }
 0x6d8   :  { %3174 = vrsqrt.f32 %v1666_v47  ;;  %vm1717_vm7 = vweird.f32 %v1666_v47 }
 0x6de   :  { %v3175_v21 = vpop.eup %3174 }
 0x6df   :  { %v1712_v42 = vmul.f32 %v3175_v21, %v1666_v47  ;;  %vm1718_vm8 = vweird.f32 %v3175_v21 }
 0x6e0   :  { %vm1719_vm14 = vmor %vm1717_vm7, %vm1718_vm8 }
 0x6e1   :  { %v1713_v18 = vmul.f32 %v3175_v21, %v1712_v42  ;;  %v3252_v42 = vld [vmem:[#allocation3 + $0x28] sm:$0xff] }
 0x6e3   :  { %v1714_v38 = vmul.f32 0.5, %v1713_v18 }
 0x6e5   :  { %v1715_v10 = vsub.f32 1.5, %v1714_v38 }
 0x6e7   :  { %v1716_v8 = vmul.f32 %v3175_v21, %v1715_v10 }
 0x6f0   :  { %1648 = vadd.xlane.f32.xlu1 %v1647_v41 }
 0x6f3   :  { %1642 = vadd.xlane.f32.xlu0 %v1641_v43 }
 0x6f8   :  { %1651 = vadd.xlane.f32.xlu1 %v1650_v37  ;;  %v4347_v37 = vsel %vm1719_vm14, %v3175_v21, %v1716_v8  ;;  %v4360_v21 = vperm.slane %v4289_v31, 0 }
 0x707   :  { %1271 = vperm.xlu0 %3075, %v4269_v62  }
 0x708   :  { %v1414_v49 = vpop.xlane.xlu2 %1413 }
 0x709   :  { %v1422_v28 = vsub.f32 %v4293_v34, %v1414_v49 }
 0x70b   :  { %v1427_v3 = vmul.f32 1.442695, %v1422_v28 }
 0x710   :  { %v1646_v52 = vpop.xlane.xlu2 %1645 }
 0x711   :  { %v1654_v35 = vmax.f32 %v1646_v52, 1e-12  ;;  %1281 = vperm.xlu1 %3082, %v4273_v63  }
 0x713   :  { %3176 = vrsqrt.f32 %v1654_v35  ;;  %vm1683_vm1 = vweird.f32 %v1654_v35 }
 0x718   :  { %v4338_v14 = vpop.permute.xlu2 %3071  ;;  %v1411_v50 = vpop.xlane.xlu1 %1410 }
 0x719   :  { %v3177_v40 = vpop.eup %3176  ;;  %v1421_v27 = vsub.f32 %v1405_v23, %v1411_v50 }
 0x71a   :  { %v1678_v6 = vmul.f32 %v3177_v40, %v1654_v35  ;;  %vm1684_vm4 = vweird.f32 %v3177_v40 }
 0x71b   :  { %v1425_v62 = vmul.f32 1.442695, %v1421_v27  ;;  %vm1685_vm11 = vmor %vm1683_vm1, %vm1684_vm4 }
 0x71c   :  { %v1679_v20 = vmul.f32 %v3177_v40, %v1678_v6 }
 0x71d   :  { %3178 = vpow2.f32 %v1425_v62 }
 0x71e   :  { %v1680_v4 = vmul.f32 0.5, %v1679_v20  ;;  %3180 = vpow2.f32 %v1427_v3 }
 0x720   :  { %v1681_v63 = vsub.f32 1.5, %v1680_v4  ;;  %v4341_v43 = vpop.permute.xlu2 %1297  ;;  %v1420_v36 = vpop.xlane.xlu1 %1419 }
 0x721   :  { %v1424_v47 = vsub.f32 %v4304_v60, %v1420_v36  ;;  %v1301_v18 = vmul.f32 %v3252_v42, %v4341_v43 }
 0x722   :  { %v1682_v41 = vmul.f32 %v3177_v40, %v1681_v63 }
 0x723   :  { %v4343_v23 = vpop.eup %3178  ;;  %v1431_v35 = vmul.f32 1.442695, %v1424_v47 }
 0x724   :  { %v1433_v34 = vsel %vm250_vm0, %v4343_v23, 0.0  ;;  %v1686_v29 = vsel %vm1685_vm11, %v3177_v40, %v1682_v41  ;;  %v4353_v57 = vpop.eup %3180  ;;  %v3073_v41 = vunpack.i.l.bf16 %v4338_v14  ;;  %vm4991_vm11 = vcmask 523264  }
 0x725   :  { %1434 = vadd.xlane.f32.xlu2 %v1433_v34  ;;  %v1708_v16 = vmul.f32 %v1686_v29, %v4297_v33  ;;  %v1436_v52 = vsel %vm250_vm0, %v4353_v57, 0.0  ;;  %v3074_v34 = vunpack.i.h.bf16 %v4338_v14  ;;  %vm4992_vm14 = vmmov %vm4991_vm11 }
 0x727   :  { %v4351_v5 = vmul.f32 %v4347_v37, %v1708_v16 }
 0x728   :  { %v1417_v13 = vpop.xlane.xlu0 %1416  ;;  %v3079_v15 = vpop.permute.xlu2 %3078 }
 0x729   :  { %v1423_v44 = vsub.f32 %v4309_v32, %v1417_v13  ;;  %v3080_v29 = vunpack.i.l.bf16 %v3079_v15  ;;  %v3081_v16 = vunpack.i.h.bf16 %v3079_v15 }
 0x72b   :  { %v1429_v49 = vmul.f32 1.442695, %v1423_v44 }
 0x72d   :  { %3182 = vpow2.f32 %v1429_v49  ;;  %1437 = vadd.xlane.f32.xlu2 %v1436_v52 }
 0x72e   :  { %3184 = vpow2.f32 %v1431_v35 }
 0x730   :  { %v1277_v50 = vpop.permute.xlu2 %1276 }
 0x731   :  { %v1291_v40 = vadd.f32 %v4360_v21, %v1277_v50 }
 0x733   :  { %v4364_v27 = vpop.eup %3182  ;;  %v1305_v60 = vadd.f32 %v1301_v18, %v1291_v40 }
 0x734   :  { %v1439_v32 = vsel %vm250_vm0, %v4364_v27, 0.0  ;;  %v4372_v28 = vpop.eup %3184 }
 0x735   :  { %1440 = vadd.xlane.f32.xlu2 %v1439_v32  ;;  %vm1309_vm2 = vcmp.gt.f32.partialorder %v1305_v60, 0.0  ;;  %v1313_v38 = vmul.f32 0.2, %v1305_v60  ;;  %v1442_v10 = vsel %vm250_vm0, %v4372_v28, 0.0 }
 0x737   :  { %v4368_v6 = vsel %vm1309_vm2, %v1305_v60, %v1313_v38  ;;  %vm4993_vm2 = vmmov %vm4991_vm11 }
 0x738   :  { %v1323_v31 = vsel %vm250_vm0, %v4368_v6, -inf  ;;  %v3067_v4 = vpop.permute.xlu1 %3066 }
 0x739   :  { %1324 = vmax.xlane.f32.xlu0 %v1323_v31  ;;  %v3068_v63 = vunpack.i.l.bf16 %v3067_v4  ;;  %v3069_v8 = vunpack.i.h.bf16 %v3067_v4 }
 0x73b   :  { %v3062_v62 = vpop.permute.xlu0 %3061 }
 0x73c   :  { %v3063_v20 = vunpack.i.l.bf16 %v3062_v62  ;;  %v3064_v3 = vunpack.i.h.bf16 %v3062_v62 }
 0x73d   :  { %1443 = vadd.xlane.f32.xlu2 %v1442_v10 }
 0x73e   :  { %1489 = vmatpush.msrb.mxu3 %v3063_v20  ;;  %v3253_v20 = vld [vmem:[#allocation3 + $0x20] sm:$0xff] }
 0x73f   :  { %v1300_v10 = vmul.f32 %v3253_v20, %v4341_v43 }
 0x740   :  { %1490 = vmatpush.msrb.mxu3 %v3064_v3 }
 0x742   :  { %1491 = vmatpush.msrb.mxu3 %v3068_v63 }
 0x744   :  { %1492 = vmatpush.msrb.mxu3 %v3069_v8 }
 0x746   :  { %1766 = vmatpush.msra.mxu3 %v3073_v41 }
 0x748   :  { %1767 = vmatpush.msra.mxu3 %v3074_v34 }
 0x74a   :  { %1768 = vmatpush.msra.mxu3 %v3080_v29 }
 0x74c   :  { %1769 = vmatpush.msra.mxu3 %v3081_v16 }
 0x755   :  { %1286 = vperm.xlu2 %3076, %v4276_v12  }
 0x75d   :  { %3084 = vset.pattern.permute.xlu2 %v3601_v25 }
 0x763   :  { %v1649_v36 = vpop.xlane.xlu1 %1648 }
 0x764   :  { %v1655_v13 = vmax.f32 %v1649_v36, 1e-12 }
 0x766   :  { %3186 = vrsqrt.f32 %v1655_v13  ;;  %v1643_v35 = vpop.xlane.xlu0 %1642  ;;  %vm1693_vm3 = vweird.f32 %v1655_v13 }
 0x76b   :  { %v1652_v44 = vpop.xlane.xlu1 %1651 }
 0x76c   :  { %v3187_v47 = vpop.eup %3186  ;;  %v1656_v49 = vmax.f32 %v1652_v44, 1e-12 }
 0x76d   :  { %v1688_v52 = vmul.f32 %v3187_v47, %v1655_v13  ;;  %vm1694_vm6 = vweird.f32 %v3187_v47 }
 0x76e   :  { %3188 = vrsqrt.f32 %v1656_v49  ;;  %vm1695_vm12 = vmor %vm1693_vm3, %vm1694_vm6  ;;  %vm1703_vm5 = vweird.f32 %v1656_v49 }
 0x76f   :  { %v1689_v14 = vmul.f32 %v3187_v47, %v1688_v52  ;;  %vm4994_vm3 = vmmov %vm4993_vm2 }
 0x770   :  { %vm4995_vm6 = vmmov %vm4993_vm2 }
 0x771   :  { %v1690_v42 = vmul.f32 0.5, %v1689_v14 }
 0x773   :  { %v1691_v15 = vsub.f32 1.5, %v1690_v42 }
 0x774   :  { %v3189_v18 = vpop.eup %3188 }
 0x775   :  { %v1692_v50 = vmul.f32 %v3187_v47, %v1691_v15  ;;  %v1698_v12 = vmul.f32 %v3189_v18, %v1656_v49  ;;  %vm1704_vm9 = vweird.f32 %v3189_v18 }
 0x776   :  { %vm1705_vm10 = vmor %vm1703_vm5, %vm1704_vm9 }
 0x777   :  { %v1699_v40 = vmul.f32 %v3189_v18, %v1698_v12  ;;  %v1696_v60 = vsel %vm1695_vm12, %v3187_v47, %v1692_v50  ;;  %v3254_v47 = vld [vmem:[#allocation3 + $0x30] sm:$0xff]  ;;  %v1653_v12 = vmax.f32 %v1643_v35, 1e-12  ;;  %vm4996_vm12 = vmmov %vm4993_vm2 }
 0x778   :  { %v1709_v32 = vmul.f32 %v1696_v60, %v4324_v59  ;;  %v1302_v49 = vmul.f32 %v3254_v47, %v4341_v43  ;;  %vm4997_vm5 = vmmov %vm4993_vm2 }
 0x779   :  { %v1272_v38 = vpop.permute.xlu0 %1271  ;;  %v1700_v31 = vmul.f32 0.5, %v1699_v40  ;;  %vm1673_vm1 = vweird.f32 %v1653_v12  ;;  %vm4998_vm9 = vmmov %vm4993_vm2 }
 0x77a   :  { %v1290_v62 = vadd.f32 %v4360_v21, %v1272_v38  ;;  %v4384_v4 = vmul.f32 %v4347_v37, %v1709_v32 }
 0x77b   :  { %v1701_v3 = vsub.f32 1.5, %v1700_v31 }
 0x77c   :  { %v1304_v63 = vadd.f32 %v1300_v10, %v1290_v62 }
 0x77d   :  { %v1702_v8 = vmul.f32 %v3189_v18, %v1701_v3 }
 0x77e   :  { %vm1308_vm13 = vcmp.gt.f32.partialorder %v1304_v63, 0.0  ;;  %v1312_v41 = vmul.f32 0.2, %v1304_v63 }
 0x77f   :  { %v1706_v34 = vsel %vm1705_vm10, %v3189_v18, %v1702_v8  ;;  %vm4999_vm10 = vmmov %vm4993_vm2 }
 0x780   :  { %v4386_v29 = vsel %vm1308_vm13, %v1304_v63, %v1312_v41  ;;  %v1710_v16 = vmul.f32 %v1706_v34, %v4332_v26 }
 0x781   :  { %v1320_v36 = vsel %vm250_vm0, %v4386_v29, -inf }
 0x782   :  { %1321 = vmax.xlane.f32.xlu2 %v1320_v36  ;;  %v4392_v13 = vmul.f32 %v4347_v37, %v1710_v16 }
 0x783   :  { %v1282_v44 = vpop.permute.xlu1 %1281 }
 0x784   :  { %v1292_v52 = vadd.f32 %v4360_v21, %v1282_v44 }
 0x786   :  { %v1306_v14 = vadd.f32 %v1302_v49, %v1292_v52  ;;  %v3255_v52 = vld [vmem:[#allocation3 + $0x38] sm:$0xff] }
 0x788   :  { %vm1310_vm15 = vcmp.gt.f32.partialorder %v1306_v14, 0.0  ;;  %v1314_v42 = vmul.f32 0.2, %v1306_v14 }
 0x78a   :  { %v4396_v15 = vsel %vm1310_vm15, %v1306_v14, %v1314_v42  ;;  %v1303_v14 = vmul.f32 %v3255_v52, %v4341_v43 }
 0x78b   :  { %v1326_v18 = vsel %vm250_vm0, %v4396_v15, -inf }
 0x78c   :  { %1327 = vmax.xlane.f32.xlu1 %v1326_v18 }
 0x798   :  { %v1435_v50 = vpop.xlane.xlu2 %1434 }
 0x799   :  { %3190 = vrcp.f32 %v1435_v50 }
 0x79a   :  { %3192 = vrsqrt.f32 %v1653_v12 }
 0x79f   :  { %v3191_v40 = vpop.eup %3190 }
 0x7a0   :  { %v1449_v60 = vmul.f32 %v3191_v40, %v4343_v23  ;;  %v1438_v32 = vpop.xlane.xlu2 %1437  ;;  %v3193_v38 = vpop.eup %3192 }
 0x7a1   :  { %3194 = vrcp.f32 %v1438_v32  ;;  %v1668_v31 = vmul.f32 %v3193_v38, %v1653_v12  ;;  %vm1674_vm4 = vweird.f32 %v3193_v38 }
 0x7a2   :  { %2913 = vmatmul.msk.f32.vlgmr.msrb.gmra.mxu3 %vm250_vm0, %v1449_v60  ;;  %vm1675_vm7 = vmor %vm1673_vm1, %vm1674_vm4 }
 0x7a3   :  { %v1669_v3 = vmul.f32 %v3193_v38, %v1668_v31 }
 0x7a5   :  { %v1670_v8 = vmul.f32 0.5, %v1669_v3 }
 0x7a7   :  { %v3195_v62 = vpop.eup %3194  ;;  %v1671_v36 = vsub.f32 1.5, %v1670_v8 }
 0x7a8   :  { %v1441_v20 = vpop.xlane.xlu2 %1440  ;;  %v1450_v10 = vmul.f32 %v3195_v62, %v4353_v57 }
 0x7a9   :  { %3196 = vrcp.f32 %v1441_v20  ;;  %v1672_v57 = vmul.f32 %v3193_v38, %v1671_v36  ;;  %v1790_v36 = vld [vmem:[#allocation12 + $0x50] sm:$0xff] }
 0x7aa   :  { %2914 = vmatmul.msk.f32.gmra.mxu3 %vm250_vm0, %v1450_v10 }
 0x7ab   :  { %v1676_v18 = vsel %vm1675_vm7, %v3193_v38, %v1672_v57 }
 0x7ac   :  { %v1325_v35 = vpop.xlane.xlu0 %1324  ;;  %v1707_v12 = vmul.f32 %v1676_v18, %v4326_v22 }
 0x7ad   :  { %v1333_v63 = vsub.f32 %v4368_v6, %v1325_v35 }
 0x7ae   :  { %v4415_v31 = vmul.f32 %v4347_v37, %v1707_v12 }
 0x7af   :  { %v3197_v41 = vpop.eup %3196  ;;  %v1338_v23 = vmul.f32 1.442695, %v1333_v63  ;;  %v4429_v63 = vld [vmem:[#allocation15 + $0x2] ss:$0 sm:$0xff] }
 0x7b0   :  { %v1444_v34 = vpop.xlane.xlu2 %1443  ;;  %v1451_v16 = vmul.f32 %v3197_v41, %v4364_v27 }
 0x7b1   :  { %3198 = vpow2.f32 %v1338_v23 }
 0x7b2   :  { %3200 = vrcp.f32 %v1444_v34  ;;  %2915 = vmatmul.msk.f32.gmra.mxu3 %vm250_vm0, %v1451_v16  ;;  %v1791_v16 = vld [vmem:[#allocation12 + $0x58] sm:$0xff] }
 0x7b3   :  { %1816 = vmatpush.msra.mxu1 %v1791_v16 }
 0x7b5   :  { %1817 = vmatpush.msra.mxu1 %v1790_v36 }
 0x7b7   :  { %v3199_v44 = vpop.eup %3198 }
 0x7b8   :  { %v3201_v47 = vpop.eup %3200  ;;  %v1287_v49 = vpop.permute.xlu2 %1286  ;;  %v1347_v6 = vsel %vm250_vm0, %v3199_v44, 0.0 }
 0x7b9   :  { %v1293_v42 = vadd.f32 %v4360_v21, %v1287_v49  ;;  %1348 = vadd.xlane.f32.xlu0 %v1347_v6  ;;  %v1452_v27 = vmul.f32 %v3201_v47, %v4372_v28 }
 0x7bb   :  { %v1307_v50 = vadd.f32 %v1303_v14, %v1293_v42  ;;  %2916 = vmatmul.msk.f32.gmra.mxu3 %vm250_vm0, %v1452_v27 }
 0x7bd   :  { %vm1311_vm8 = vcmp.gt.f32.partialorder %v1307_v50, 0.0  ;;  %v1315_v40 = vmul.f32 0.2, %v1307_v50 }
 0x7bf   :  { %v1319_v60 = vsel %vm1311_vm8, %v1307_v50, %v1315_v40  ;;  %v1789_v50 = vld [vmem:[#allocation12 + $0x48] sm:$0xff]  ;;  %v1788_v40 = vld [vmem:[#allocation12 + $0x40] sm:$0xff] }
 0x7c0   :  { %v1329_v32 = vsel %vm250_vm0, %v1319_v60, -inf  ;;  %1818 = vmatpush.msra.mxu1 %v1789_v50 }
 0x7c1   :  { %1330 = vmax.xlane.f32.xlu2 %v1329_v32 }
 0x7c2   :  { %1819 = vmatpush.msra.mxu1 %v1788_v40 }
 0x7c3   :  { %2930 = vmatmul.msk.f32.vlgmr.msra.gmra.mxu3 %vm250_vm0, %v4415_v31 }
 0x7cb   :  { %2931 = vmatmul.msk.f32.gmra.mxu3 %vm250_vm0, %v4351_v5 }
 0x7d3   :  { %2932 = vmatmul.msk.f32.gmra.mxu3 %vm250_vm0, %v4384_v4 }
 0x7db   :  { %2933 = vmatmul.msk.f32.gmra.mxu3 %vm250_vm0, %v4392_v13 }
 0x7f5   :  { %v1322_v43 = vpop.xlane.xlu2 %1321 }
 0x7f6   :  { %v1332_v21 = vsub.f32 %v4386_v29, %v1322_v43 }
 0x7f8   :  { %v1336_v28 = vmul.f32 1.442695, %v1332_v21 }
 0x7fa   :  { %3202 = vpow2.f32 %v1336_v28  ;;  %v3114_v28 = vld [vmem:[#allocation8 + $0x2] ss:$0 sm:$0xff] }
 0x7ff   :  { %v1328_v37 = vpop.xlane.xlu1 %1327 }
 0x800   :  { %v3203_v38 = vpop.eup %3202  ;;  %v1334_v62 = vsub.f32 %v4396_v15, %v1328_v37 }
 0x801   :  { %v1344_v20 = vsel %vm250_vm0, %v3203_v38, 0.0 }
 0x802   :  { %v1340_v10 = vmul.f32 1.442695, %v1334_v62  ;;  %1345 = vadd.xlane.f32.xlu2 %v1344_v20  ;;  %v2220_v62 = vld [vmem:[#allocation9 + $0x50] sm:$0xff] }
 0x804   :  { %3204 = vpow2.f32 %v1340_v10  ;;  %v2219_v10 = vld [vmem:[#allocation9 + $0x48] sm:$0xff] }
 0x80a   :  { %v3205_v3 = vpop.eup %3204 }
 0x80b   :  { %v1350_v35 = vsel %vm250_vm0, %v3205_v3, 0.0 }
 0x80c   :  { %1351 = vadd.xlane.f32.xlu1 %v1350_v35  ;;  %v2218_v35 = vld [vmem:[#allocation9 + $0x40] sm:$0xff] }
 0x825   :  { %1950 = vperm.xlu1 %3082, %v4429_v63   ;;  %v4435_v18 = vpop.f32.mrf.mxu3 }
 0x82c   :  { %v1349_v57 = vpop.xlane.xlu0 %1348 }
 0x82d   :  { %v4438_v12 = vpop.f32.mrf.mxu3 }
 0x834   :  { %v1331_v29 = vpop.xlane.xlu2 %1330 }
 0x835   :  { %v1335_v8 = vsub.f32 %v1319_v60, %v1331_v29  ;;  %v4440_v60 = vpop.f32.mrf.mxu3 }
 0x837   :  { %v1342_v41 = vmul.f32 1.442695, %v1335_v8 }
 0x839   :  { %3206 = vpow2.f32 %v1342_v41 }
 0x83e   :  { %v4442_v32 = vpop.f32.mrf.mxu3 }
 0x83f   :  { %v3207_v23 = vpop.eup %3206 }
 0x840   :  { %v1353_v15 = vsel %vm250_vm0, %v3207_v23, 0.0 }
 0x841   :  { %1354 = vadd.xlane.f32.xlu2 %v1353_v15 }
 0x875   :  { %v1346_v34 = vpop.xlane.xlu2 %1345 }
 0x876   :  { %3208 = vrcp.f32 %v1346_v34 }
 0x877   :  { %3210 = vrcp.f32 %v1349_v57 }
 0x87c   :  { %v3209_v47 = vpop.eup %3208 }
 0x87d   :  { %v1360_v49 = vmul.f32 %v3209_v47, %v3203_v38  ;;  %v3211_v52 = vpop.eup %3210  ;;  %v2221_v38 = vld [vmem:[#allocation9 + $0x58] sm:$0xff] }
 0x87e   :  { %v1361_v14 = vmul.f32 %v3211_v52, %v3199_v44  ;;  %v1771_v44 = vpop.f32.mrf.mxu3 }
 0x87f   :  { %2917 = vmatmul.msk.f32.vlgmr.msrb.gmra.mxu1 %vm250_vm0, %v1360_v49  ;;  %v1352_v6 = vpop.xlane.xlu1 %1351  ;;  %v1772_v20 = vadd.f32 %v3114_v28, %v1771_v44 }
 0x880   :  { %3212 = vrcp.f32 %v1352_v6  ;;  %2234 = vmatpush.msrb.mxu1 %v2221_v38 }
 0x881   :  { %v4445_v29 = vmax.f32 %v1772_v20, 0.0 }
 0x882   :  { %2235 = vmatpush.msrb.mxu1 %v2220_v62 }
 0x883   :  { %4987 = vst [vmem:[#allocation32_spill] sm:$0xff] %v4445_v29 }
 0x884   :  { %2236 = vmatpush.msrb.mxu1 %v2219_v10 }
 0x886   :  { %v3213_v42 = vpop.eup %3212  ;;  %2237 = vmatpush.msrb.mxu1 %v2218_v35  ;;  %v2950_v35 = vld [vmem:[%s4902_s7 + $0x4] sm:$0x3] }
 0x887   :  { %2918 = vmatmul.msk.f32.gmra.mxu1 %vm250_vm0, %v1361_v14  ;;  %v1362_v27 = vmul.f32 %v3213_v42, %v3205_v3  ;;  %v1774_v3 = vpop.f32.mrf.mxu3  ;;  %v3115_v14 = vld [vmem:[#allocation14 + $0x2] ss:$0 sm:$0xff] }
 0x888   :  { %v1775_v8 = vadd.f32 %v3114_v28, %v1774_v3 }
 0x88f   :  { %2919 = vmatmul.msk.f32.gmra.mxu1 %vm250_vm0, %v1362_v27  ;;  %v1777_v41 = vpop.f32.mrf.mxu3 }
 0x890   :  { %v1778_v15 = vadd.f32 %v3114_v28, %v1777_v41 }
 0x892   :  { %v4453_v34 = vmax.f32 %v1778_v15, 0.0 }
 0x894   :  { %4989 = vst [vmem:[#allocation34_spill] sm:$0xff] %v4453_v34 }
 0x897   :  { %v1780_v16 = vpop.f32.mrf.mxu3 }
 0x898   :  { %v1781_v36 = vadd.f32 %v3114_v28, %v1780_v16 }
 0x89a   :  { %v4457_v57 = vmax.f32 %v1781_v36, 0.0 }
 0x89c   :  { %4990 = vst [vmem:[#allocation35_spill] sm:$0xff] %v4457_v57 }
 0x8b4   :  { %v1355_v43 = vpop.xlane.xlu2 %1354 }
 0x8b5   :  { %3214 = vrcp.f32 %v1355_v43 }
 0x8bb   :  { %v3215_v21 = vpop.eup %3214 }
 0x8bc   :  { %v1363_v37 = vmul.f32 %v3215_v21, %v3207_v23  ;;  %v4449_v23 = vmax.f32 %v1775_v8, 0.0 }
 0x8be   :  { %2920 = vmatmul.msk.f32.gmra.mxu1 %vm250_vm0, %v1363_v37  ;;  %4988 = vst [vmem:[#allocation33_spill] sm:$0xff] %v4449_v23 }
 0x8c6   :  { %2934 = vmatmul.msk.f32.vlgmr.msra.gmra.mxu1 %vm250_vm0, %v4445_v29 }
 0x8ce   :  { %2935 = vmatmul.msk.f32.gmra.mxu1 %vm250_vm0, %v4449_v23 }
 0x8d6   :  { %2936 = vmatmul.msk.f32.gmra.mxu1 %vm250_vm0, %v4453_v34 }
 0x8de   :  { %2937 = vmatmul.msk.f32.gmra.mxu1 %vm250_vm0, %v4457_v57 }
 0x8e6   :  { %2965 = vmatmul.msk.f32.vlgmr.msrb.gmra.mxu1 %vm250_vm0, %v4445_v29 }
 0x8ee   :  { %2966 = vmatmul.msk.f32.gmra.mxu1 %vm250_vm0, %v4449_v23 }
 0x8f6   :  { %2967 = vmatmul.msk.f32.gmra.mxu1 %vm250_vm0, %v4453_v34 }
 0x8fc   :  { %v4469_v47 = vpop.f32.mrf.mxu1 }
 0x8fe   :  { %2968 = vmatmul.msk.f32.gmra.mxu1 %vm250_vm0, %v4457_v57 }
 0x904   :  { %v4471_v49 = vpop.f32.mrf.mxu1 }
 0x90c   :  { %v4473_v6 = vpop.f32.mrf.mxu1 }
 0x93b   :  { %v4475_v52 = vpop.f32.mrf.mxu1 }
 0x943   :  { %v4477_v42 = vpop.f32.mrf.mxu1 }
 0x944   :  { %v1838_v27 = vmul.f32 %v3115_v14, %v4477_v42 }
 0x946   :  { %2946 = vmatmul.msk.f32.vlgmr.msra.gmra.mxu2 %vm4991_vm11, %v1838_v27  ;;  %v1951_v27 = vpop.permute.xlu1 %1950 }
 0x94b   :  { %v4481_v50 = vpop.f32.mrf.mxu1 }
 0x94c   :  { %v1839_v40 = vmul.f32 %v3115_v14, %v4481_v50 }
 0x94e   :  { %2947 = vmatmul.msk.f32.gmra.mxu2 %vm4992_vm14, %v1839_v40 }
 0x953   :  { %v4487_v44 = vpop.f32.mrf.mxu1 }
 0x954   :  { %v1840_v21 = vmul.f32 %v3115_v14, %v4487_v44 }
 0x956   :  { %2948 = vmatmul.msk.f32.gmra.mxu2 %vm4993_vm2, %v1840_v21  ;;  %vm2527_vm2 = vcmask 1044480  }
 0x95b   :  { %v4491_v28 = vpop.f32.mrf.mxu1 }
 0x95c   :  { %2951 = vmatpush.xpose.msk.msrb.mxu0 %vm4994_vm3, %v4491_v28  ;;  %2183 = vmatpush.msrb.mxu3 %v4491_v28  ;;  %v1841_v37 = vmul.f32 %v3115_v14, %v4491_v28  ;;  %vm2523_vm3 = vcmask 367616  }
 0x95e   :  { %2949 = vmatmul.msk.f32.gmra.mxu2 %vm4995_vm6, %v1841_v37  ;;  %2184 = vmatpush.msrb.mxu3 %v4487_v44 }
 0x960   :  { %2952 = vmatpush.xpose.msk.msrb.mxu0 %vm4996_vm12, %v4487_v44  ;;  %2185 = vmatpush.msrb.mxu3 %v4481_v50 }
 0x962   :  { %2186 = vmatpush.msrb.mxu3 %v4477_v42 }
 0x963   :  { %v2239_v62 = vpop.f32.mrf.mxu1 }
 0x964   :  { %2953 = vmatpush.xpose.msk.msrb.mxu0 %vm4997_vm5, %v4481_v50 }
 0x968   :  { %2954 = vmatpush.xpose.msk.msrb.mxu0 %vm4998_vm9, %v4477_v42 }
 0x96b   :  { %v2242_v20 = vpop.f32.mrf.mxu1  ;;  %2955 = vmatmul.msk.f32.vlgmr.msrb.gmra.mxu0 %vm4999_vm10, %v2950_v35 }
 0x973   :  { %v2245_v10 = vpop.f32.mrf.mxu1 }
 0x97b   :  { %v2248_v3 = vpop.f32.mrf.mxu1 }
 0x97c   :  { %2268 = vmatpush.msrb.mxu2 %v2248_v3 }
 0x97e   :  { %2269 = vmatpush.msrb.mxu2 %v2245_v10 }
 0x980   :  { %2270 = vmatpush.msrb.mxu2 %v2242_v20 }
 0x982   :  { %2271 = vmatpush.msrb.mxu2 %v2239_v62 }
 0x983   :  { %2969 = vmatmul.msk.f32.vlgmr.msrb.gmra.mxu2 %vm250_vm0, %v4415_v31 }
 0x98b   :  { %2970 = vmatmul.msk.f32.gmra.mxu2 %vm250_vm0, %v4351_v5 }
 0x993   :  { %2971 = vmatmul.msk.f32.gmra.mxu2 %vm250_vm0, %v4384_v4  ;;  %v4526_v4 = vpop.f32.mrf.mxu0 }
 0x99b   :  { %2972 = vmatmul.msk.f32.gmra.mxu2 %vm250_vm0, %v4392_v13  ;;  %v4528_v13 = vpop.f32.mrf.mxu0 }
 0x9a3   :  { %v4530_v15 = vpop.f32.mrf.mxu0 }
 0x9ab   :  { %v4532_v16 = vpop.f32.mrf.mxu0 }
 0x9c9   :  { %v1871_v8 = vpop.f32.mrf.mxu2 }
 0x9ca   :  { %2018 = vperm.xlu2 %3084, %v1871_v8   ;;  %1924 = vperm.xlu0 %3075, %v1871_v8  }
 0x9d1   :  { %v1874_v41 = vpop.f32.mrf.mxu2 }
 0x9d2   :  { %3083 = vset.pattern.permute.xlu0 %v3601_v25  ;;  %2022 = vperm.xlu2 %3084, %v1874_v41  }
 0x9d3   :  { %1929 = vperm.xlu1 %3082, %v1874_v41   ;;  %2039 = vperm.xlu0 %3083, %v4429_v63  }
 0x9d9   :  { %v1877_v31 = vpop.f32.mrf.mxu2 }
 0x9da   :  { %3087 = vset.pattern.permute.xlu2 %v3603_v24 }
 0x9db   :  { %3086 = vset.pattern.permute.xlu1 %v3601_v25  ;;  %3085 = vset.pattern.permute.xlu0 %v3603_v24  ;;  %v1953_v24 = vmul.f32 %v1951_v27, %v4326_v22 }
 0x9dc   :  { %2026 = vperm.xlu1 %3086, %v1877_v31   ;;  %1934 = vperm.xlu0 %3085, %v1877_v31   ;;  %v1954_v31 = vmul.f32 %v1951_v27, %v4297_v33 }
 0x9e1   :  { %v1880_v5 = vpop.f32.mrf.mxu2 }
 0x9e2   :  { %1939 = vperm.xlu2 %3087, %v1880_v5  }
 0x9e4   :  { %2030 = vperm.xlu1 %3086, %v1880_v5  }
 0x9e8   :  { %v1917_v36 = vpop.f32.mrf.mxu0 }
 0x9e9   :  { %v1942_v14 = vperm.slane %v1917_v36, 0  ;;  %v2033_v62 = vperm.slane %v1917_v36, 1 }
 0xa24   :  { %v2019_v63 = vpop.permute.xlu2 %2018 }
 0xa25   :  { %v2034_v8 = vadd.f32 %v2033_v62, %v2019_v63 }
 0xa2c   :  { %v2023_v25 = vpop.permute.xlu2 %2022 }
 0xa2d   :  { %v2035_v38 = vadd.f32 %v2033_v62, %v2023_v25 }
 0xa3c   :  { %v1925_v40 = vpop.permute.xlu0 %1924  ;;  %v1940_v10 = vpop.permute.xlu2 %1939 }
 0xa3d   :  { %v1943_v21 = vadd.f32 %v1942_v14, %v1925_v40  ;;  %v1946_v41 = vadd.f32 %v1942_v14, %v1940_v10 }
 0xa3f   :  { %v1957_v37 = vadd.f32 %v1953_v24, %v1943_v21  ;;  %v1956_v24 = vmul.f32 %v1951_v27, %v4332_v26 }
 0xa41   :  { %vm1961_vm13 = vcmp.gt.f32.partialorder %v1957_v37, 0.0  ;;  %v1965_v20 = vmul.f32 0.2, %v1957_v37  ;;  %v1960_v57 = vadd.f32 %v1956_v24, %v1946_v41 }
 0xa43   :  { %v4535_v3 = vsel %vm1961_vm13, %v1957_v37, %v1965_v20  ;;  %v1968_v41 = vmul.f32 0.2, %v1960_v57  ;;  %vm1964_vm7 = vcmp.gt.f32.partialorder %v1960_v57, 0.0 }
 0xa44   :  { %v1973_v35 = vsel %vm250_vm0, %v4535_v3, -inf }
 0xa45   :  { %v1930_v5 = vpop.permute.xlu1 %1929  ;;  %v2040_v43 = vpop.permute.xlu0 %2039  ;;  %1974 = vmax.xlane.f32.xlu2 %v1973_v35 }
 0xa46   :  { %v1944_v34 = vadd.f32 %v1942_v14, %v1930_v5  ;;  %v2042_v40 = vmul.f32 %v2040_v43, %v4326_v22  ;;  %v2043_v36 = vmul.f32 %v2040_v43, %v4297_v33 }
 0xa48   :  { %v1958_v21 = vadd.f32 %v1954_v31, %v1944_v34  ;;  %v2046_v37 = vadd.f32 %v2042_v40, %v2034_v8  ;;  %v2047_v20 = vadd.f32 %v2043_v36, %v2035_v38  ;;  %v1955_v34 = vmul.f32 %v1951_v27, %v4324_v59 }
 0xa49   :  { %v2044_v31 = vmul.f32 %v2040_v43, %v4324_v59 }
 0xa4a   :  { %vm1962_vm15 = vcmp.gt.f32.partialorder %v1958_v21, 0.0  ;;  %v1966_v63 = vmul.f32 0.2, %v1958_v21  ;;  %vm2050_vm1 = vcmp.gt.f32.partialorder %v2046_v37, 0.0  ;;  %v2054_v10 = vmul.f32 0.2, %v2046_v37 }
 0xa4b   :  { %vm2051_vm4 = vcmp.gt.f32.partialorder %v2047_v20, 0.0  ;;  %v2055_v23 = vmul.f32 0.2, %v2047_v20 }
 0xa4c   :  { %v1970_v29 = vsel %vm1962_vm15, %v1958_v21, %v1966_v63  ;;  %v2058_v35 = vsel %vm2050_vm1, %v2046_v37, %v2054_v10  ;;  %v4548_v37 = vsel %vm1964_vm7, %v1960_v57, %v1968_v41 }
 0xa4d   :  { %v1976_v25 = vsel %vm250_vm0, %v1970_v29, -inf  ;;  %v2062_v22 = vsel %vm250_vm0, %v2058_v35, -inf  ;;  %v2059_v5 = vsel %vm2051_vm4, %v2047_v20, %v2055_v23  ;;  %v1982_v59 = vsel %vm250_vm0, %v4548_v37, -inf }
 0xa4e   :  { %v2027_v33 = vpop.permute.xlu1 %2026  ;;  %1977 = vmax.xlane.f32.xlu1 %v1976_v25  ;;  %v1935_v8 = vpop.permute.xlu0 %1934  ;;  %2063 = vmax.xlane.f32.xlu0 %v2062_v22  ;;  %v2065_v38 = vsel %vm250_vm0, %v2059_v5, -inf  ;;  %v2045_v22 = vmul.f32 %v2040_v43, %v4332_v26 }
 0xa4f   :  { %v2036_v40 = vadd.f32 %v2033_v62, %v2027_v33  ;;  %v1945_v36 = vadd.f32 %v1942_v14, %v1935_v8  ;;  %2066 = vmax.xlane.f32.xlu2 %v2065_v38 }
 0xa51   :  { %v2048_v24 = vadd.f32 %v2044_v31, %v2036_v40  ;;  %v1959_v21 = vadd.f32 %v1955_v34, %v1945_v36 }
 0xa53   :  { %vm2052_vm8 = vcmp.gt.f32.partialorder %v2048_v24, 0.0  ;;  %v2056_v23 = vmul.f32 0.2, %v2048_v24  ;;  %vm1963_vm11 = vcmp.gt.f32.partialorder %v1959_v21, 0.0  ;;  %v1967_v20 = vmul.f32 0.2, %v1959_v21 }
 0xa55   :  { %v2060_v27 = vsel %vm2052_vm8, %v2048_v24, %v2056_v23  ;;  %v1971_v63 = vsel %vm1963_vm11, %v1959_v21, %v1967_v20 }
 0xa56   :  { %v2031_v10 = vpop.permute.xlu1 %2030  ;;  %v2068_v25 = vsel %vm250_vm0, %v2060_v27, -inf  ;;  %v1979_v14 = vsel %vm250_vm0, %v1971_v63, -inf }
 0xa57   :  { %v2037_v33 = vadd.f32 %v2033_v62, %v2031_v10  ;;  %2069 = vmax.xlane.f32.xlu1 %v2068_v25  ;;  %1983 = vmax.xlane.f32.xlu2 %v1982_v59 }
 0xa58   :  { %1980 = vmax.xlane.f32.xlu0 %v1979_v14 }
 0xa59   :  { %v2049_v57 = vadd.f32 %v2045_v22, %v2037_v33 }
 0xa5b   :  { %vm2053_vm14 = vcmp.gt.f32.partialorder %v2049_v57, 0.0  ;;  %v2057_v34 = vmul.f32 0.2, %v2049_v57 }
 0xa5d   :  { %v4555_v8 = vsel %vm2053_vm14, %v2049_v57, %v2057_v34 }
 0xa5e   :  { %v2071_v38 = vsel %vm250_vm0, %v4555_v8, -inf }
 0xa60   :  { %2072 = vmax.xlane.f32.xlu0 %v2071_v38 }
 0xab8   :  { %v1975_v41 = vpop.xlane.xlu2 %1974 }
 0xab9   :  { %v1985_v31 = vsub.f32 %v4535_v3, %v1975_v41 }
 0xabb   :  { %v1989_v40 = vmul.f32 1.442695, %v1985_v31 }
 0xabd   :  { %3216 = vpow2.f32 %v1989_v40 }
 0xac1   :  { %v1978_v36 = vpop.xlane.xlu1 %1977  ;;  %v2064_v26 = vpop.xlane.xlu0 %2063 }
 0xac2   :  { %v1986_v43 = vsub.f32 %v1970_v29, %v1978_v36  ;;  %v2074_v62 = vsub.f32 %v2058_v35, %v2064_v26  ;;  %v2067_v24 = vpop.xlane.xlu2 %2066  ;;  %v5000_v36 = vpack.i.bf16 %v4487_v44, %v4491_v28  ;;  %v3108_v26 = vld [vmem:[#allocation11] ss:$0 sm:$0xff] }
 0xac3   :  { %v4560_v21 = vpop.eup %3216  ;;  %v2075_v10 = vsub.f32 %v2059_v5, %v2067_v24  ;;  %v5001_v24 = vpack.i.bf16 %v4477_v42, %v4481_v50  ;;  %v4597_v44 = vadd.f32 %v3108_v26, %v4283_v48  ;;  %v882_v42 = vadd.f32 %v4214_v45, %v4154_v56 }
 0xac4   :  { %v1991_v23 = vmul.f32 1.442695, %v1986_v43  ;;  %v2078_v20 = vmul.f32 1.442695, %v2074_v62  ;;  %v1997_v25 = vsel %vm250_vm0, %v4560_v21, 0.0  ;;  %v4587_v43 = vadd.f32 %v3108_v26, %v4281_v30 }
 0xac5   :  { %1998 = vadd.xlane.f32.xlu1 %v1997_v25  ;;  %v2080_v59 = vmul.f32 1.442695, %v2075_v10  ;;  %v4944_v30 = vmax.f32 %v4597_v44, 0.0  ;;  %v4604_v10 = vadd.f32 %v3108_v26, %v4285_v51 }
 0xac6   :  { %3218 = vpow2.f32 %v1991_v23  ;;  %v4945_v23 = vmax.f32 %v4587_v43, 0.0 }
 0xac7   :  { %3220 = vpow2.f32 %v2078_v20  ;;  %v2293_v50 = vsel %vm250_vm0, %v4944_v30, 0.0  ;;  %v4943_v25 = vmax.f32 %v4604_v10, 0.0 }
 0xac8   :  { %3222 = vpow2.f32 %v2080_v59  ;;  %v2290_v28 = vsel %vm250_vm0, %v4945_v23, 0.0  ;;  %v893_v59 = vmul.f32 0.5, %v882_v42 }
 0xac9   :  { %v2296_v56 = vsel %vm250_vm0, %v4943_v25, 0.0 }
 0xaca   :  { %v2070_v57 = vpop.xlane.xlu1 %2069  ;;  %v1984_v20 = vpop.xlane.xlu2 %1983 }
 0xacb   :  { %v1981_v3 = vpop.xlane.xlu0 %1980  ;;  %v2076_v38 = vsub.f32 %v2060_v27, %v2070_v57  ;;  %v1988_v48 = vsub.f32 %v4548_v37, %v1984_v20 }
 0xacc   :  { %v4564_v14 = vpop.eup %3218  ;;  %v1987_v22 = vsub.f32 %v1971_v63, %v1981_v3  ;;  %v3117_v3 = vld [vmem:[%s4905_s10] ss:$0 sm:$0xff] }
 0xacd   :  { %v4566_v29 = vpop.eup %3220  ;;  %v2000_v35 = vsel %vm250_vm0, %v4564_v14, 0.0  ;;  %v2082_v63 = vmul.f32 1.442695, %v2076_v38  ;;  %v4621_v45 = vadd.f32 %v3117_v3, %v893_v59  ;;  %v3112_v59 = vld [vmem:[#allocation11 + $0x1] ss:$0 sm:$0xff] }
 0xace   :  { %2001 = vadd.xlane.f32.xlu0 %v2000_v35  ;;  %v2086_v5 = vsel %vm250_vm0, %v4566_v29, 0.0  ;;  %v1993_v33 = vmul.f32 1.442695, %v1987_v22  ;;  %v4572_v34 = vpop.eup %3222  ;;  %v1995_v22 = vmul.f32 1.442695, %v1988_v48  ;;  %v885_v35 = vadd.f32 %v4216_v55, %v4157_v11 }
 0xacf   :  { %2087 = vadd.xlane.f32.xlu2 %v2086_v5  ;;  %v2089_v41 = vsel %vm250_vm0, %v4572_v34, 0.0  ;;  %v888_v5 = vadd.f32 %v4218_v0, %v4160_v9  ;;  %v4941_v57 = vmax.f32 %v4621_v45, 0.0 }
 0xad0   :  { %3224 = vpow2.f32 %v1993_v33  ;;  %v894_v33 = vmul.f32 0.5, %v885_v35 }
 0xad1   :  { %3226 = vpow2.f32 %v2082_v63  ;;  %v2315_v11 = vsel %vm250_vm0, %v4941_v57, 0.0 }
 0xad2   :  { %3228 = vpow2.f32 %v1995_v22  ;;  %v4632_v55 = vadd.f32 %v3117_v3, %v894_v33  ;;  %v1536_v22 = vadd.f32 %v4469_v47, %v4435_v18  ;;  %v1539_v18 = vadd.f32 %v4471_v49, %v4438_v12 }
 0xad3   :  { %v2073_v51 = vpop.xlane.xlu0 %2072  ;;  %v2346_v47 = vsel %vm250_vm0, %v3896_v58, 0.0  ;;  %v2343_v33 = vsel %vm250_vm0, %v3872_v53, 0.0 }
 0xad4   :  { %v2077_v37 = vsub.f32 %v4555_v8, %v2073_v51  ;;  %v891_v8 = vadd.f32 %v4220_v1, %v4163_v2  ;;  %v4648_v2 = vadd.f32 %v3108_v26, %v4287_v17  ;;  %v2340_v17 = vsel %vm250_vm0, %v3846_v39, 0.0 }
 0xad5   :  { %v4662_v26 = vadd.f32 %v3112_v59, %v4528_v13  ;;  %v3118_v13 = vld [vmem:[%s4905_s10 + $0x1] ss:$0 sm:$0xff]  ;;  %v1548_v12 = vmul.f32 0.5, %v1539_v18 }
 0xad6   :  { %2090 = vadd.xlane.f32.xlu0 %v2089_v41  ;;  %v4576_v31 = vpop.eup %3224  ;;  %v2084_v38 = vmul.f32 1.442695, %v2077_v37  ;;  %v895_v41 = vmul.f32 0.5, %v888_v5  ;;  %v4681_v37 = vadd.f32 %v3112_v59, %v4526_v4  ;;  %v1542_v5 = vadd.f32 %v4473_v6, %v4440_v60 }
 0xad7   :  { %v2003_v40 = vsel %vm250_vm0, %v4576_v31, 0.0  ;;  %v4584_v27 = vpop.eup %3226  ;;  %v4932_v35 = vmax.f32 %v4662_v26, 0.0  ;;  %v2349_v60 = vsel %vm250_vm0, %v3900_v61, 0.0  ;;  %v4696_v6 = vadd.f32 %v3118_v13, %v1548_v12 }
 0xad8   :  { %v2092_v62 = vsel %vm250_vm0, %v4584_v27, 0.0  ;;  %v4627_v63 = vpop.eup %3228  ;;  %3230 = vpow2.f32 %v2084_v38  ;;  %v4638_v0 = vadd.f32 %v3117_v3, %v895_v41  ;;  %v4936_v49 = vmax.f32 %v4681_v37, 0.0 }
 0xad9   :  { %v2006_v9 = vsel %vm250_vm0, %v4627_v63, 0.0  ;;  %v2368_v38 = vsel %vm250_vm0, %v4932_v35, 0.0  ;;  %v1549_v4 = vmul.f32 0.5, %v1542_v5 }
 0xade   :  { %2004 = vadd.xlane.f32.xlu0 %v2003_v40  ;;  %3089 = vrot.lane.b32.xlu1 %v5000_v36, %s3602_s4  ;;  %v4940_v40 = vmax.f32 %v4632_v55, 0.0  ;;  %v896_v36 = vmul.f32 0.5, %v891_v8  ;;  %v2365_v8 = vsel %vm250_vm0, %v4936_v49, 0.0  ;;  %v2520_v49 = vld [vmem:[#allocation20 + $0x20] sm:$0xff] }
 0xae0   :  { %v4655_v42 = vadd.f32 %v3117_v3, %v896_v36  ;;  %v1545_v36 = vadd.f32 %v4475_v52, %v4442_v32  ;;  %v4718_v52 = vadd.f32 %v3112_v59, %v4532_v16  ;;  %v2415_v16 = vsel %vm250_vm0, %v4166_v7, 0.0 }
 0xae2   :  { %v4938_v48 = vmax.f32 %v4655_v42, 0.0 }
 0xae4   :  { %v2324_v51 = vsel %vm250_vm0, %v4938_v48, 0.0 }
 0xae6   :  { %2093 = vadd.xlane.f32.xlu0 %v2092_v62  ;;  %v4939_v62 = vmax.f32 %v4638_v0, 0.0 }
 0xae7   :  { %3094 = vrot.lane.b32.xlu2 %v5001_v24, %s3602_s4  ;;  %v4642_v24 = vpop.eup %3230 }
 0xae8   :  { %v2095_v1 = vsel %vm250_vm0, %v4642_v24, 0.0  ;;  %v2321_v20 = vsel %vm250_vm0, %v4939_v62, 0.0 }
 0xaee   :  { %2291 = vadd.xlane.f32.xlu0 %v2290_v28  ;;  %v2318_v28 = vsel %vm250_vm0, %v4940_v40, 0.0 }
 0xaf6   :  { %2294 = vadd.xlane.f32.xlu0 %v2293_v50  ;;  %v4942_v50 = vmax.f32 %v4648_v2, 0.0 }
 0xaf8   :  { %v2299_v3 = vsel %vm250_vm0, %v4942_v50, 0.0 }
 0xafe   :  { %2297 = vadd.xlane.f32.xlu0 %v2296_v56  ;;  %v1547_v56 = vmul.f32 0.5, %v1536_v22 }
 0xb00   :  { %v4690_v41 = vadd.f32 %v3118_v13, %v1547_v56 }
 0xb06   :  { %2316 = vadd.xlane.f32.xlu0 %v2315_v11  ;;  %v4929_v11 = vmax.f32 %v4690_v41, 0.0 }
 0xb08   :  { %2007 = vadd.xlane.f32.xlu1 %v2006_v9  ;;  %v4702_v9 = vadd.f32 %v3112_v59, %v4530_v15 }
 0xb0a   :  { %v4931_v22 = vmax.f32 %v4702_v9, 0.0 }
 0xb0e   :  { %2319 = vadd.xlane.f32.xlu0 %v2318_v28  ;;  %v2390_v28 = vsel %vm250_vm0, %v4929_v11, 0.0 }
 0xb10   :  { %2096 = vadd.xlane.f32.xlu2 %v2095_v1  ;;  %2322 = vadd.xlane.f32.xlu1 %v2321_v20  ;;  %v4709_v1 = vadd.f32 %v3118_v13, %v1549_v4  ;;  %v4928_v20 = vmax.f32 %v4696_v6, 0.0 }
 0xb12   :  { %v4925_v15 = vmax.f32 %v4709_v1, 0.0  ;;  %v2393_v32 = vsel %vm250_vm0, %v4928_v20, 0.0 }
 0xb14   :  { %v2396_v56 = vsel %vm250_vm0, %v4925_v15, 0.0 }
 0xb16   :  { %2341 = vadd.xlane.f32.xlu0 %v2340_v17  ;;  %v2273_v17 = vpop.f32.mrf.mxu2 }
 0xb18   :  { %2300 = vadd.xlane.f32.xlu2 %v2299_v3  ;;  %2325 = vadd.xlane.f32.xlu1 %v2324_v51  ;;  %v1550_v3 = vmul.f32 0.5, %v1545_v36  ;;  %v2371_v51 = vsel %vm250_vm0, %v4931_v22, 0.0  ;;  %v2337_v22 = vld [vmem:[#allocation17 + $0x1] sm:$0x1] }
 0xb1a   :  { %v4726_v18 = vadd.f32 %v3118_v13, %v1550_v3  ;;  %v2418_v3 = vsel %vm250_vm0, %v4179_v19, 0.0 }
 0xb1c   :  { %v4924_v5 = vmax.f32 %v4726_v18, 0.0 }
 0xb1e   :  { %2347 = vadd.xlane.f32.xlu0 %v2346_v47  ;;  %v4930_v47 = vmax.f32 %v4718_v52, 0.0  ;;  %v2399_v13 = vsel %vm250_vm0, %v4924_v5, 0.0 }
 0xb20   :  { %2344 = vadd.xlane.f32.xlu2 %v2343_v33  ;;  %2369 = vadd.xlane.f32.xlu1 %v2368_v38  ;;  %v2276_v33 = vpop.f32.mrf.mxu2  ;;  %v3116_v38 = vld [vmem:[#allocation11 + $0x2] ss:$0 sm:$0xff]  ;;  %v2374_v12 = vsel %vm250_vm0, %v4930_v47, 0.0 }
 0xb21   :  { %v4732_v59 = vadd.f32 %v3116_v38, %v2276_v33 }
 0xb23   :  { %5002 = vst [vmem:[#allocation36_spill] sm:$0xff] %v4732_v59 }
 0xb26   :  { %2350 = vadd.xlane.f32.xlu0 %v2349_v60  ;;  %v4922_v60 = vmax.f32 %v4732_v59, 0.0 }
 0xb28   :  { %2366 = vadd.xlane.f32.xlu2 %v2365_v8  ;;  %2391 = vadd.xlane.f32.xlu1 %v2390_v28  ;;  %v2421_v8 = vsel %vm250_vm0, %v4195_v46, 0.0  ;;  %v4743_v28 = vadd.f32 %v3116_v38, %v2273_v17  ;;  %v2279_v33 = vpop.f32.mrf.mxu2  ;;  %v2424_v17 = vsel %vm250_vm0, %v4202_v54, 0.0 }
 0xb2a   :  { %5003 = vst [vmem:[#allocation37_spill] sm:$0xff] %v4743_v28 }
 0xb2e   :  { %2394 = vadd.xlane.f32.xlu0 %v2393_v32  ;;  %v2443_v32 = vsel %vm250_vm0, %v4922_v60, 0.0 }
 0xb30   :  { %2372 = vadd.xlane.f32.xlu2 %v2371_v51  ;;  %2397 = vadd.xlane.f32.xlu1 %v2396_v56 }
 0xb36   :  { %2416 = vadd.xlane.f32.xlu0 %v2415_v16  ;;  %v4923_v16 = vmax.f32 %v4743_v28, 0.0 }
 0xb38   :  { %2375 = vadd.xlane.f32.xlu2 %v2374_v12  ;;  %v1999_v4 = vpop.xlane.xlu1 %1998  ;;  %2400 = vadd.xlane.f32.xlu1 %v2399_v13  ;;  %v4755_v12 = vadd.f32 %v3116_v38, %v2279_v33  ;;  %v2440_v13 = vsel %vm250_vm0, %v4923_v16, 0.0 }
 0xb39   :  { %3232 = vrcp.f32 %v1999_v4 }
 0xb3a   :  { %5004 = vst [vmem:[#allocation38_spill] sm:$0xff] %v4755_v12 }
 0xb3e   :  { %2422 = vadd.xlane.f32.xlu0 %v2421_v8 }
 0xb3f   :  { %v3233_v36 = vpop.eup %3232 }
 0xb40   :  { %v2013_v51 = vmul.f32 %v3233_v36, %v4560_v21  ;;  %2419 = vadd.xlane.f32.xlu2 %v2418_v3  ;;  %2444 = vadd.xlane.f32.xlu1 %v2443_v32  ;;  %v4927_v3 = vmax.f32 %v4755_v12, 0.0  ;;  %v2282_v32 = vpop.f32.mrf.mxu2 }
 0xb41   :  { %v2002_v56 = vpop.xlane.xlu0 %2001  ;;  %v4765_v33 = vadd.f32 %v3116_v38, %v2282_v32 }
 0xb42   :  { %3234 = vrcp.f32 %v2002_v56  ;;  %2960 = vmatmul.msk.f32.vlgmr.msrb.gmra.mxu3 %vm250_vm0, %v2013_v51  ;;  %v2088_v4 = vpop.xlane.xlu2 %2087  ;;  %v5005_v51 = vld [vmem:[#allocation32_spill] sm:$0xff] }
 0xb43   :  { %v2490_v56 = vsel %vm250_vm0, %v5005_v51, 0.0  ;;  %5006 = vst [vmem:[#allocation39_spill] sm:$0xff] %v4765_v33  ;;  %3236 = vrcp.f32 %v2088_v4 }
 0xb46   :  { %2425 = vadd.xlane.f32.xlu0 %v2424_v17  ;;  %v2446_v17 = vsel %vm250_vm0, %v4927_v3, 0.0 }
 0xb48   :  { %v3235_v21 = vpop.eup %3234  ;;  %2441 = vadd.xlane.f32.xlu2 %v2440_v13 }
 0xb49   :  { %v2091_v8 = vpop.xlane.xlu0 %2090  ;;  %v2014_v36 = vmul.f32 %v3235_v21, %v4564_v14  ;;  %v3237_v5 = vpop.eup %3236 }
 0xb4a   :  { %v3095_v21 = vpop.permute.xlu2 %3094 }
 0xb4b   :  { %2961 = vmatmul.msk.f32.gmra.mxu3 %vm250_vm0, %v2014_v36  ;;  %v4926_v36 = vmax.f32 %v4765_v33, 0.0  ;;  %v3096_v15 = vunpack.i.l.bf16 %v3095_v21  ;;  %v3097_v38 = vunpack.i.h.bf16 %v3095_v21 }
 0xb4d   :  { %v2449_v4 = vsel %vm250_vm0, %v4926_v36, 0.0 }
 0xb4e   :  { %2491 = vadd.xlane.f32.xlu0 %v2490_v56  ;;  %v2102_v56 = vmul.f32 %v3237_v5, %v4566_v29  ;;  %v5008_v5 = vld [vmem:[#allocation35_spill] sm:$0xff] }
 0xb4f   :  { %v2499_v21 = vsel %vm250_vm0, %v5008_v5, 0.0 }
 0xb50   :  { %2447 = vadd.xlane.f32.xlu2 %v2446_v17  ;;  %v3090_v13 = vpop.permute.xlu1 %3089 }
 0xb51   :  { %v3091_v60 = vunpack.i.l.bf16 %v3090_v13  ;;  %v2005_v14 = vpop.xlane.xlu0 %2004  ;;  %v3092_v16 = vunpack.i.h.bf16 %v3090_v13 }
 0xb52   :  { %3238 = vrcp.f32 %v2005_v14 }
 0xb53   :  { %2142 = vmatpush.msra.mxu0 %v3091_v60  ;;  %3240 = vrcp.f32 %v2091_v8 }
 0xb55   :  { %2143 = vmatpush.msra.mxu0 %v3092_v16  ;;  %v5007_v16 = vld [vmem:[#allocation33_spill] sm:$0xff] }
 0xb57   :  { %2144 = vmatpush.msra.mxu0 %v3096_v15  ;;  %v2493_v15 = vsel %vm250_vm0, %v5007_v16, 0.0 }
 0xb58   :  { %v3239_v32 = vpop.eup %3238  ;;  %2450 = vadd.xlane.f32.xlu2 %v2449_v4 }
 0xb59   :  { %v2094_v17 = vpop.xlane.xlu0 %2093  ;;  %2145 = vmatpush.msra.mxu0 %v3097_v38  ;;  %v2015_v14 = vmul.f32 %v3239_v32, %v4576_v31  ;;  %v3241_v60 = vpop.eup %3240 }
 0xb5a   :  { %2956 = vmatmul.msk.f32.vlgmr.msra.gmra.mxu0 %vm250_vm0, %v2102_v56  ;;  %3242 = vrcp.f32 %v2094_v17  ;;  %v2103_v8 = vmul.f32 %v3241_v60, %v4572_v34 }
 0xb5b   :  { %2962 = vmatmul.msk.f32.gmra.mxu3 %vm250_vm0, %v2015_v14 }
 0xb60   :  { %2494 = vadd.xlane.f32.xlu2 %v2493_v15  ;;  %v3243_v29 = vpop.eup %3242 }
 0xb61   :  { %v2292_v13 = vpop.xlane.xlu0 %2291  ;;  %v2104_v31 = vmul.f32 %v3243_v29, %v4584_v27 }
 0xb62   :  { %2957 = vmatmul.msk.f32.gmra.mxu0 %vm250_vm0, %v2103_v8 }
 0xb68   :  { %2500 = vadd.xlane.f32.xlu2 %v2499_v21 }
 0xb69   :  { %v2295_v38 = vpop.xlane.xlu0 %2294 }
 0xb6a   :  { %v2302_v4 = vadd.f32 %v2295_v38, %v2292_v13  ;;  %2958 = vmatmul.msk.f32.gmra.mxu0 %vm250_vm0, %v2104_v31 }
 0xb71   :  { %v2298_v32 = vpop.xlane.xlu0 %2297 }
 0xb72   :  { %v2303_v56 = vadd.f32 %v2302_v4, %v2298_v32 }
 0xb79   :  { %v2317_v17 = vpop.xlane.xlu0 %2316 }
 0xb7b   :  { %v2008_v14 = vpop.xlane.xlu1 %2007 }
 0xb7c   :  { %3244 = vrcp.f32 %v2008_v14 }
 0xb81   :  { %v2320_v34 = vpop.xlane.xlu0 %2319 }
 0xb82   :  { %v3245_v60 = vpop.eup %3244  ;;  %v2327_v15 = vadd.f32 %v2320_v34, %v2317_v17 }
 0xb83   :  { %v2097_v8 = vpop.xlane.xlu2 %2096  ;;  %v2323_v36 = vpop.xlane.xlu1 %2322  ;;  %v2016_v3 = vmul.f32 %v3245_v60, %v4627_v63 }
 0xb84   :  { %3246 = vrcp.f32 %v2097_v8  ;;  %v2328_v29 = vadd.f32 %v2327_v15, %v2323_v36  ;;  %v2312_v15 = vld [vmem:[#allocation17] sm:$0x1] }
 0xb85   :  { %2963 = vmatmul.msk.f32.gmra.mxu3 %vm250_vm0, %v2016_v3 }
 0xb8a   :  { %v3247_v27 = vpop.eup %3246 }
 0xb8b   :  { %v2301_v13 = vpop.xlane.xlu2 %2300  ;;  %v2326_v21 = vpop.xlane.xlu1 %2325  ;;  %v2105_v31 = vmul.f32 %v3247_v27, %v4642_v24 }
 0xb8c   :  { %v2304_v38 = vadd.f32 %v2303_v56, %v2301_v13  ;;  %v2329_v4 = vadd.f32 %v2328_v29, %v2326_v21  ;;  %v2289_v56 = vld [vmem:[#allocation18] sm:$0x1] }
 0xb8d   :  { %2959 = vmatmul.msk.f32.gmra.mxu0 %vm250_vm0, %v2105_v31 }
 0xb8e   :  { %v2305_v32 = vrot.slane %v2304_v38, 4  ;;  %v2330_v14 = vrot.slane %v2329_v4, 4 }
 0xb90   :  { %v2306_v17 = vadd.f32 %v2305_v32, %v2304_v38  ;;  %v2331_v34 = vadd.f32 %v2330_v14, %v2329_v4 }
 0xb92   :  { %v2307_v20 = vrot.slane %v2306_v17, 2  ;;  %v2332_v11 = vrot.slane %v2331_v34, 2 }
 0xb94   :  { %v2308_v63 = vadd.f32 %v2307_v20, %v2306_v17  ;;  %v2333_v60 = vadd.f32 %v2332_v11, %v2331_v34  ;;  %v3119_v11 = vld [vmem:[%s4905_s10 + $0x2] ss:$0 sm:$0xff]  ;;  %s3605_s10 = smov 125  }
 0xb96   :  { %v2309_v8 = vrot.slane %v2308_v63, 1  ;;  %v2334_v3 = vrot.slane %v2333_v60, 1 }
 0xb98   :  { %v2310_v47 = vadd.f32 %v2309_v8, %v2308_v63  ;;  %v2335_v36 = vadd.f32 %v2334_v3, %v2333_v60 }
 0xb9a   :  { %v2311_v35 = vmul.f32 0.0009765625, %v2310_v47  ;;  %v2336_v24 = vmul.f32 0.0009765625, %v2335_v36 }
 0xb9c   :  { %v2313_v27 = vmul.f32 %v2312_v15, %v2311_v35  ;;  %v2338_v29 = vmul.f32 %v2337_v22, %v2336_v24 }
 0xb9e   :  { %v2314_v13 = vadd.f32 %v2313_v27, %v2289_v56 }
 0xba0   :  { %v4790_v21 = vadd.f32 %v2338_v29, %v2314_v13  ;;  %v5012_v13 = vld [vmem:[#allocation34_spill] sm:$0xff] }
 0xbc5   :  { %v2188_v31 = vpop.f32.mrf.mxu3 }
 0xbce   :  { %v2191_v47 = vpop.f32.mrf.mxu3 }
 0xbd7   :  { %v2147_v38 = vpop.f32.mrf.mxu0 }
 0xbd8   :  { %v2189_v4 = vadd.f32 %v2188_v31, %v2147_v38  ;;  %v2496_v31 = vsel %vm250_vm0, %v5012_v13, 0.0 }
 0xbda   :  { %v2200_v20 = vmul.f32 0.5, %v2189_v4 }
 0xbdc   :  { %v4795_v32 = vadd.f32 %v3119_v11, %v2200_v20 }
 0xbde   :  { %5009 = vst [vmem:[#allocation40_spill] sm:$0xff] %v4795_v32  ;;  %v4935_v14 = vmax.f32 %v4795_v32, 0.0  ;;  %v2194_v8 = vpop.f32.mrf.mxu3 }
 0xbdf   :  { %v2150_v17 = vpop.f32.mrf.mxu0 }
 0xbe0   :  { %v2192_v34 = vadd.f32 %v2191_v47, %v2150_v17  ;;  %v2465_v35 = vsel %vm250_vm0, %v4935_v14, 0.0  ;;  %v2521_v14 = vld [vmem:[#allocation20 + $0x28] sm:$0x1f] }
 0xbe1   :  { %2466 = vadd.xlane.f32.xlu1 %v2465_v35  ;;  %2973 = vmatpush.msk.msrb.mxu0 %vm2527_vm2, %v2521_v14 }
 0xbe2   :  { %v2201_v22 = vmul.f32 0.5, %v2192_v34 }
 0xbe3   :  { %2542 = vmatpush.msrb.mxu0 %v2520_v49 }
 0xbe4   :  { %v4801_v63 = vadd.f32 %v3119_v11, %v2201_v22  ;;  %v2342_v22 = vpop.xlane.xlu0 %2341 }
 0xbe6   :  { %5010 = vst [vmem:[#allocation41_spill] sm:$0xff] %v4801_v63  ;;  %v4934_v60 = vmax.f32 %v4801_v63, 0.0 }
 0xbe7   :  { %v2153_v3 = vpop.f32.mrf.mxu0 }
 0xbe8   :  { %v2195_v36 = vadd.f32 %v2194_v8, %v2153_v3  ;;  %v2468_v15 = vsel %vm250_vm0, %v4934_v60, 0.0  ;;  %v2345_v8 = vpop.xlane.xlu2 %2344 }
 0xbe9   :  { %2469 = vadd.xlane.f32.xlu0 %v2468_v15  ;;  %v2352_v62 = vadd.f32 %v2345_v8, %v2342_v22 }
 0xbea   :  { %v2202_v24 = vmul.f32 0.5, %v2195_v36 }
 0xbec   :  { %v4807_v56 = vadd.f32 %v3119_v11, %v2202_v24  ;;  %v2348_v3 = vpop.xlane.xlu0 %2347 }
 0xbed   :  { %v2353_v50 = vadd.f32 %v2352_v62, %v2348_v3 }
 0xbee   :  { %5011 = vst [vmem:[#allocation42_spill] sm:$0xff] %v4807_v56  ;;  %v4933_v27 = vmax.f32 %v4807_v56, 0.0 }
 0xbf0   :  { %v2471_v29 = vsel %vm250_vm0, %v4933_v27, 0.0  ;;  %v2367_v36 = vpop.xlane.xlu2 %2366 }
 0xbf1   :  { %2472 = vadd.xlane.f32.xlu1 %v2471_v29  ;;  %2497 = vadd.xlane.f32.xlu0 %v2496_v31 }
 0xbf4   :  { %v2351_v15 = vpop.xlane.xlu0 %2350 }
 0xbf5   :  { %v2354_v23 = vadd.f32 %v2353_v50, %v2351_v15 }
 0xbf8   :  { %v2373_v24 = vpop.xlane.xlu2 %2372 }
 0xbfc   :  { %v2395_v29 = vpop.xlane.xlu0 %2394 }
 0xc00   :  { %v2376_v31 = vpop.xlane.xlu2 %2375 }
 0xc04   :  { %v2417_v27 = vpop.xlane.xlu0 %2416 }
 0xc08   :  { %v2197_v38 = vpop.f32.mrf.mxu3 }
 0xc0a   :  { %v2156_v4 = vpop.f32.mrf.mxu0 }
 0xc0b   :  { %v2198_v20 = vadd.f32 %v2197_v38, %v2156_v4  ;;  %v2370_v38 = vpop.xlane.xlu1 %2369  ;;  %v2420_v4 = vpop.xlane.xlu2 %2419 }
 0xc0c   :  { %v2377_v25 = vadd.f32 %v2370_v38, %v2367_v36  ;;  %v2427_v51 = vadd.f32 %v2420_v4, %v2417_v27  ;;  %v2519_v38 = vld [vmem:[#allocation20 + $0x18] sm:$0xff] }
 0xc0d   :  { %v2203_v47 = vmul.f32 0.5, %v2198_v20  ;;  %2543 = vmatpush.msrb.mxu0 %v2519_v38 }
 0xc0e   :  { %v2378_v13 = vadd.f32 %v2377_v25, %v2373_v24 }
 0xc0f   :  { %v4815_v17 = vadd.f32 %v3119_v11, %v2203_v47  ;;  %v2423_v11 = vpop.xlane.xlu0 %2422 }
 0xc10   :  { %v2379_v16 = vadd.f32 %v2378_v13, %v2376_v31  ;;  %v2428_v33 = vadd.f32 %v2427_v51, %v2423_v11 }
 0xc11   :  { %5013 = vst [vmem:[#allocation43_spill] sm:$0xff] %v4815_v17  ;;  %v4937_v34 = vmax.f32 %v4815_v17, 0.0  ;;  %v2355_v17 = vrot.slane %v2354_v23, 4 }
 0xc12   :  { %v2380_v14 = vrot.slane %v2379_v16, 4 }
 0xc13   :  { %v2474_v35 = vsel %vm250_vm0, %v4937_v34, 0.0  ;;  %v2392_v20 = vpop.xlane.xlu1 %2391  ;;  %v2442_v47 = vpop.xlane.xlu2 %2441  ;;  %v2356_v59 = vadd.f32 %v2355_v17, %v2354_v23  ;;  %v2518_v23 = vld [vmem:[#allocation20 + $0x10] sm:$0xff] }
 0xc14   :  { %2475 = vadd.xlane.f32.xlu1 %v2474_v35  ;;  %v2402_v5 = vadd.f32 %v2395_v29, %v2392_v20  ;;  %v2381_v62 = vadd.f32 %v2380_v14, %v2379_v16  ;;  %2544 = vmatpush.msrb.mxu0 %v2518_v23 }
 0xc15   :  { %v2357_v15 = vrot.slane %v2356_v59, 2 }
 0xc16   :  { %v2382_v24 = vrot.slane %v2381_v62, 2 }
 0xc17   :  { %v2426_v60 = vpop.xlane.xlu0 %2425 }
 0xc18   :  { %v2429_v22 = vadd.f32 %v2428_v33, %v2426_v60  ;;  %v2383_v33 = vadd.f32 %v2382_v24, %v2381_v62 }
 0xc1a   :  { %v2430_v25 = vrot.slane %v2429_v22, 4  ;;  %v2384_v17 = vrot.slane %v2383_v33, 1 }
 0xc1b   :  { %v2398_v35 = vpop.xlane.xlu1 %2397  ;;  %v2448_v34 = vpop.xlane.xlu2 %2447 }
 0xc1c   :  { %v2403_v56 = vadd.f32 %v2402_v5, %v2398_v35  ;;  %v2431_v51 = vadd.f32 %v2430_v25, %v2429_v22 }
 0xc1f   :  { %v2492_v48 = vpop.xlane.xlu0 %2491 }
 0xc23   :  { %v2401_v40 = vpop.xlane.xlu1 %2400  ;;  %v2451_v57 = vpop.xlane.xlu2 %2450 }
 0xc24   :  { %v2404_v49 = vadd.f32 %v2403_v56, %v2401_v40  ;;  %v2358_v40 = vadd.f32 %v2357_v15, %v2356_v59 }
 0xc26   :  { %v2405_v3 = vrot.slane %v2404_v49, 4 }
 0xc28   :  { %v2406_v5 = vadd.f32 %v2405_v3, %v2404_v49 }
 0xc2a   :  { %v2407_v16 = vrot.slane %v2406_v5, 2 }
 0xc2b   :  { %v2445_v63 = vpop.xlane.xlu1 %2444  ;;  %v2495_v32 = vpop.xlane.xlu2 %2494 }
 0xc2c   :  { %v2452_v12 = vadd.f32 %v2445_v63, %v2442_v47  ;;  %v2502_v50 = vadd.f32 %v2495_v32, %v2492_v48  ;;  %v2359_v48 = vrot.slane %v2358_v40, 1  ;;  %v2432_v32 = vrot.slane %v2431_v51, 2 }
 0xc2d   :  { %v2385_v47 = vadd.f32 %v2384_v17, %v2383_v33  ;;  %v2462_v17 = vld [vmem:[#allocation17 + $0x6] sm:$0x1] }
 0xc2e   :  { %v2453_v8 = vadd.f32 %v2452_v12, %v2448_v34  ;;  %v2517_v12 = vld [vmem:[#allocation20 + $0x8] sm:$0xff]  ;;  %v2408_v34 = vadd.f32 %v2407_v16, %v2406_v5  ;;  %v2360_v59 = vadd.f32 %v2359_v48, %v2358_v40  ;;  %v2433_v11 = vadd.f32 %v2432_v32, %v2431_v51  ;;  %v2387_v5 = vld [vmem:[#allocation17 + $0x3] sm:$0x1] }
 0xc2f   :  { %2545 = vmatpush.msrb.mxu0 %v2517_v12  ;;  %v2386_v15 = vmul.f32 0.0009765625, %v2385_v47 }
 0xc30   :  { %v2454_v36 = vadd.f32 %v2453_v8, %v2451_v57  ;;  %v2516_v57 = vld [vmem:[#allocation20] sm:$0xff]  ;;  %v2409_v35 = vrot.slane %v2408_v34, 1  ;;  %v2361_v22 = vmul.f32 0.0009765625, %v2360_v59  ;;  %v2434_v8 = vrot.slane %v2433_v11, 1 }
 0xc31   :  { %2546 = vmatpush.msrb.mxu0 %v2516_v57  ;;  %v2388_v51 = vmul.f32 %v2387_v5, %v2386_v15  ;;  %v2437_v57 = vld [vmem:[#allocation17 + $0x5] sm:$0x1] }
 0xc32   :  { %v2455_v29 = vrot.slane %v2454_v36, 4  ;;  %v2410_v25 = vadd.f32 %v2409_v35, %v2408_v34  ;;  %v2487_v35 = vld [vmem:[#allocation17 + $0x7] sm:$0x1] }
 0xc33   :  { %v2501_v31 = vpop.xlane.xlu2 %2500 }
 0xc34   :  { %v2456_v60 = vadd.f32 %v2455_v29, %v2454_v36  ;;  %v2362_v36 = vld [vmem:[#allocation17 + $0x2] sm:$0x1] }
 0xc35   :  { %v2363_v29 = vmul.f32 %v2362_v36, %v2361_v22 }
 0xc36   :  { %v2457_v4 = vrot.slane %v2456_v60, 2 }
 0xc38   :  { %v2458_v14 = vadd.f32 %v2457_v4, %v2456_v60 }
 0xc54   :  { %v2467_v27 = vpop.xlane.xlu1 %2466 }
 0xc5c   :  { %v2470_v30 = vpop.xlane.xlu0 %2469 }
 0xc5d   :  { %v2477_v49 = vadd.f32 %v2470_v30, %v2467_v27  ;;  %v2412_v30 = vld [vmem:[#allocation17 + $0x4] sm:$0x1]  ;;  %v2364_v27 = vadd.f32 %v2363_v29, %v4790_v21  ;;  %v2512_v21 = vld [vmem:[#allocation17 + $0x8] sm:$0x1] }
 0xc5f   :  { %v2389_v48 = vadd.f32 %v2388_v51, %v2364_v27 }
 0xc64   :  { %v2498_v28 = vpop.xlane.xlu0 %2497  ;;  %v2473_v56 = vpop.xlane.xlu1 %2472 }
 0xc65   :  { %v2503_v13 = vadd.f32 %v2502_v50, %v2498_v28  ;;  %v2478_v62 = vadd.f32 %v2477_v49, %v2473_v56 }
 0xc67   :  { %v2504_v63 = vadd.f32 %v2503_v13, %v2501_v31  ;;  %v2459_v13 = vrot.slane %v2458_v14, 1  ;;  %v2435_v31 = vadd.f32 %v2434_v8, %v2433_v11 }
 0xc69   :  { %v2505_v28 = vrot.slane %v2504_v63, 4  ;;  %v2460_v23 = vadd.f32 %v2459_v13, %v2458_v14  ;;  %v2436_v33 = vmul.f32 0.0009765625, %v2435_v31 }
 0xc6b   :  { %v2506_v20 = vadd.f32 %v2505_v28, %v2504_v63  ;;  %v2411_v63 = vmul.f32 0.0009765625, %v2410_v25  ;;  %v2461_v28 = vmul.f32 0.0009765625, %v2460_v23  ;;  %v2438_v34 = vmul.f32 %v2437_v57, %v2436_v33  ;;  %v2522_v25 = vld [vmem:[#allocation21] sm:$0x1]  ;;  %v3121_v57 = vld [vmem:[#allocation2] ss:$0 sm:$0xff] }
 0xc6d   :  { %v2507_v3 = vrot.slane %v2506_v20, 2  ;;  %v2413_v32 = vmul.f32 %v2412_v30, %v2411_v63 }
 0xc6f   :  { %v2508_v38 = vadd.f32 %v2507_v3, %v2506_v20  ;;  %v2414_v11 = vadd.f32 %v2413_v32, %v2389_v48  ;;  %v2463_v20 = vmul.f32 %v2462_v17, %v2461_v28  ;;  %v3613_v48 = vmov 2  }
 0xc70   :  { %v3614_v32 = vmov 3   ;;  %v3615_v28 = vmov 4   ;;  %v3617_v17 = vmov 8  }
 0xc71   :  { %v2509_v16 = vrot.slane %v2508_v38, 1  ;;  %v2439_v14 = vadd.f32 %v2438_v34, %v2414_v11  ;;  %v3618_v34 = vmov 6  }
 0xc73   :  { %v2510_v4 = vadd.f32 %v2509_v16, %v2508_v38  ;;  %v2464_v8 = vadd.f32 %v2463_v20, %v2439_v14 }
 0xc75   :  { %v2511_v49 = vmul.f32 0.0009765625, %v2510_v4  ;;  %v3619_v4 = vmov 7  }
 0xc77   :  { %v2513_v3 = vmul.f32 %v2512_v21, %v2511_v49 }
 0xc87   :  { %v2476_v50 = vpop.xlane.xlu1 %2475 }
 0xc88   :  { %v2479_v24 = vadd.f32 %v2478_v62, %v2476_v50 }
 0xc8a   :  { %v2480_v40 = vrot.slane %v2479_v24, 4 }
 0xc8c   :  { %v2481_v12 = vadd.f32 %v2480_v40, %v2479_v24 }
 0xc8e   :  { %v2482_v60 = vrot.slane %v2481_v12, 2 }
 0xc90   :  { %v2483_v56 = vadd.f32 %v2482_v60, %v2481_v12  ;;  %v3120_v60 = vld [vmem:[%s4910_s15] ss:$0 sm:$0xff] }
 0xc92   :  { %v2484_v59 = vrot.slane %v2483_v56, 1 }
 0xc94   :  { %v2485_v47 = vadd.f32 %v2484_v59, %v2483_v56  ;;  %v3616_v56 = vmov 5  }
 0xc96   :  { %v2486_v22 = vmul.f32 0.0009765625, %v2485_v47 }
 0xc98   :  { %v2488_v62 = vmul.f32 %v2487_v35, %v2486_v22 }
 0xc9a   :  { %v2489_v36 = vadd.f32 %v2488_v62, %v2464_v8  ;;  %v5014_v8 = vmax.f32 %v4587_v43, 0.0 }
 0xc9c   :  { %v2514_v50 = vadd.f32 %v2513_v3, %v2489_v36  ;;  %v5015_v3 = vmax.f32 %v4597_v44, 0.0 }
 0xc9e   :  { %v2515_v15 = vmax.f32 %v2514_v50, 0.0  ;;  %v5016_v50 = vmax.f32 %v4604_v10, 0.0  ;;  %v5018_v10 = vmax.f32 %v4621_v45, 0.0 }
 0xca0   :  { %2974 = vmatmul.msk.f32.vlgmr.msrb.gmra.mxu0 %vm2523_vm3, %v2515_v15 }
 0xd1d   :  { %v2548_v13 = vpop.f32.mrf.mxu0 }
 0xd1e   :  { %v2549_v24 = vadd.f32 %v2548_v13, %v2522_v25  ;;  %v5017_v25 = vmax.f32 %v4648_v2, 0.0  ;;  %v5019_v2 = vmax.f32 %v4632_v55, 0.0 }
 0xd20   :  { %v2975_v5 = vmul.f32 -1.442695, %v2549_v24 }
 0xd22   :  { %3248 = vpow2.f32 %v2975_v5 }
 0xd28   :  { %v3249_v29 = vpop.eup %3248 }
 0xd29   :  { %v2554_v31 = vadd.f32 1.0, %v3249_v29 }
 0xd2b   :  { %3250 = vrcp.f32 %v2554_v31  ;;  %v2566_v63 = vand.u32 2147483648, %v2554_v31  ;;  %v2564_v12 = vand.u32 2147483647, %v2554_v31  ;;  %vm2560_vm12 = vweird.f32 %v2554_v31 }
 0xd2d   :  { %v2567_v27 = vor.u32 1.1754944e-38, %v2566_v63  ;;  %vm2565_vm9 = vcmp.eq.f32.partialorder %v2564_v12, 8.507059e+37 }
 0xd31   :  { %v3251_v38 = vpop.eup %3250 }
 0xd32   :  { %v2556_v40 = vmul.f32 %v3251_v38, %v2554_v31  ;;  %vm2561_vm6 = vweird.f32 %v3251_v38 }
 0xd33   :  { %vm2562_vm5 = vmor %vm2560_vm12, %vm2561_vm6 }
 0xd34   :  { %v2557_v51 = vsub.f32 1.0, %v2556_v40 }
 0xd36   :  { %v2558_v23 = vmul.f32 %v3251_v38, %v2557_v51 }
 0xd38   :  { %v2559_v30 = vadd.f32 %v3251_v38, %v2558_v23 }
 0xd3a   :  { %v2563_v33 = vsel %vm2562_vm5, %v3251_v38, %v2559_v30 }
 0xd3b   :  { %v2568_v16 = vsel %vm2565_vm9, %v2567_v27, %v2563_v33 }
 0xd3c   :  { %2655 = vrot.lane.b32.xlu2 %v2568_v16, %s3605_s10  ;;  %2630 = vrot.lane.b32.xlu0 %v2568_v16, %s3606_s18  ;;  %2976 = vpush %v2568_v16 }
 0xd3d   :  { %2605 = vrot.lane.b32.xlu1 %v2568_v16, %s3607_s9 }
 0xd44   :  { %2730 = vrot.lane.b32.xlu2 %v2568_v16, %s3608_s16  ;;  %2680 = vrot.lane.b32.xlu0 %v2568_v16, %s3609_s13 }
 0xd45   :  { %2705 = vrot.lane.b32.xlu1 %v2568_v16, %s3610_s14 }
 0xd4c   :  { %2594 = vperm.xlu2 %3087, %v3120_v60   ;;  %2755 = vrot.lane.b32.xlu0 %v2568_v16, %s3611_s3 }
 0xd4d   :  { %2780 = vrot.lane.b32.xlu1 %v2568_v16, %s3612_s22  ;;  %v5020_v16 = vmax.f32 %v4638_v0, 0.0 }
 0xd54   :  { %2574 = vperm.xlu0 %3085, %v3121_v57   ;;  %3098 = vset.pattern.permute.xlu2 %v3613_v48  ;;  %v5021_v57 = vmax.f32 %v4655_v42, 0.0 }
 0xd55   :  { %2619 = vperm.xlu1 %3086, %v3120_v60   ;;  %2644 = vperm.xlu2 %3098, %v3120_v60  }
 0xd5c   :  { %3099 = vset.pattern.permute.xlu0 %v3614_v32 }
 0xd5d   :  { %3100 = vset.pattern.permute.xlu1 %v3615_v28  ;;  %2669 = vperm.xlu0 %3099, %v3120_v60  }
 0xd5e   :  { %2694 = vperm.xlu1 %3100, %v3120_v60   ;;  %3101 = vset.pattern.permute.xlu2 %v3616_v56 }
 0xd5f   :  { %2719 = vperm.xlu2 %3101, %v3120_v60  }
 0xd65   :  { %3104 = vset.pattern.permute.xlu0 %v3617_v17 }
 0xd66   :  { %3102 = vset.pattern.permute.xlu1 %v3618_v34  ;;  %2794 = vperm.xlu0 %3104, %v3120_v60  }
 0xd67   :  { %2744 = vperm.xlu1 %3102, %v3120_v60   ;;  %3103 = vset.pattern.permute.xlu2 %v3619_v4 }
 0xd68   :  { %2769 = vperm.xlu2 %3103, %v3120_v60  }
 0xd6d   :  { %s2977_s15 = spop %2976 }
 0xd6e   :  { %v2581_v21 = vstv %s2977_s15 }
 0xd6f   :  { %v2583_v62 = vmul.f32 %v2581_v21, %v5014_v8  ;;  %v2584_v36 = vmul.f32 %v2581_v21, %v5015_v3  ;;  %v2585_v15 = vmul.f32 %v2581_v21, %v5016_v50  ;;  %v2586_v13 = vmul.f32 %v2581_v21, %v5017_v25 }
 0xd71   :  { %v2587_v5 = vmax.f32 %v2583_v62, 0.0  ;;  %v2588_v29 = vmax.f32 %v2584_v36, 0.0  ;;  %v2589_v31 = vmax.f32 %v2585_v15, 0.0  ;;  %v2590_v40 = vmax.f32 %v2586_v13, 0.0 }
 0xd96   :  { %v2656_v59 = vpop.permute.xlu2 %2655 }
 0xd9e   :  { %v2731_v14 = vpop.permute.xlu2 %2730 }
 0xda6   :  { %v2595_v24 = vpop.permute.xlu2 %2594 }
 0xda7   :  { %v2597_v51 = vmul.f32 %v2595_v24, %v2587_v5  ;;  %v2598_v63 = vmul.f32 %v2595_v24, %v2588_v29  ;;  %v2599_v23 = vmul.f32 %v2595_v24, %v2589_v31  ;;  %v2600_v43 = vmul.f32 %v2595_v24, %v2590_v40 }
 0xda8   :  { %v5025_v24 = vmax.f32 %v4718_v52, 0.0 }
 0xdae   :  { %v2631_v11 = vpop.permute.xlu0 %2630 }
 0xdaf   :  { %v2606_v20 = vpop.permute.xlu1 %2605  ;;  %v2645_v29 = vpop.permute.xlu2 %2644 }
 0xdb0   :  { %2978 = vpush %v2606_v20 }
 0xdb1   :  { %2980 = vpush %v2631_v11 }
 0xdb2   :  { %2982 = vpush %v2656_v59 }
 0xdb6   :  { %v2681_v47 = vpop.permute.xlu0 %2680 }
 0xdb7   :  { %v2706_v35 = vpop.permute.xlu1 %2705  ;;  %2984 = vpush %v2681_v47 }
 0xdb8   :  { %2986 = vpush %v2706_v35 }
 0xdb9   :  { %2988 = vpush %v2731_v14 }
 0xdbe   :  { %v2756_v49 = vpop.permute.xlu0 %2755 }
 0xdbf   :  { %v2781_v22 = vpop.permute.xlu1 %2780  ;;  %2990 = vpush %v2756_v49 }
 0xdc0   :  { %2992 = vpush %v2781_v22 }
 0xdc6   :  { %v2575_v38 = vpop.permute.xlu0 %2574 }
 0xdc7   :  { %v2601_v12 = vadd.f32 %v2597_v51, %v2575_v38  ;;  %v2602_v44 = vadd.f32 %v2598_v63, %v2575_v38  ;;  %v2603_v32 = vadd.f32 %v2599_v23, %v2575_v38  ;;  %v2604_v28 = vadd.f32 %v2600_v43, %v2575_v38  ;;  %v2620_v34 = vpop.permute.xlu1 %2619 }
 0xdcf   :  { %v2670_v63 = vpop.permute.xlu0 %2669 }
 0xde1   :  { %s2979_s23 = spop %2978 }
 0xde2   :  { %v2608_v30 = vstv %s2979_s23  ;;  %s2981_s25 = spop %2980 }
 0xde3   :  { %v2610_v27 = vmul.f32 %v2608_v30, %v5018_v10  ;;  %v2611_v33 = vmul.f32 %v2608_v30, %v5019_v2  ;;  %v2612_v60 = vmul.f32 %v2608_v30, %v5020_v16  ;;  %v2613_v48 = vmul.f32 %v2608_v30, %v5021_v57  ;;  %s2983_s5 = spop %2982  ;;  %v2695_v10 = vpop.permute.xlu1 %2694 }
 0xde4   :  { %v2633_v56 = vstv %s2981_s25  ;;  %v2658_v17 = vstv %s2983_s5 }
 0xde5   :  { %v2614_v4 = vmax.f32 %v2610_v27, 0.0  ;;  %v2615_v59 = vmax.f32 %v2611_v33, 0.0  ;;  %v2616_v11 = vmax.f32 %v2612_v60, 0.0  ;;  %v2617_v45 = vmax.f32 %v2613_v48, 0.0 }
 0xde6   :  { %v2635_v20 = vmul.f32 %v2633_v56, %v3846_v39  ;;  %v2636_v55 = vmul.f32 %v2633_v56, %v3872_v53  ;;  %v2637_v0 = vmul.f32 %v2633_v56, %v3896_v58  ;;  %v2638_v47 = vmul.f32 %v2633_v56, %v3900_v61 }
 0xde7   :  { %v2622_v42 = vmul.f32 %v2620_v34, %v2614_v4  ;;  %v2623_v35 = vmul.f32 %v2620_v34, %v2615_v59  ;;  %v2624_v14 = vmul.f32 %v2620_v34, %v2616_v11  ;;  %v2625_v49 = vmul.f32 %v2620_v34, %v2617_v45 }
 0xde8   :  { %v2639_v22 = vmax.f32 %v2635_v20, 0.0  ;;  %v2640_v21 = vmax.f32 %v2636_v55, 0.0  ;;  %v2641_v8 = vmax.f32 %v2637_v0, 0.0  ;;  %v2642_v62 = vmax.f32 %v2638_v47, 0.0  ;;  %s2985_s2 = spop %2984 }
 0xde9   :  { %v2626_v3 = vadd.f32 %v2622_v42, %v2601_v12  ;;  %v2627_v36 = vadd.f32 %v2623_v35, %v2602_v44  ;;  %v2628_v50 = vadd.f32 %v2624_v14, %v2603_v32  ;;  %v2629_v15 = vadd.f32 %v2625_v49, %v2604_v28  ;;  %s2987_s24 = spop %2986 }
 0xdea   :  { %v5022_v39 = vmax.f32 %v4681_v37, 0.0  ;;  %v5023_v58 = vmax.f32 %v4662_v26, 0.0  ;;  %v5024_v61 = vmax.f32 %v4702_v9, 0.0  ;;  %v2663_v5 = vmul.f32 %v2658_v17, %v5025_v24  ;;  %s2989_s4 = spop %2988 }
 0xdeb   :  { %v2647_v31 = vmul.f32 %v2645_v29, %v2639_v22  ;;  %v2648_v38 = vmul.f32 %v2645_v29, %v2640_v21  ;;  %v2649_v40 = vmul.f32 %v2645_v29, %v2641_v8  ;;  %v2650_v51 = vmul.f32 %v2645_v29, %v2642_v62 }
 0xdec   :  { %v2660_v53 = vmul.f32 %v2658_v17, %v5022_v39  ;;  %v2661_v25 = vmul.f32 %v2658_v17, %v5023_v58  ;;  %v2662_v13 = vmul.f32 %v2658_v17, %v5024_v61  ;;  %v2667_v12 = vmax.f32 %v2663_v5, 0.0  ;;  %v5032_v39 = vld [vmem:[#allocation36_spill] sm:$0xff]  ;;  %v5036_v61 = vld [vmem:[#allocation39_spill] sm:$0xff] }
 0xded   :  { %v2651_v26 = vadd.f32 %v2647_v31, %v2626_v3  ;;  %v2652_v44 = vadd.f32 %v2648_v38, %v2627_v36  ;;  %v2653_v30 = vadd.f32 %v2649_v40, %v2628_v50  ;;  %v2654_v9 = vadd.f32 %v2650_v51, %v2629_v15  ;;  %v2720_v50 = vpop.permute.xlu2 %2719  ;;  %v2745_v40 = vpop.permute.xlu1 %2744 }
 0xdee   :  { %v2664_v23 = vmax.f32 %v2660_v53, 0.0  ;;  %v2665_v43 = vmax.f32 %v2661_v25, 0.0  ;;  %v2666_v37 = vmax.f32 %v2662_v13, 0.0  ;;  %v2675_v33 = vmul.f32 %v2670_v63, %v2667_v12 }
 0xdef   :  { %v2683_v16 = vstv %s2985_s2  ;;  %v2708_v60 = vstv %s2987_s24  ;;  %v2733_v57 = vstv %s2989_s4  ;;  %v5026_v17 = vmax.f32 %v4690_v41, 0.0 }
 0xdf0   :  { %v2672_v27 = vmul.f32 %v2670_v63, %v2664_v23  ;;  %v2673_v52 = vmul.f32 %v2670_v63, %v2665_v43  ;;  %v2674_v2 = vmul.f32 %v2670_v63, %v2666_v37  ;;  %v2679_v56 = vadd.f32 %v2675_v33, %v2654_v9  ;;  %s2991_s26 = spop %2990 }
 0xdf1   :  { %v2685_v34 = vmul.f32 %v2683_v16, %v5026_v17  ;;  %v5027_v4 = vmax.f32 %v4696_v6, 0.0  ;;  %v5028_v11 = vmax.f32 %v4709_v1, 0.0  ;;  %v5029_v20 = vmax.f32 %v4726_v18, 0.0  ;;  %s2993_s27 = spop %2992  ;;  %v5038_v17 = vld [vmem:[#allocation40_spill] sm:$0xff] }
 0xdf2   :  { %v2676_v48 = vadd.f32 %v2672_v27, %v2651_v26  ;;  %v2677_v32 = vadd.f32 %v2673_v52, %v2652_v44  ;;  %v2678_v28 = vadd.f32 %v2674_v2, %v2653_v30  ;;  %v2710_v0 = vmul.f32 %v2708_v60, %v4166_v7  ;;  %v5030_v7 = vld [vmem:[#allocation37_spill] sm:$0xff] }
 0xdf3   :  { %v2686_v59 = vmul.f32 %v2683_v16, %v5027_v4  ;;  %v2687_v45 = vmul.f32 %v2683_v16, %v5028_v11  ;;  %v2688_v55 = vmul.f32 %v2683_v16, %v5029_v20  ;;  %v2711_v47 = vmul.f32 %v2708_v60, %v4179_v19  ;;  %v5042_v20 = vld [vmem:[#allocation42_spill] sm:$0xff] }
 0xdf4   :  { %v2712_v42 = vmul.f32 %v2708_v60, %v4195_v46  ;;  %v2713_v35 = vmul.f32 %v2708_v60, %v4202_v54  ;;  %v2689_v14 = vmax.f32 %v2685_v34, 0.0  ;;  %v2714_v6 = vmax.f32 %v2710_v0, 0.0  ;;  %v5034_v54 = vld [vmem:[#allocation38_spill] sm:$0xff] }
 0xdf5   :  { %v2690_v41 = vmax.f32 %v2686_v59, 0.0  ;;  %v2691_v49 = vmax.f32 %v2687_v45, 0.0  ;;  %v2692_v22 = vmax.f32 %v2688_v55, 0.0  ;;  %v2715_v21 = vmax.f32 %v2711_v47, 0.0  ;;  %v5040_v59 = vld [vmem:[#allocation41_spill] sm:$0xff]  ;;  %v5044_v47 = vld [vmem:[#allocation43_spill] sm:$0xff] }
 0xdf6   :  { %v2716_v8 = vmax.f32 %v2712_v42, 0.0  ;;  %v2717_v1 = vmax.f32 %v2713_v35, 0.0  ;;  %v2697_v62 = vmul.f32 %v2695_v10, %v2689_v14  ;;  %v5031_v15 = vmax.f32 %v5030_v7, 0.0  ;;  %v5046_v14 = vld [vmem:[#allocation32_spill] sm:$0xff]  ;;  %v2795_v7 = vpop.permute.xlu0 %2794 }
 0xdf7   :  { %v2698_v3 = vmul.f32 %v2695_v10, %v2690_v41  ;;  %v2699_v18 = vmul.f32 %v2695_v10, %v2691_v49  ;;  %v2700_v36 = vmul.f32 %v2695_v10, %v2692_v22  ;;  %v5033_v46 = vmax.f32 %v5032_v39, 0.0  ;;  %v5047_v49 = vld [vmem:[#allocation33_spill] sm:$0xff] }
 0xdf8   :  { %v2735_v19 = vmul.f32 %v2733_v57, %v5031_v15  ;;  %v5035_v58 = vmax.f32 %v5034_v54, 0.0  ;;  %v5037_v13 = vmax.f32 %v5036_v61, 0.0  ;;  %v2701_v5 = vadd.f32 %v2697_v62, %v2676_v48  ;;  %v2770_v62 = vpop.permute.xlu2 %2769 }
 0xdf9   :  { %v2736_v53 = vmul.f32 %v2733_v57, %v5033_v46  ;;  %v2702_v29 = vadd.f32 %v2698_v3, %v2677_v32  ;;  %v2703_v31 = vadd.f32 %v2699_v18, %v2678_v28  ;;  %v2704_v38 = vadd.f32 %v2700_v36, %v2679_v56 }
 0xdfa   :  { %v2737_v25 = vmul.f32 %v2733_v57, %v5035_v58  ;;  %v2738_v24 = vmul.f32 %v2733_v57, %v5037_v13  ;;  %v2739_v51 = vmax.f32 %v2735_v19, 0.0  ;;  %v2722_v37 = vmul.f32 %v2720_v50, %v2714_v6  ;;  %v5048_v6 = vld [vmem:[#allocation34_spill] sm:$0xff] }
 0xdfb   :  { %v2740_v63 = vmax.f32 %v2736_v53, 0.0  ;;  %v2723_v12 = vmul.f32 %v2720_v50, %v2715_v21  ;;  %v2724_v26 = vmul.f32 %v2720_v50, %v2716_v8  ;;  %v2725_v44 = vmul.f32 %v2720_v50, %v2717_v1  ;;  %v5049_v8 = vld [vmem:[#allocation35_spill] sm:$0xff] }
 0xdfc   :  { %v2741_v23 = vmax.f32 %v2737_v25, 0.0  ;;  %v2742_v43 = vmax.f32 %v2738_v24, 0.0  ;;  %v2747_v30 = vmul.f32 %v2745_v40, %v2739_v51  ;;  %v2726_v52 = vadd.f32 %v2722_v37, %v2701_v5 }
 0xdfd   :  { %v2748_v9 = vmul.f32 %v2745_v40, %v2740_v63  ;;  %v2727_v2 = vadd.f32 %v2723_v12, %v2702_v29  ;;  %v2728_v33 = vadd.f32 %v2724_v26, %v2703_v31  ;;  %v2729_v16 = vadd.f32 %v2725_v44, %v2704_v38 }
 0xdfe   :  { %v2749_v10 = vmul.f32 %v2745_v40, %v2741_v23  ;;  %v2750_v27 = vmul.f32 %v2745_v40, %v2742_v43  ;;  %v2758_v60 = vstv %s2991_s26  ;;  %v2783_v57 = vstv %s2993_s27 }
 0xdff   :  { %v2751_v48 = vadd.f32 %v2747_v30, %v2726_v52  ;;  %v2752_v32 = vadd.f32 %v2748_v9, %v2727_v2  ;;  %v5039_v34 = vmax.f32 %v5038_v17, 0.0  ;;  %v5041_v11 = vmax.f32 %v5040_v59, 0.0 }
 0xe00   :  { %v2753_v28 = vadd.f32 %v2749_v10, %v2728_v33  ;;  %v2754_v56 = vadd.f32 %v2750_v27, %v2729_v16  ;;  %v5043_v55 = vmax.f32 %v5042_v20, 0.0  ;;  %v5045_v42 = vmax.f32 %v5044_v47, 0.0 }
 0xe01   :  { %v2760_v4 = vmul.f32 %v2758_v60, %v5039_v34  ;;  %v2761_v45 = vmul.f32 %v2758_v60, %v5041_v11  ;;  %v2785_v41 = vmul.f32 %v2783_v57, %v5046_v14  ;;  %v2786_v22 = vmul.f32 %v2783_v57, %v5047_v49 }
 0xe02   :  { %v2762_v0 = vmul.f32 %v2758_v60, %v5043_v55  ;;  %v2763_v35 = vmul.f32 %v2758_v60, %v5045_v42  ;;  %v2787_v21 = vmul.f32 %v2783_v57, %v5048_v6  ;;  %v2788_v1 = vmul.f32 %v2783_v57, %v5049_v8 }
 0xe03   :  { %v2764_v3 = vmax.f32 %v2760_v4, 0.0  ;;  %v2765_v18 = vmax.f32 %v2761_v45, 0.0  ;;  %v2789_v15 = vmax.f32 %v2785_v41, 0.0  ;;  %v2790_v19 = vmax.f32 %v2786_v22, 0.0 }
 0xe04   :  { %v2766_v36 = vmax.f32 %v2762_v0, 0.0  ;;  %v2767_v50 = vmax.f32 %v2763_v35, 0.0  ;;  %v2791_v39 = vmax.f32 %v2787_v21, 0.0  ;;  %v2792_v46 = vmax.f32 %v2788_v1, 0.0 }
 0xe05   :  { %v2772_v53 = vmul.f32 %v2770_v62, %v2764_v3  ;;  %v2773_v54 = vmul.f32 %v2770_v62, %v2765_v18  ;;  %v2797_v61 = vmul.f32 %v2795_v7, %v2789_v15  ;;  %v2798_v13 = vmul.f32 %v2795_v7, %v2790_v19 }
 0xe06   :  { %v2774_v58 = vmul.f32 %v2770_v62, %v2766_v36  ;;  %v2775_v25 = vmul.f32 %v2770_v62, %v2767_v50  ;;  %v2799_v24 = vmul.f32 %v2795_v7, %v2791_v39  ;;  %v2800_v40 = vmul.f32 %v2795_v7, %v2792_v46 }
 0xe07   :  { %v2776_v5 = vadd.f32 %v2772_v53, %v2751_v48  ;;  %v2777_v29 = vadd.f32 %v2773_v54, %v2752_v32 }
 0xe08   :  { %v2778_v31 = vadd.f32 %v2774_v58, %v2753_v28  ;;  %v2779_v38 = vadd.f32 %v2775_v25, %v2754_v56 }
 0xe09   :  { %v2801_v51 = vadd.f32 %v2797_v61, %v2776_v5  ;;  %v2802_v63 = vadd.f32 %v2798_v13, %v2777_v29 }
 0xe0a   :  { %v2803_v23 = vadd.f32 %v2799_v24, %v2778_v31  ;;  %v2804_v43 = vadd.f32 %v2800_v40, %v2779_v38 }
 0xe0b   :  { %2805 = vst.msk [vmem:[#allocation23] sm:$0xff] %vm250_vm0, %v2801_v51 }
 0xe0c   :  { %2806 = vst.msk [vmem:[#allocation23 + $0x8] sm:$0xff] %vm250_vm0, %v2802_v63 }
 0xe0d   :  { %2807 = vst.msk [vmem:[#allocation23 + $0x10] sm:$0xff] %vm250_vm0, %v2803_v23 }
 0xe0e   :  { %2808 = vst.msk [vmem:[#allocation23 + $0x18] sm:$0xff] %vm250_vm0, %v2804_v43 }
 0xe0f   :  { %2821 = dma.vmem_to_hbm [thread:$0]  %s2814_s8, 512, %s2816_s0, [#allocation5], %s3585_s1, %s3585_s1, %s3586_s20  }
 0xe10   :  { %3582 = dma.done.wait [#allocation5], 512  }
 0xe11   :  { %3583 = vsyncadd [#allocation5], 4294966784 }
 0xe12   :  { %2826 = vsyncpa [#allocation4], 1 }
 0xe13   :  { %2827 = vsyncpa [#allocation7], 1 }
 0xe14   :  { %2828 = vsyncpa [#allocation10], 1 }
 0xe15   :  { %2829 = vsyncpa [#allocation13], 1 }
 0xe16   :  { %2830 = vsyncpa [#allocation16], 1 }
 0xe17   :  { %2831 = vsyncpa [#allocation19], 1 }
 0xe18   :  { %2832 = vsyncpa [#allocation22], 1 }
 0xe19   :  { %2833 = vsyncpa [#allocation5], 1 }

</bundles_post_ra>
